<compile_context>
chip_gen: v6e
topology: v6e:2x2x1
jax: 0.10.0
libtpu: 0.0.40
codegen_flags: <defaults>
</compile_context>

<pallas_src>
import functools

import jax
import jax.numpy as jnp
from jax.experimental import pallas as pl
from jax.experimental.pallas import tpu as pltpu

C1, C2, NH = 16, 32, 16      # conv1 / conv2 out-channels, FC hidden width
KS = 3                       # conv & pool kernel size
H_IN = 28                    # spatial size implied by Linear(32*2*2, 16)
H1 = H_IN - KS + 1           # 26 (conv1 valid size; only 24 rows/cols feed pool1)
P1 = H1 // KS                # 8  (pool1 out)
HP = P1 * KS                 # 24 (conv1 rows/cols actually consumed by pool1)
H2 = P1 - KS + 1             # 6  (conv2 out)
P2 = H2 // KS                # 2  (pool2 out)
W2PAD = 8                    # conv2 output width padded to 8 (aligned reshapes)
P1PAD = 16                   # pool1 staging width (>= W2PAD + KS - 1 = 10), 8-aligned
TB_CAP = 128                 # images per grid step (VMEM-safe on v7x's 64 MiB)


# ----------------------------------------------------------------------------
# Fused kernel: conv1 -> pool1 -> conv2+ReLU -> pool2+FC1+ReLU -> FC2
# Processes TB images per grid step; everything lives in VMEM.
# ----------------------------------------------------------------------------
def _cnn_kernel(x_ref, w1_ref, b1_ref, w2_ref, b2_ref, w3_ref, b3_ref,
                w4_ref, b4_ref, out_ref, p1_ref, *, tb, cin):
    f32 = jnp.float32

    # ---- conv1 (3x3 valid) + pool1 (3x3 / stride 3), values only ----------
    # Only the 24x24 conv outputs used by pool1 are computed.  For each
    # column phase dw (output col w = 3*j + dw), an im2col patch
    # (tb*24*8, 9*cin) is built with sublane-strided loads straight from the
    # input block and fed to ONE MXU matmul; pooling over W is then just an
    # elementwise max of the 3 phase results (rows stay ordered (b, h, j)).
    wmax = None
    for dw in range(KS):
        cols = [x_ref[:, kh:kh + HP, pl.ds(dw + kw, P1, KS), :]   # (tb,24,8,cin)
                for kh in range(KS) for kw in range(KS)]
        pat = jnp.concatenate(cols, axis=-1)                      # (tb,24,8,9*cin)
        pat = pat.reshape(tb * HP * P1, KS * KS * cin)            # aligned merge
        z = jnp.dot(pat, w1_ref[...], preferred_element_type=f32)
        wmax = z if wmax is None else jnp.maximum(wmax, z)        # W pooling

    # Pool over H: rows are (b, h, j) with h = 3*i + dh -> aligned split.
    y = wmax.reshape(tb, P1, KS, P1, C1)                          # (tb,8,3,8,16)
    hmax = jnp.maximum(jnp.maximum(y[:, :, 0], y[:, :, 1]), y[:, :, 2])
    p1 = jnp.maximum(hmax + b1_ref[...], 0.0)      # bias+ReLU commute with max

    # Stage pool1 output in an aligned scratch (width padded to 16, pad
    # zeroed) so conv2's im2col slices keep an 8-wide sublane dim.
    p1_ref[:, :, 0:P1, :] = p1
    p1_ref[:, :, P1:P1PAD, :] = jnp.zeros((tb, P1, P1PAD - P1, C1), f32)

    # ---- conv2 (3x3 valid) + bias + ReLU: one im2col matmul ----------------
    cols2 = [p1_ref[:, kh:kh + H2, kw:kw + W2PAD, :]              # (tb,6,8,16)
             for kh in range(KS) for kw in range(KS)]
    pat2 = jnp.concatenate(cols2, axis=-1)                        # (tb,6,8,144)
    pat2 = pat2.reshape(tb * H2 * W2PAD, KS * KS * C1)            # aligned merge
    y2 = jnp.dot(pat2, w2_ref[...], preferred_element_type=f32) + b2_ref[...]
    y2 = jnp.maximum(y2, 0.0).reshape(tb, H2, W2PAD, C2)  # cols 6,7 = unused pad

    # ---- pool2 (3x3 / stride 3) fused with Linear(128,16) ------------------
    hid = b3_ref[...]                                             # (1, NH)
    for i in range(P2):
        for j in range(P2):
            win = y2[:, KS * i:KS * i + KS, KS * j:KS * j + KS, :]   # (tb,3,3,32)
            m = jnp.max(jnp.max(win, axis=2), axis=1)                # (tb,32)
            hid = hid + jnp.dot(m, w3_ref[i * P2 + j],
                                preferred_element_type=f32)
    hid = jnp.maximum(hid, 0.0)                                   # (tb, NH)

    # ---- Linear(16, nc), one writeback per TB images ------------------------
    logits = jnp.dot(hid, w4_ref[...], preferred_element_type=f32) + b4_ref[...]
    out_ref[...] = logits[None]                                   # (1, tb, nc)


# ----------------------------------------------------------------------------
# Parameter prep (once): rearrange PyTorch-layout weights for the kernel.
# ----------------------------------------------------------------------------
def prep_params(params):
    w1, b1, w2, b2, w3, b3, w4, b4 = params
    cin = w1.shape[1]
    nc = w4.shape[0]
    # conv weights: OIHW -> (kh, kw, Cin, Cout) -> (9*Cin, Cout)
    w1b = jnp.transpose(w1, (2, 3, 1, 0)).reshape(KS * KS * cin, C1)
    w2b = jnp.transpose(w2, (2, 3, 1, 0)).reshape(KS * KS * C1, C2)
    # FC1: PyTorch flatten order is (C,H,W); kernel consumes per-(h,w) blocks:
    # w3b[h*2+w, c, o] = w3[o, c*4 + h*2 + w]
    w3b = jnp.transpose(w3.reshape(NH, C2, P2, P2), (2, 3, 1, 0))
    w3b = w3b.reshape(P2 * P2, C2, NH)
    w4b = jnp.transpose(w4)                                       # (NH, nc)
    return (w1b, b1.reshape(1, C1), w2b, b2.reshape(1, C2),
            w3b, b3.reshape(1, NH), w4b, b4.reshape(1, nc))


# ----------------------------------------------------------------------------
# Forward (matches CNNClassifier.forward); input is NCHW like the PyTorch model
# ----------------------------------------------------------------------------
@jax.jit
def cnn_forward(x_nchw, prepped):
    w1b, b1, w2b, b2, w3b, b3, w4b, b4 = prepped
    B, cin, H, W = x_nchw.shape
    nc = b4.shape[-1]
    assert H == H_IN and W == H_IN, "Linear(32*2*2,16) requires 28x28 inputs"

    # TB images per step: large enough to amortize per-step launch/DMA
    # overhead, capped for v7x VMEM, and >= 2 grid steps whenever B >= 2 so
    # both v7x TensorCores get work.
    tb = min(TB_CAP, max(1, (B + 1) // 2))
    nblk = -(-B // tb)
    bp = nblk * tb

    x = jnp.transpose(x_nchw, (0, 2, 3, 1)).astype(jnp.float32)   # NHWC
    if bp != B:
        x = jnp.pad(x, ((0, bp - B), (0, 0), (0, 0), (0, 0)))

    kernel = functools.partial(_cnn_kernel, tb=tb, cin=cin)
    out = pl.pallas_call(
        kernel,
        out_shape=jax.ShapeDtypeStruct((nblk, tb, nc), jnp.float32),
        grid=(nblk,),
        in_specs=[
            pl.BlockSpec((tb, H_IN, H_IN, cin), lambda b: (b, 0, 0, 0)),
            pl.BlockSpec((KS * KS * cin, C1), lambda b: (0, 0)),
            pl.BlockSpec((1, C1), lambda b: (0, 0)),
            pl.BlockSpec((KS * KS * C1, C2), lambda b: (0, 0)),
            pl.BlockSpec((1, C2), lambda b: (0, 0)),
            pl.BlockSpec((P2 * P2, C2, NH), lambda b: (0, 0, 0)),
            pl.BlockSpec((1, NH), lambda b: (0, 0)),
            pl.BlockSpec((NH, nc), lambda b: (0, 0)),
            pl.BlockSpec((1, nc), lambda b: (0, 0)),
        ],
        out_specs=pl.BlockSpec((1, tb, nc), lambda b: (b, 0, 0)),
        scratch_shapes=[pltpu.VMEM((tb, P1, P1PAD, C1), jnp.float32)],
        compiler_params=pltpu.CompilerParams(
            dimension_semantics=("parallel",),
            vmem_limit_bytes=48 * 1024 * 1024),
    )(x, w1b, b1, w2b, b2, w3b, b3, w4b, b4)
    return out.reshape(bp, nc)[:B]


# ----------------------------------------------------------------------------
# Pure-JAX reference (for correctness check)
# ----------------------------------------------------------------------------
def reference_forward(x, params):
    w1, b1, w2, b2, w3, b3, w4, b4 = params
    dn = ("NCHW", "OIHW", "NCHW")
    y = jax.lax.conv_general_dilated(x, w1, (1, 1), "VALID", dimension_numbers=dn)
    y = jnp.maximum(y + b1[None, :, None, None], 0.0)
    y = jax.lax.reduce_window(y, -jnp.inf, jax.lax.max, (1, 1, 3, 3), (1, 1, 3, 3), "VALID")
    y = jax.lax.conv_general_dilated(y, w2, (1, 1), "VALID", dimension_numbers=dn)
    y = jnp.maximum(y + b2[None, :, None, None], 0.0)
    y = jax.lax.reduce_window(y, -jnp.inf, jax.lax.max, (1, 1, 3, 3), (1, 1, 3, 3), "VALID")
    y = y.reshape(y.shape[0], -1)
    y = jnp.maximum(y @ w3.T + b3, 0.0)
    return y @ w4.T + b4


def init_params(key, in_channels, no_classes):
    ks = jax.random.split(key, 8)
    f32 = jnp.float32
    w1 = 0.1 * jax.random.normal(ks[0], (C1, in_channels, 3, 3), f32)
    b1 = 0.1 * jax.random.normal(ks[1], (C1,), f32)
    w2 = 0.1 * jax.random.normal(ks[2], (C2, C1, 3, 3), f32)
    b2 = 0.1 * jax.random.normal(ks[3], (C2,), f32)
    w3 = 0.1 * jax.random.normal(ks[4], (NH, C2 * P2 * P2), f32)   # PyTorch (out,in)
    b3 = 0.1 * jax.random.normal(ks[5], (NH,), f32)
    w4 = 0.1 * jax.random.normal(ks[6], (no_classes, NH), f32)
    b4 = 0.1 * jax.random.normal(ks[7], (no_classes,), f32)
    return (w1, b1, w2, b2, w3, b3, w4, b4)


if __name__ == "__main__":
    key = jax.random.PRNGKey(0)
    in_channels, no_classes = 3, 10
    B = 2                                   # 28x28 required by Linear(32*2*2,16)

    pkey, xkey = jax.random.split(key)
    params = init_params(pkey, in_channels, no_classes)
    prepped = prep_params(params)
    x = jax.random.normal(xkey, (B, in_channels, H_IN, H_IN), jnp.float32)

    out = cnn_forward(x, prepped)
    jax.block_until_ready(out)
    assert out.shape == (B, no_classes) and out.dtype == jnp.float32

    ref = reference_forward(x, params)
    err = float(jnp.max(jnp.abs(out - ref)))
    assert err < 1e-3, f"mismatch vs reference: {err}"

    print("KERNEL_OK")
</pallas_src>

<mosaic_0001>
module attributes {stable_mosaic.version = 11 : i64} {
  func.func @_cnn_kernel(%arg0: i32, %arg1: memref<1x28x28x3xf32, #tpu.memory_space<vmem>>, %arg2: memref<27x16xf32, #tpu.memory_space<vmem>>, %arg3: memref<1x16xf32, #tpu.memory_space<vmem>>, %arg4: memref<144x32xf32, #tpu.memory_space<vmem>>, %arg5: memref<1x32xf32, #tpu.memory_space<vmem>>, %arg6: memref<4x32x16xf32, #tpu.memory_space<vmem>>, %arg7: memref<1x16xf32, #tpu.memory_space<vmem>>, %arg8: memref<16x10xf32, #tpu.memory_space<vmem>>, %arg9: memref<1x10xf32, #tpu.memory_space<vmem>>, %arg10: memref<1x1x10xf32, #tpu.memory_space<vmem>>, %arg11: memref<1x8x16x16xf32, #tpu.memory_space<vmem>>) attributes {dimension_semantics = [#tpu.dimension_semantics<parallel>], iteration_bounds = array<i64: 2>, scalar_prefetch = 0 : i64, scratch_operands = 1 : i64, tpu.core_type = #tpu.core_type<tc>, window_params = [{transform_indices = @transform_0, window_bounds = array<i64: 1, 28, 28, 3>}, {pipeline_mode = #tpu.pipeline_mode<synchronous>, transform_indices = @transform_1, window_bounds = array<i64: 27, 16>}, {pipeline_mode = #tpu.pipeline_mode<synchronous>, transform_indices = @transform_2, window_bounds = array<i64: 1, 16>}, {pipeline_mode = #tpu.pipeline_mode<synchronous>, transform_indices = @transform_3, window_bounds = array<i64: 144, 32>}, {pipeline_mode = #tpu.pipeline_mode<synchronous>, transform_indices = @transform_4, window_bounds = array<i64: 1, 32>}, {pipeline_mode = #tpu.pipeline_mode<synchronous>, transform_indices = @transform_5, window_bounds = array<i64: 4, 32, 16>}, {pipeline_mode = #tpu.pipeline_mode<synchronous>, transform_indices = @transform_6, window_bounds = array<i64: 1, 16>}, {pipeline_mode = #tpu.pipeline_mode<synchronous>, transform_indices = @transform_7, window_bounds = array<i64: 16, 10>}, {pipeline_mode = #tpu.pipeline_mode<synchronous>, transform_indices = @transform_8, window_bounds = array<i64: 1, 10>}, {transform_indices = @transform_9, window_bounds = array<i64: 1, 1, 10>}]} {
    %c0 = arith.constant 0 : index
    %c0_0 = arith.constant 0 : index
    %c0_1 = arith.constant 0 : index
    %c0_2 = arith.constant 0 : index
    %0 = tpu.strided_load %arg1[%c0, %c0_0, %c0_1, %c0_2] {strides = array<i32: 1, 1, 3, 1>} : memref<1x28x28x3xf32, #tpu.memory_space<vmem>>, vector<1x24x8x3xf32>
    %c0_3 = arith.constant 0 : index
    %c0_4 = arith.constant 0 : index
    %c1 = arith.constant 1 : index
    %c0_5 = arith.constant 0 : index
    %1 = tpu.strided_load %arg1[%c0_3, %c0_4, %c1, %c0_5] {strides = array<i32: 1, 1, 3, 1>} : memref<1x28x28x3xf32, #tpu.memory_space<vmem>>, vector<1x24x8x3xf32>
    %c0_6 = arith.constant 0 : index
    %c0_7 = arith.constant 0 : index
    %c2 = arith.constant 2 : index
    %c0_8 = arith.constant 0 : index
    %2 = tpu.strided_load %arg1[%c0_6, %c0_7, %c2, %c0_8] {strides = array<i32: 1, 1, 3, 1>} : memref<1x28x28x3xf32, #tpu.memory_space<vmem>>, vector<1x24x8x3xf32>
    %c0_9 = arith.constant 0 : index
    %c1_10 = arith.constant 1 : index
    %c0_11 = arith.constant 0 : index
    %c0_12 = arith.constant 0 : index
    %3 = tpu.strided_load %arg1[%c0_9, %c1_10, %c0_11, %c0_12] {strides = array<i32: 1, 1, 3, 1>} : memref<1x28x28x3xf32, #tpu.memory_space<vmem>>, vector<1x24x8x3xf32>
    %c0_13 = arith.constant 0 : index
    %c1_14 = arith.constant 1 : index
    %c1_15 = arith.constant 1 : index
    %c0_16 = arith.constant 0 : index
    %4 = tpu.strided_load %arg1[%c0_13, %c1_14, %c1_15, %c0_16] {strides = array<i32: 1, 1, 3, 1>} : memref<1x28x28x3xf32, #tpu.memory_space<vmem>>, vector<1x24x8x3xf32>
    %c0_17 = arith.constant 0 : index
    %c1_18 = arith.constant 1 : index
    %c2_19 = arith.constant 2 : index
    %c0_20 = arith.constant 0 : index
    %5 = tpu.strided_load %arg1[%c0_17, %c1_18, %c2_19, %c0_20] {strides = array<i32: 1, 1, 3, 1>} : memref<1x28x28x3xf32, #tpu.memory_space<vmem>>, vector<1x24x8x3xf32>
    %c0_21 = arith.constant 0 : index
    %c2_22 = arith.constant 2 : index
    %c0_23 = arith.constant 0 : index
    %c0_24 = arith.constant 0 : index
    %6 = tpu.strided_load %arg1[%c0_21, %c2_22, %c0_23, %c0_24] {strides = array<i32: 1, 1, 3, 1>} : memref<1x28x28x3xf32, #tpu.memory_space<vmem>>, vector<1x24x8x3xf32>
    %c0_25 = arith.constant 0 : index
    %c2_26 = arith.constant 2 : index
    %c1_27 = arith.constant 1 : index
    %c0_28 = arith.constant 0 : index
    %7 = tpu.strided_load %arg1[%c0_25, %c2_26, %c1_27, %c0_28] {strides = array<i32: 1, 1, 3, 1>} : memref<1x28x28x3xf32, #tpu.memory_space<vmem>>, vector<1x24x8x3xf32>
    %c0_29 = arith.constant 0 : index
    %c2_30 = arith.constant 2 : index
    %c2_31 = arith.constant 2 : index
    %c0_32 = arith.constant 0 : index
    %8 = tpu.strided_load %arg1[%c0_29, %c2_30, %c2_31, %c0_32] {strides = array<i32: 1, 1, 3, 1>} : memref<1x28x28x3xf32, #tpu.memory_space<vmem>>, vector<1x24x8x3xf32>
    %9 = tpu.concatenate %0, %1, %2, %3, %4, %5, %6, %7, %8 in 3 : vector<1x24x8x3xf32>, vector<1x24x8x3xf32>, vector<1x24x8x3xf32>, vector<1x24x8x3xf32>, vector<1x24x8x3xf32>, vector<1x24x8x3xf32>, vector<1x24x8x3xf32>, vector<1x24x8x3xf32>, vector<1x24x8x3xf32> -> vector<1x24x8x27xf32>
    %10 = vector.shape_cast %9 : vector<1x24x8x27xf32> to vector<192x27xf32>
    %c0_33 = arith.constant 0 : index
    %c0_34 = arith.constant 0 : index
    %11 = vector.load %arg2[%c0_33, %c0_34] : memref<27x16xf32, #tpu.memory_space<vmem>>, vector<27x16xf32>
    %cst = arith.constant dense<0.000000e+00> : vector<192x16xf32>
    %12 = tpu.matmul %10, %11, %cst {dimension_numbers = #tpu.dot_dimension_numbers<[1], [0], [0], [1], [0, 0, 1, 1], [], []>} : vector<192x27xf32>, vector<27x16xf32>, vector<192x16xf32> -> vector<192x16xf32>
    %c0_35 = arith.constant 0 : index
    %c0_36 = arith.constant 0 : index
    %c1_37 = arith.constant 1 : index
    %c0_38 = arith.constant 0 : index
    %13 = tpu.strided_load %arg1[%c0_35, %c0_36, %c1_37, %c0_38] {strides = array<i32: 1, 1, 3, 1>} : memref<1x28x28x3xf32, #tpu.memory_space<vmem>>, vector<1x24x8x3xf32>
    %c0_39 = arith.constant 0 : index
    %c0_40 = arith.constant 0 : index
    %c2_41 = arith.constant 2 : index
    %c0_42 = arith.constant 0 : index
    %14 = tpu.strided_load %arg1[%c0_39, %c0_40, %c2_41, %c0_42] {strides = array<i32: 1, 1, 3, 1>} : memref<1x28x28x3xf32, #tpu.memory_space<vmem>>, vector<1x24x8x3xf32>
    %c0_43 = arith.constant 0 : index
    %c0_44 = arith.constant 0 : index
    %c3 = arith.constant 3 : index
    %c0_45 = arith.constant 0 : index
    %15 = tpu.strided_load %arg1[%c0_43, %c0_44, %c3, %c0_45] {strides = array<i32: 1, 1, 3, 1>} : memref<1x28x28x3xf32, #tpu.memory_space<vmem>>, vector<1x24x8x3xf32>
    %c0_46 = arith.constant 0 : index
    %c1_47 = arith.constant 1 : index
    %c1_48 = arith.constant 1 : index
    %c0_49 = arith.constant 0 : index
    %16 = tpu.strided_load %arg1[%c0_46, %c1_47, %c1_48, %c0_49] {strides = array<i32: 1, 1, 3, 1>} : memref<1x28x28x3xf32, #tpu.memory_space<vmem>>, vector<1x24x8x3xf32>
    %c0_50 = arith.constant 0 : index
    %c1_51 = arith.constant 1 : index
    %c2_52 = arith.constant 2 : index
    %c0_53 = arith.constant 0 : index
    %17 = tpu.strided_load %arg1[%c0_50, %c1_51, %c2_52, %c0_53] {strides = array<i32: 1, 1, 3, 1>} : memref<1x28x28x3xf32, #tpu.memory_space<vmem>>, vector<1x24x8x3xf32>
    %c0_54 = arith.constant 0 : index
    %c1_55 = arith.constant 1 : index
    %c3_56 = arith.constant 3 : index
    %c0_57 = arith.constant 0 : index
    %18 = tpu.strided_load %arg1[%c0_54, %c1_55, %c3_56, %c0_57] {strides = array<i32: 1, 1, 3, 1>} : memref<1x28x28x3xf32, #tpu.memory_space<vmem>>, vector<1x24x8x3xf32>
    %c0_58 = arith.constant 0 : index
    %c2_59 = arith.constant 2 : index
    %c1_60 = arith.constant 1 : index
    %c0_61 = arith.constant 0 : index
    %19 = tpu.strided_load %arg1[%c0_58, %c2_59, %c1_60, %c0_61] {strides = array<i32: 1, 1, 3, 1>} : memref<1x28x28x3xf32, #tpu.memory_space<vmem>>, vector<1x24x8x3xf32>
    %c0_62 = arith.constant 0 : index
    %c2_63 = arith.constant 2 : index
    %c2_64 = arith.constant 2 : index
    %c0_65 = arith.constant 0 : index
    %20 = tpu.strided_load %arg1[%c0_62, %c2_63, %c2_64, %c0_65] {strides = array<i32: 1, 1, 3, 1>} : memref<1x28x28x3xf32, #tpu.memory_space<vmem>>, vector<1x24x8x3xf32>
    %c0_66 = arith.constant 0 : index
    %c2_67 = arith.constant 2 : index
    %c3_68 = arith.constant 3 : index
    %c0_69 = arith.constant 0 : index
    %21 = tpu.strided_load %arg1[%c0_66, %c2_67, %c3_68, %c0_69] {strides = array<i32: 1, 1, 3, 1>} : memref<1x28x28x3xf32, #tpu.memory_space<vmem>>, vector<1x24x8x3xf32>
    %22 = tpu.concatenate %13, %14, %15, %16, %17, %18, %19, %20, %21 in 3 : vector<1x24x8x3xf32>, vector<1x24x8x3xf32>, vector<1x24x8x3xf32>, vector<1x24x8x3xf32>, vector<1x24x8x3xf32>, vector<1x24x8x3xf32>, vector<1x24x8x3xf32>, vector<1x24x8x3xf32>, vector<1x24x8x3xf32> -> vector<1x24x8x27xf32>
    %23 = vector.shape_cast %22 : vector<1x24x8x27xf32> to vector<192x27xf32>
    %c0_70 = arith.constant 0 : index
    %c0_71 = arith.constant 0 : index
    %24 = vector.load %arg2[%c0_70, %c0_71] : memref<27x16xf32, #tpu.memory_space<vmem>>, vector<27x16xf32>
    %cst_72 = arith.constant dense<0.000000e+00> : vector<192x16xf32>
    %25 = tpu.matmul %23, %24, %cst_72 {dimension_numbers = #tpu.dot_dimension_numbers<[1], [0], [0], [1], [0, 0, 1, 1], [], []>} : vector<192x27xf32>, vector<27x16xf32>, vector<192x16xf32> -> vector<192x16xf32>
    %26 = arith.maximumf %12, %25 : vector<192x16xf32>
    %c0_73 = arith.constant 0 : index
    %c0_74 = arith.constant 0 : index
    %c2_75 = arith.constant 2 : index
    %c0_76 = arith.constant 0 : index
    %27 = tpu.strided_load %arg1[%c0_73, %c0_74, %c2_75, %c0_76] {strides = array<i32: 1, 1, 3, 1>} : memref<1x28x28x3xf32, #tpu.memory_space<vmem>>, vector<1x24x8x3xf32>
    %c0_77 = arith.constant 0 : index
    %c0_78 = arith.constant 0 : index
    %c3_79 = arith.constant 3 : index
    %c0_80 = arith.constant 0 : index
    %28 = tpu.strided_load %arg1[%c0_77, %c0_78, %c3_79, %c0_80] {strides = array<i32: 1, 1, 3, 1>} : memref<1x28x28x3xf32, #tpu.memory_space<vmem>>, vector<1x24x8x3xf32>
    %c0_81 = arith.constant 0 : index
    %c0_82 = arith.constant 0 : index
    %c4 = arith.constant 4 : index
    %c0_83 = arith.constant 0 : index
    %29 = tpu.strided_load %arg1[%c0_81, %c0_82, %c4, %c0_83] {strides = array<i32: 1, 1, 3, 1>} : memref<1x28x28x3xf32, #tpu.memory_space<vmem>>, vector<1x24x8x3xf32>
    %c0_84 = arith.constant 0 : index
    %c1_85 = arith.constant 1 : index
    %c2_86 = arith.constant 2 : index
    %c0_87 = arith.constant 0 : index
    %30 = tpu.strided_load %arg1[%c0_84, %c1_85, %c2_86, %c0_87] {strides = array<i32: 1, 1, 3, 1>} : memref<1x28x28x3xf32, #tpu.memory_space<vmem>>, vector<1x24x8x3xf32>
    %c0_88 = arith.constant 0 : index
    %c1_89 = arith.constant 1 : index
    %c3_90 = arith.constant 3 : index
    %c0_91 = arith.constant 0 : index
    %31 = tpu.strided_load %arg1[%c0_88, %c1_89, %c3_90, %c0_91] {strides = array<i32: 1, 1, 3, 1>} : memref<1x28x28x3xf32, #tpu.memory_space<vmem>>, vector<1x24x8x3xf32>
    %c0_92 = arith.constant 0 : index
    %c1_93 = arith.constant 1 : index
    %c4_94 = arith.constant 4 : index
    %c0_95 = arith.constant 0 : index
    %32 = tpu.strided_load %arg1[%c0_92, %c1_93, %c4_94, %c0_95] {strides = array<i32: 1, 1, 3, 1>} : memref<1x28x28x3xf32, #tpu.memory_space<vmem>>, vector<1x24x8x3xf32>
    %c0_96 = arith.constant 0 : index
    %c2_97 = arith.constant 2 : index
    %c2_98 = arith.constant 2 : index
    %c0_99 = arith.constant 0 : index
    %33 = tpu.strided_load %arg1[%c0_96, %c2_97, %c2_98, %c0_99] {strides = array<i32: 1, 1, 3, 1>} : memref<1x28x28x3xf32, #tpu.memory_space<vmem>>, vector<1x24x8x3xf32>
    %c0_100 = arith.constant 0 : index
    %c2_101 = arith.constant 2 : index
    %c3_102 = arith.constant 3 : index
    %c0_103 = arith.constant 0 : index
    %34 = tpu.strided_load %arg1[%c0_100, %c2_101, %c3_102, %c0_103] {strides = array<i32: 1, 1, 3, 1>} : memref<1x28x28x3xf32, #tpu.memory_space<vmem>>, vector<1x24x8x3xf32>
    %c0_104 = arith.constant 0 : index
    %c2_105 = arith.constant 2 : index
    %c4_106 = arith.constant 4 : index
    %c0_107 = arith.constant 0 : index
    %35 = tpu.strided_load %arg1[%c0_104, %c2_105, %c4_106, %c0_107] {strides = array<i32: 1, 1, 3, 1>} : memref<1x28x28x3xf32, #tpu.memory_space<vmem>>, vector<1x24x8x3xf32>
    %36 = tpu.concatenate %27, %28, %29, %30, %31, %32, %33, %34, %35 in 3 : vector<1x24x8x3xf32>, vector<1x24x8x3xf32>, vector<1x24x8x3xf32>, vector<1x24x8x3xf32>, vector<1x24x8x3xf32>, vector<1x24x8x3xf32>, vector<1x24x8x3xf32>, vector<1x24x8x3xf32>, vector<1x24x8x3xf32> -> vector<1x24x8x27xf32>
    %37 = vector.shape_cast %36 : vector<1x24x8x27xf32> to vector<192x27xf32>
    %c0_108 = arith.constant 0 : index
    %c0_109 = arith.constant 0 : index
    %38 = vector.load %arg2[%c0_108, %c0_109] : memref<27x16xf32, #tpu.memory_space<vmem>>, vector<27x16xf32>
    %cst_110 = arith.constant dense<0.000000e+00> : vector<192x16xf32>
    %39 = tpu.matmul %37, %38, %cst_110 {dimension_numbers = #tpu.dot_dimension_numbers<[1], [0], [0], [1], [0, 0, 1, 1], [], []>} : vector<192x27xf32>, vector<27x16xf32>, vector<192x16xf32> -> vector<192x16xf32>
    %40 = arith.maximumf %26, %39 : vector<192x16xf32>
    %41 = vector.shape_cast %40 : vector<192x16xf32> to vector<1x8x3x8x16xf32>
    %42 = vector.extract_strided_slice %41 {offsets = [0, 0, 0, 0, 0], sizes = [1, 8, 1, 8, 16], strides = [1, 1, 1, 1, 1]} : vector<1x8x3x8x16xf32> to vector<1x8x1x8x16xf32>
    %43 = vector.shape_cast %42 : vector<1x8x1x8x16xf32> to vector<1x8x8x16xf32>
    %44 = vector.extract_strided_slice %41 {offsets = [0, 0, 1, 0, 0], sizes = [1, 8, 1, 8, 16], strides = [1, 1, 1, 1, 1]} : vector<1x8x3x8x16xf32> to vector<1x8x1x8x16xf32>
    %45 = vector.shape_cast %44 : vector<1x8x1x8x16xf32> to vector<1x8x8x16xf32>
    %46 = arith.maximumf %43, %45 : vector<1x8x8x16xf32>
    %47 = vector.extract_strided_slice %41 {offsets = [0, 0, 2, 0, 0], sizes = [1, 8, 1, 8, 16], strides = [1, 1, 1, 1, 1]} : vector<1x8x3x8x16xf32> to vector<1x8x1x8x16xf32>
    %48 = vector.shape_cast %47 : vector<1x8x1x8x16xf32> to vector<1x8x8x16xf32>
    %49 = arith.maximumf %46, %48 : vector<1x8x8x16xf32>
    %c0_111 = arith.constant 0 : index
    %c0_112 = arith.constant 0 : index
    %50 = vector.load %arg3[%c0_111, %c0_112] : memref<1x16xf32, #tpu.memory_space<vmem>>, vector<1x16xf32>
    %51 = vector.shape_cast %50 : vector<1x16xf32> to vector<1x1x1x16xf32>
    %52 = vector.broadcast %51 : vector<1x1x1x16xf32> to vector<1x8x8x16xf32>
    %53 = arith.addf %49, %52 : vector<1x8x8x16xf32>
    %cst_113 = arith.constant 0.000000e+00 : f32
    %54 = vector.broadcast %cst_113 : f32 to vector<1x8x8x16xf32>
    %55 = arith.maximumf %53, %54 : vector<1x8x8x16xf32>
    %c0_114 = arith.constant 0 : index
    %c0_115 = arith.constant 0 : index
    %c0_116 = arith.constant 0 : index
    %c0_117 = arith.constant 0 : index
    %56 = vector.load %arg11[%c0_114, %c0_115, %c0_116, %c0_117] : memref<1x8x16x16xf32, #tpu.memory_space<vmem>>, vector<1x8x8x16xf32>
    tpu.vector_store %arg11[%c0_114, %c0_115, %c0_116, %c0_117], %55 {strides = array<i32>} : memref<1x8x16x16xf32, #tpu.memory_space<vmem>>, vector<1x8x8x16xf32>,
    %cst_118 = arith.constant 0.000000e+00 : f32
    %57 = vector.broadcast %cst_118 : f32 to vector<1x8x8x16xf32>
    %c0_119 = arith.constant 0 : index
    %c0_120 = arith.constant 0 : index
    %c8 = arith.constant 8 : index
    %c0_121 = arith.constant 0 : index
    %58 = vector.load %arg11[%c0_119, %c0_120, %c8, %c0_121] : memref<1x8x16x16xf32, #tpu.memory_space<vmem>>, vector<1x8x8x16xf32>
    tpu.vector_store %arg11[%c0_119, %c0_120, %c8, %c0_121], %57 {strides = array<i32>} : memref<1x8x16x16xf32, #tpu.memory_space<vmem>>, vector<1x8x8x16xf32>,
    %c0_122 = arith.constant 0 : index
    %c0_123 = arith.constant 0 : index
    %c0_124 = arith.constant 0 : index
    %c0_125 = arith.constant 0 : index
    %59 = vector.load %arg11[%c0_122, %c0_123, %c0_124, %c0_125] : memref<1x8x16x16xf32, #tpu.memory_space<vmem>>, vector<1x6x8x16xf32>
    %c0_126 = arith.constant 0 : index
    %c0_127 = arith.constant 0 : index
    %c1_128 = arith.constant 1 : index
    %c0_129 = arith.constant 0 : index
    %60 = vector.load %arg11[%c0_126, %c0_127, %c1_128, %c0_129] : memref<1x8x16x16xf32, #tpu.memory_space<vmem>>, vector<1x6x8x16xf32>
    %c0_130 = arith.constant 0 : index
    %c0_131 = arith.constant 0 : index
    %c2_132 = arith.constant 2 : index
    %c0_133 = arith.constant 0 : index
    %61 = vector.load %arg11[%c0_130, %c0_131, %c2_132, %c0_133] : memref<1x8x16x16xf32, #tpu.memory_space<vmem>>, vector<1x6x8x16xf32>
    %c0_134 = arith.constant 0 : index
    %c1_135 = arith.constant 1 : index
    %c0_136 = arith.constant 0 : index
    %c0_137 = arith.constant 0 : index
    %62 = vector.load %arg11[%c0_134, %c1_135, %c0_136, %c0_137] : memref<1x8x16x16xf32, #tpu.memory_space<vmem>>, vector<1x6x8x16xf32>
    %c0_138 = arith.constant 0 : index
    %c1_139 = arith.constant 1 : index
    %c1_140 = arith.constant 1 : index
    %c0_141 = arith.constant 0 : index
    %63 = vector.load %arg11[%c0_138, %c1_139, %c1_140, %c0_141] : memref<1x8x16x16xf32, #tpu.memory_space<vmem>>, vector<1x6x8x16xf32>
    %c0_142 = arith.constant 0 : index
    %c1_143 = arith.constant 1 : index
    %c2_144 = arith.constant 2 : index
    %c0_145 = arith.constant 0 : index
    %64 = vector.load %arg11[%c0_142, %c1_143, %c2_144, %c0_145] : memref<1x8x16x16xf32, #tpu.memory_space<vmem>>, vector<1x6x8x16xf32>
    %c0_146 = arith.constant 0 : index
    %c2_147 = arith.constant 2 : index
    %c0_148 = arith.constant 0 : index
    %c0_149 = arith.constant 0 : index
    %65 = vector.load %arg11[%c0_146, %c2_147, %c0_148, %c0_149] : memref<1x8x16x16xf32, #tpu.memory_space<vmem>>, vector<1x6x8x16xf32>
    %c0_150 = arith.constant 0 : index
    %c2_151 = arith.constant 2 : index
    %c1_152 = arith.constant 1 : index
    %c0_153 = arith.constant 0 : index
    %66 = vector.load %arg11[%c0_150, %c2_151, %c1_152, %c0_153] : memref<1x8x16x16xf32, #tpu.memory_space<vmem>>, vector<1x6x8x16xf32>
    %c0_154 = arith.constant 0 : index
    %c2_155 = arith.constant 2 : index
    %c2_156 = arith.constant 2 : index
    %c0_157 = arith.constant 0 : index
    %67 = vector.load %arg11[%c0_154, %c2_155, %c2_156, %c0_157] : memref<1x8x16x16xf32, #tpu.memory_space<vmem>>, vector<1x6x8x16xf32>
    %68 = tpu.concatenate %59, %60, %61, %62, %63, %64, %65, %66, %67 in 3 : vector<1x6x8x16xf32>, vector<1x6x8x16xf32>, vector<1x6x8x16xf32>, vector<1x6x8x16xf32>, vector<1x6x8x16xf32>, vector<1x6x8x16xf32>, vector<1x6x8x16xf32>, vector<1x6x8x16xf32>, vector<1x6x8x16xf32> -> vector<1x6x8x144xf32>
    %69 = vector.shape_cast %68 : vector<1x6x8x144xf32> to vector<48x144xf32>
    %c0_158 = arith.constant 0 : index
    %c0_159 = arith.constant 0 : index
    %70 = vector.load %arg4[%c0_158, %c0_159] : memref<144x32xf32, #tpu.memory_space<vmem>>, vector<144x32xf32>
    %cst_160 = arith.constant dense<0.000000e+00> : vector<48x32xf32>
    %71 = tpu.matmul %69, %70, %cst_160 {dimension_numbers = #tpu.dot_dimension_numbers<[1], [0], [0], [1], [0, 0, 1, 1], [], []>} : vector<48x144xf32>, vector<144x32xf32>, vector<48x32xf32> -> vector<48x32xf32>
    %c0_161 = arith.constant 0 : index
    %c0_162 = arith.constant 0 : index
    %72 = vector.load %arg5[%c0_161, %c0_162] : memref<1x32xf32, #tpu.memory_space<vmem>>, vector<1x32xf32>
    %73 = vector.broadcast %72 : vector<1x32xf32> to vector<48x32xf32>
    %74 = arith.addf %71, %73 : vector<48x32xf32>
    %cst_163 = arith.constant 0.000000e+00 : f32
    %75 = vector.broadcast %cst_163 : f32 to vector<48x32xf32>
    %76 = arith.maximumf %74, %75 : vector<48x32xf32>
    %77 = vector.shape_cast %76 : vector<48x32xf32> to vector<1x6x8x32xf32>
    %c0_164 = arith.constant 0 : index
    %c0_165 = arith.constant 0 : index
    %78 = vector.load %arg7[%c0_164, %c0_165] : memref<1x16xf32, #tpu.memory_space<vmem>>, vector<1x16xf32>
    %79 = vector.extract_strided_slice %77 {offsets = [0, 0, 0, 0], sizes = [1, 3, 3, 32], strides = [1, 1, 1, 1]} : vector<1x6x8x32xf32> to vector<1x3x3x32xf32>
    %cst_166 = arith.constant dense<0xFF800000> : vector<1x3x32xf32>
    %80 = vector.multi_reduction <maximumf>, %79, %cst_166 [2] : vector<1x3x3x32xf32> to vector<1x3x32xf32>
    %cst_167 = arith.constant dense<0xFF800000> : vector<1x32xf32>
    %81 = vector.multi_reduction <maximumf>, %80, %cst_167 [1] : vector<1x3x32xf32> to vector<1x32xf32>
    %c0_168 = arith.constant 0 : index
    %c0_169 = arith.constant 0 : index
    %c0_170 = arith.constant 0 : index
    %82 = vector.load %arg6[%c0_168, %c0_169, %c0_170] : memref<4x32x16xf32, #tpu.memory_space<vmem>>, vector<1x32x16xf32>
    %83 = vector.shape_cast %82 : vector<1x32x16xf32> to vector<32x16xf32>
    %cst_171 = arith.constant dense<0.000000e+00> : vector<1x16xf32>
    %84 = tpu.matmul %81, %83, %cst_171 {dimension_numbers = #tpu.dot_dimension_numbers<[1], [0], [0], [1], [0, 0, 1, 1], [], []>} : vector<1x32xf32>, vector<32x16xf32>, vector<1x16xf32> -> vector<1x16xf32>
    %85 = arith.addf %78, %84 : vector<1x16xf32>
    %86 = vector.extract_strided_slice %77 {offsets = [0, 0, 3, 0], sizes = [1, 3, 3, 32], strides = [1, 1, 1, 1]} : vector<1x6x8x32xf32> to vector<1x3x3x32xf32>
    %cst_172 = arith.constant dense<0xFF800000> : vector<1x3x32xf32>
    %87 = vector.multi_reduction <maximumf>, %86, %cst_172 [2] : vector<1x3x3x32xf32> to vector<1x3x32xf32>
    %cst_173 = arith.constant dense<0xFF800000> : vector<1x32xf32>
    %88 = vector.multi_reduction <maximumf>, %87, %cst_173 [1] : vector<1x3x32xf32> to vector<1x32xf32>
    %c1_174 = arith.constant 1 : index
    %c0_175 = arith.constant 0 : index
    %c0_176 = arith.constant 0 : index
    %89 = vector.load %arg6[%c1_174, %c0_175, %c0_176] : memref<4x32x16xf32, #tpu.memory_space<vmem>>, vector<1x32x16xf32>
    %90 = vector.shape_cast %89 : vector<1x32x16xf32> to vector<32x16xf32>
    %cst_177 = arith.constant dense<0.000000e+00> : vector<1x16xf32>
    %91 = tpu.matmul %88, %90, %cst_177 {dimension_numbers = #tpu.dot_dimension_numbers<[1], [0], [0], [1], [0, 0, 1, 1], [], []>} : vector<1x32xf32>, vector<32x16xf32>, vector<1x16xf32> -> vector<1x16xf32>
    %92 = arith.addf %85, %91 : vector<1x16xf32>
    %93 = vector.extract_strided_slice %77 {offsets = [0, 3, 0, 0], sizes = [1, 3, 3, 32], strides = [1, 1, 1, 1]} : vector<1x6x8x32xf32> to vector<1x3x3x32xf32>
    %cst_178 = arith.constant dense<0xFF800000> : vector<1x3x32xf32>
    %94 = vector.multi_reduction <maximumf>, %93, %cst_178 [2] : vector<1x3x3x32xf32> to vector<1x3x32xf32>
    %cst_179 = arith.constant dense<0xFF800000> : vector<1x32xf32>
    %95 = vector.multi_reduction <maximumf>, %94, %cst_179 [1] : vector<1x3x32xf32> to vector<1x32xf32>
    %c2_180 = arith.constant 2 : index
    %c0_181 = arith.constant 0 : index
    %c0_182 = arith.constant 0 : index
    %96 = vector.load %arg6[%c2_180, %c0_181, %c0_182] : memref<4x32x16xf32, #tpu.memory_space<vmem>>, vector<1x32x16xf32>
    %97 = vector.shape_cast %96 : vector<1x32x16xf32> to vector<32x16xf32>
    %cst_183 = arith.constant dense<0.000000e+00> : vector<1x16xf32>
    %98 = tpu.matmul %95, %97, %cst_183 {dimension_numbers = #tpu.dot_dimension_numbers<[1], [0], [0], [1], [0, 0, 1, 1], [], []>} : vector<1x32xf32>, vector<32x16xf32>, vector<1x16xf32> -> vector<1x16xf32>
    %99 = arith.addf %92, %98 : vector<1x16xf32>
    %100 = vector.extract_strided_slice %77 {offsets = [0, 3, 3, 0], sizes = [1, 3, 3, 32], strides = [1, 1, 1, 1]} : vector<1x6x8x32xf32> to vector<1x3x3x32xf32>
    %cst_184 = arith.constant dense<0xFF800000> : vector<1x3x32xf32>
    %101 = vector.multi_reduction <maximumf>, %100, %cst_184 [2] : vector<1x3x3x32xf32> to vector<1x3x32xf32>
    %cst_185 = arith.constant dense<0xFF800000> : vector<1x32xf32>
    %102 = vector.multi_reduction <maximumf>, %101, %cst_185 [1] : vector<1x3x32xf32> to vector<1x32xf32>
    %c3_186 = arith.constant 3 : index
    %c0_187 = arith.constant 0 : index
    %c0_188 = arith.constant 0 : index
    %103 = vector.load %arg6[%c3_186, %c0_187, %c0_188] : memref<4x32x16xf32, #tpu.memory_space<vmem>>, vector<1x32x16xf32>
    %104 = vector.shape_cast %103 : vector<1x32x16xf32> to vector<32x16xf32>
    %cst_189 = arith.constant dense<0.000000e+00> : vector<1x16xf32>
    %105 = tpu.matmul %102, %104, %cst_189 {dimension_numbers = #tpu.dot_dimension_numbers<[1], [0], [0], [1], [0, 0, 1, 1], [], []>} : vector<1x32xf32>, vector<32x16xf32>, vector<1x16xf32> -> vector<1x16xf32>
    %106 = arith.addf %99, %105 : vector<1x16xf32>
    %cst_190 = arith.constant 0.000000e+00 : f32
    %107 = vector.broadcast %cst_190 : f32 to vector<1x16xf32>
    %108 = arith.maximumf %106, %107 : vector<1x16xf32>
    %c0_191 = arith.constant 0 : index
    %c0_192 = arith.constant 0 : index
    %109 = vector.load %arg8[%c0_191, %c0_192] : memref<16x10xf32, #tpu.memory_space<vmem>>, vector<16x10xf32>
    %cst_193 = arith.constant dense<0.000000e+00> : vector<1x10xf32>
    %110 = tpu.matmul %108, %109, %cst_193 {dimension_numbers = #tpu.dot_dimension_numbers<[1], [0], [0], [1], [0, 0, 1, 1], [], []>} : vector<1x16xf32>, vector<16x10xf32>, vector<1x10xf32> -> vector<1x10xf32>
    %c0_194 = arith.constant 0 : index
    %c0_195 = arith.constant 0 : index
    %111 = vector.load %arg9[%c0_194, %c0_195] : memref<1x10xf32, #tpu.memory_space<vmem>>, vector<1x10xf32>
    %112 = arith.addf %110, %111 : vector<1x10xf32>
    %113 = vector.shape_cast %112 : vector<1x10xf32> to vector<1x1x10xf32>
    %c0_196 = arith.constant 0 : index
    %c0_197 = arith.constant 0 : index
    %c0_198 = arith.constant 0 : index
    %114 = vector.load %arg10[%c0_196, %c0_197, %c0_198] : memref<1x1x10xf32, #tpu.memory_space<vmem>>, vector<1x1x10xf32>
    tpu.vector_store %arg10[%c0_196, %c0_197, %c0_198], %113 {strides = array<i32>} : memref<1x1x10xf32, #tpu.memory_space<vmem>>, vector<1x1x10xf32>,
    return
  }
  func.func @transform_0(%arg0: i32) -> (i32, i32, i32, i32) {
    %c0_i32 = arith.constant 0 : i32
    %c0_i32_0 = arith.constant 0 : i32
    %c0_i32_1 = arith.constant 0 : i32
    %c0_i32_2 = arith.constant 0 : i32
    return %arg0, %c0_i32, %c0_i32_0, %c0_i32_1 : i32, i32, i32, i32
  }
  func.func @transform_1(%arg0: i32) -> (i32, i32) {
    %c0_i32 = arith.constant 0 : i32
    %c0_i32_0 = arith.constant 0 : i32
    %c0_i32_1 = arith.constant 0 : i32
    return %c0_i32, %c0_i32_0 : i32, i32
  }
  func.func @transform_2(%arg0: i32) -> (i32, i32) {
    %c0_i32 = arith.constant 0 : i32
    %c0_i32_0 = arith.constant 0 : i32
    %c0_i32_1 = arith.constant 0 : i32
    return %c0_i32, %c0_i32_0 : i32, i32
  }
  func.func @transform_3(%arg0: i32) -> (i32, i32) {
    %c0_i32 = arith.constant 0 : i32
    %c0_i32_0 = arith.constant 0 : i32
    %c0_i32_1 = arith.constant 0 : i32
    return %c0_i32, %c0_i32_0 : i32, i32
  }
  func.func @transform_4(%arg0: i32) -> (i32, i32) {
    %c0_i32 = arith.constant 0 : i32
    %c0_i32_0 = arith.constant 0 : i32
    %c0_i32_1 = arith.constant 0 : i32
    return %c0_i32, %c0_i32_0 : i32, i32
  }
  func.func @transform_5(%arg0: i32) -> (i32, i32, i32) {
    %c0_i32 = arith.constant 0 : i32
    %c0_i32_0 = arith.constant 0 : i32
    %c0_i32_1 = arith.constant 0 : i32
    %c0_i32_2 = arith.constant 0 : i32
    return %c0_i32, %c0_i32_0, %c0_i32_1 : i32, i32, i32
  }
  func.func @transform_6(%arg0: i32) -> (i32, i32) {
    %c0_i32 = arith.constant 0 : i32
    %c0_i32_0 = arith.constant 0 : i32
    %c0_i32_1 = arith.constant 0 : i32
    return %c0_i32, %c0_i32_0 : i32, i32
  }
  func.func @transform_7(%arg0: i32) -> (i32, i32) {
    %c0_i32 = arith.constant 0 : i32
    %c0_i32_0 = arith.constant 0 : i32
    %c0_i32_1 = arith.constant 0 : i32
    return %c0_i32, %c0_i32_0 : i32, i32
  }
  func.func @transform_8(%arg0: i32) -> (i32, i32) {
    %c0_i32 = arith.constant 0 : i32
    %c0_i32_0 = arith.constant 0 : i32
    %c0_i32_1 = arith.constant 0 : i32
    return %c0_i32, %c0_i32_0 : i32, i32
  }
  func.func @transform_9(%arg0: i32) -> (i32, i32, i32) {
    %c0_i32 = arith.constant 0 : i32
    %c0_i32_0 = arith.constant 0 : i32
    %c0_i32_1 = arith.constant 0 : i32
    return %arg0, %c0_i32, %c0_i32_0 : i32, i32, i32
  }
}

</mosaic_0001>

<bundles_post_ra>
// kernel: cnn_forward.1
= control target key start
LH: loop header
LB: loop body
LE: loop exit
PB: predicated region body
PF: predicated region fallthrough
CT: control target
= control target key end

     0   :  { %14 = vsyncpa [#allocation4], 0  ;;  %s10522_s0 = inlined_call_operand.vmem [shape: f32[2,28,28,3], index: 0, kind: input, shape index: {}]   ;;  %s10523_s1 = inlined_call_operand.vmem [shape: f32[27,16], index: 1, kind: input, shape index: {}]   ;;  %s10524_s2 = inlined_call_operand.vmem [shape: f32[1,16], index: 2, kind: input, shape index: {}]   ;;  %s10525_s3 = inlined_call_operand.vmem [shape: f32[144,32], index: 3, kind: input, shape index: {}]   ;;  %s10526_s4 = inlined_call_operand.vmem [shape: f32[1,32], index: 4, kind: input, shape index: {}]   ;;  %s10527_s5 = inlined_call_operand.vmem [shape: f32[4,32,16], index: 5, kind: input, shape index: {}]   ;;  %s10528_s6 = inlined_call_operand.vmem [shape: f32[1,16], index: 6, kind: input, shape index: {}]   ;;  %s10529_s7 = inlined_call_operand.vmem [shape: f32[16,10], index: 7, kind: input, shape index: {}]   ;;  %s10530_s8 = inlined_call_operand.vmem [shape: f32[1,10], index: 8, kind: input, shape index: {}]   ;;  %s10531_s9 = inlined_call_operand.hbm [shape: f32[2,1,10], index: 9, kind: output, shape index: {}]  }
   0x1   :  { %16 = vsyncpa [#allocation4 + $0x1], 0  ;;  %s6988_s30 = smov 0   ;;  %s6990_s10 = smov 0  }
   0x2   :  { %s6992_s11 = smov 0   ;;  %s6994_s12 = smov 0  }
   0x3 LB: > { %s7009_s13 = sadd.s32 4294967295, %s6918_s12   ;;  %s5804_s14 = sadd.s32 4294967294, %s6918_s12   ;;  %s6918_s12 = sphi %s6994_s12, %s10680_s12   ;;  %s6914_s11 = sphi %s6992_s11, %s10679_s11   ;;  %s6910_s10 = sphi %s6990_s10, %s10678_s10   ;;  %s6906_s30 = sphi %s6988_s30, %s10677_s30  }
   0x4   : > { %s7013_s15 = sadd.s32 1, %s6918_s12   ;;  %s223_s16 = sadd.s32 1, %s6914_s11 }
   0x5   : > { %s220_s17 = ssub.s32 %s6918_s12, %s7013_s15  ;;  %p233_p0 = scmp.ne.s32.totalorder %s6914_s11, %s6910_s10 }
   0x6   : > { %p221_p1 = scmp.eq.s32.totalorder %s220_s17, 0  ;;  %p234_p2 = scmp.eq.s32.totalorder %s7009_s13, 1 }
   0x7   : > { %p239_p3 = scmp.ne.s32.totalorder %s6910_s10, %s6906_s30  ;;  %p240_p4 = scmp.eq.s32.totalorder %s5804_s14, 1 }
   0x8   : > { %s7024_s18 = scalar_select %p221_p1, %s6914_s11, %s223_s16  }
   0x9   : > { %p7026_p5 = por %p234_p2, %p233_p0  ;;  %p7030_p6 = por %p240_p4, %p239_p3 }
   0xa   : > { %p5807_p7 = scmp.ge.s32.totalorder %s6918_s12, 1  ;;  %p290_p8 = scmp.lt.s32.totalorder %s6918_s12, 3 }
   0xc   : > { %p291_p9 = pnand %p5807_p7, %p290_p8 }
   0xe   : > { %294 = sbr.rel (%p291_p9) target bundleno = 2244 (0x8c4), region = 56 }
  0x13   : > { %p325_p10 = scmp.lt.s32.totalorder %s7009_s13, 1  ;;  %s6920_s26 = smov 3   ;;  %vm1806_vm0 = vcmask 1042432   ;;  %vm1529_vm1 = vcmask 23552   ;;  %vm1554_vm2 = vcmask 48128   ;;  %vm1579_vm3 = vcmask 72704  }
  0x14   : > { %s6921_s27 = smov 6   ;;  %s6922_s28 = smov 9   ;;  %vm1604_vm4 = vcmask 97280   ;;  %vm1629_vm5 = vcmask 121856   ;;  %vm1654_vm6 = vcmask 146432   ;;  %vm1679_vm7 = vcmask 171008  }
  0x15   : > { %s326_s21 = scalar_select %p325_p10, %s7009_s13, 1  ;;  %vm1704_vm8 = vcmask 195584   ;;  %vm1733_vm9 = vcmask 220160   ;;  %vm4564_vm10 = vcmask 130048   ;;  %vm4811_vm11 = vcmask 261120  }
  0x16   : > { %s6923_s29 = smov 12   ;;  %s6924_s17 = smov 15   ;;  %vm4818_vm12 = vcmask 392192   ;;  %vm4825_vm13 = vcmask 523264   ;;  %vm4832_vm14 = vcmask 654336   ;;  %vm4839_vm15 = vcmask 785408  }
  0x17   : > { %s6561_s22 = smul.u32 896, %s326_s21  ;;  %s6925_s21 = smov 18  }
  0x18   : > { %s6927_s23 = smov 24   ;;  %s6930_s14 = smov 16  }
  0x19   : > { %s7041_s25 = scalar_lea.vmem %s10522_s0, %s6561_s22  ;;  %s6926_s22 = smov 21  }
  0x1a   : > { %v5834_v0 = vld [vmem:[%s7041_s25 + $0x41] ss:$3 sm:$0xff]  ;;  %v5857_v24 = vld [vmem:[%s7041_s25 + $0x22] ss:$3 sm:$0xff]  ;;  %v5881_v48 = vld [vmem:[%s7041_s25 + $0x40] ss:$3 sm:$0xff] }
  0x1b   : > { %v5832_v1 = vld [vmem:[%s7041_s25 + $0x1] ss:$3 sm:$0xff]  ;;  %789 = vrot.lane.b32.xlu1 %v5834_v0, %s6920_s26  ;;  %v5856_v25 = vld [vmem:[%s7041_s25 + $0x2] ss:$3 sm:$0xff]  ;;  %v5880_v49 = vld [vmem:[%s7041_s25 + $0x20] ss:$3 sm:$0xff] }
  0x1c   : > { %785 = vrot.lane.b32.xlu0 %v5832_v1, %s6920_s26  ;;  %v5835_v2 = vld [vmem:[%s7041_s25 + $0x61] ss:$3 sm:$0xff]  ;;  %v5859_v26 = vld [vmem:[%s7041_s25 + $0x62] ss:$3 sm:$0xff]  ;;  %v5883_v50 = vld [vmem:[%s7041_s25 + $0x80] ss:$3 sm:$0xff] }
  0x1d   : > { %v5833_v3 = vld [vmem:[%s7041_s25 + $0x21] ss:$3 sm:$0xff]  ;;  %v5858_v27 = vld [vmem:[%s7041_s25 + $0x42] ss:$3 sm:$0xff]  ;;  %v5882_v51 = vld [vmem:[%s7041_s25 + $0x60] ss:$3 sm:$0xff] }
  0x1e   : > { %v5837_v4 = vld [vmem:[%s7041_s25 + $0xa1] ss:$3 sm:$0xff]  ;;  %v5861_v28 = vld [vmem:[%s7041_s25 + $0xa2] ss:$3 sm:$0xff]  ;;  %v5885_v52 = vld [vmem:[%s7041_s25 + $0xc0] ss:$3 sm:$0xff] }
  0x1f   : > { %791 = vrot.lane.b32.xlu1 %v5835_v2, %s6920_s26  ;;  %v5836_v5 = vld [vmem:[%s7041_s25 + $0x81] ss:$3 sm:$0xff]  ;;  %v5860_v29 = vld [vmem:[%s7041_s25 + $0x82] ss:$3 sm:$0xff]  ;;  %v5884_v53 = vld [vmem:[%s7041_s25 + $0xa0] ss:$3 sm:$0xff] }
  0x20   : > { %787 = vrot.lane.b32.xlu0 %v5833_v3, %s6920_s26  ;;  %v5839_v6 = vld [vmem:[%s7041_s25 + $0xe1] ss:$3 sm:$0xff]  ;;  %v5863_v30 = vld [vmem:[%s7041_s25 + $0xe2] ss:$3 sm:$0xff]  ;;  %v5887_v54 = vld [vmem:[%s7041_s25 + $0x100] ss:$3 sm:$0xff] }
  0x21   : > { %v5838_v7 = vld [vmem:[%s7041_s25 + $0xc1] ss:$3 sm:$0xff]  ;;  %v5862_v31 = vld [vmem:[%s7041_s25 + $0xc2] ss:$3 sm:$0xff]  ;;  %v5886_v55 = vld [vmem:[%s7041_s25 + $0xe0] ss:$3 sm:$0xff] }
  0x22   : > { %v5841_v8 = vld [vmem:[%s7041_s25 + $0x121] ss:$3 sm:$0xff]  ;;  %v5865_v32 = vld [vmem:[%s7041_s25 + $0x122] ss:$3 sm:$0xff]  ;;  %v5889_v56 = vld [vmem:[%s7041_s25 + $0x140] ss:$3 sm:$0xff] }
  0x23   : > { %795 = vrot.lane.b32.xlu1 %v5837_v4, %s6920_s26  ;;  %v5840_v9 = vld [vmem:[%s7041_s25 + $0x101] ss:$3 sm:$0xff]  ;;  %v5864_v33 = vld [vmem:[%s7041_s25 + $0x102] ss:$3 sm:$0xff]  ;;  %v5888_v57 = vld [vmem:[%s7041_s25 + $0x120] ss:$3 sm:$0xff] }
  0x24   : > { %793 = vrot.lane.b32.xlu0 %v5836_v5, %s6920_s26  ;;  %v5843_v10 = vld [vmem:[%s7041_s25 + $0x161] ss:$3 sm:$0xff]  ;;  %v5867_v34 = vld [vmem:[%s7041_s25 + $0x162] ss:$3 sm:$0xff]  ;;  %v5891_v58 = vld [vmem:[%s7041_s25 + $0x180] ss:$3 sm:$0xff] }
  0x25   : > { %v5842_v11 = vld [vmem:[%s7041_s25 + $0x141] ss:$3 sm:$0xff]  ;;  %v5866_v35 = vld [vmem:[%s7041_s25 + $0x142] ss:$3 sm:$0xff]  ;;  %v5890_v59 = vld [vmem:[%s7041_s25 + $0x160] ss:$3 sm:$0xff] }
  0x26   : > { %v5845_v12 = vld [vmem:[%s7041_s25 + $0x1a1] ss:$3 sm:$0xff]  ;;  %v5869_v36 = vld [vmem:[%s7041_s25 + $0x1a2] ss:$3 sm:$0xff]  ;;  %v5893_v62 = vld [vmem:[%s7041_s25 + $0x1c0] ss:$3 sm:$0xff] }
  0x27   : > { %799 = vrot.lane.b32.xlu1 %v5839_v6, %s6920_s26  ;;  %v5844_v13 = vld [vmem:[%s7041_s25 + $0x181] ss:$3 sm:$0xff]  ;;  %v5868_v37 = vld [vmem:[%s7041_s25 + $0x182] ss:$3 sm:$0xff]  ;;  %v5892_v63 = vld [vmem:[%s7041_s25 + $0x1a0] ss:$3 sm:$0xff] }
  0x28   : > { %797 = vrot.lane.b32.xlu0 %v5838_v7, %s6920_s26  ;;  %v5847_v14 = vld [vmem:[%s7041_s25 + $0x1e1] ss:$3 sm:$0xff]  ;;  %v5871_v38 = vld [vmem:[%s7041_s25 + $0x1e2] ss:$3 sm:$0xff]  ;;  %v5895_v2 = vld [vmem:[%s7041_s25 + $0x200] ss:$3 sm:$0xff] }
  0x29   : > { %v5846_v15 = vld [vmem:[%s7041_s25 + $0x1c1] ss:$3 sm:$0xff]  ;;  %v5870_v39 = vld [vmem:[%s7041_s25 + $0x1c2] ss:$3 sm:$0xff]  ;;  %v5894_v3 = vld [vmem:[%s7041_s25 + $0x1e0] ss:$3 sm:$0xff] }
  0x2a   : > { %v5849_v16 = vld [vmem:[%s7041_s25 + $0x221] ss:$3 sm:$0xff]  ;;  %v5873_v40 = vld [vmem:[%s7041_s25 + $0x222] ss:$3 sm:$0xff]  ;;  %v5897_v6 = vld [vmem:[%s7041_s25 + $0x240] ss:$3 sm:$0xff] }
  0x2b   : > { %803 = vrot.lane.b32.xlu1 %v5841_v8, %s6920_s26  ;;  %v5848_v17 = vld [vmem:[%s7041_s25 + $0x201] ss:$3 sm:$0xff]  ;;  %v5872_v41 = vld [vmem:[%s7041_s25 + $0x202] ss:$3 sm:$0xff]  ;;  %v5896_v7 = vld [vmem:[%s7041_s25 + $0x220] ss:$3 sm:$0xff] }
  0x2c   : > { %801 = vrot.lane.b32.xlu0 %v5840_v9, %s6920_s26  ;;  %v5851_v18 = vld [vmem:[%s7041_s25 + $0x261] ss:$3 sm:$0xff]  ;;  %v5875_v42 = vld [vmem:[%s7041_s25 + $0x262] ss:$3 sm:$0xff]  ;;  %s6933_s24 = smov 96  }
  0x2d   : > { %v5850_v19 = vld [vmem:[%s7041_s25 + $0x241] ss:$3 sm:$0xff]  ;;  %v5874_v43 = vld [vmem:[%s7041_s25 + $0x242] ss:$3 sm:$0xff] }
  0x2e   : > { %v5853_v20 = vld [vmem:[%s7041_s25 + $0x2a1] ss:$3 sm:$0xff]  ;;  %v5877_v44 = vld [vmem:[%s7041_s25 + $0x2a2] ss:$3 sm:$0xff] }
  0x2f   : > { %807 = vrot.lane.b32.xlu1 %v5843_v10, %s6920_s26  ;;  %v5852_v21 = vld [vmem:[%s7041_s25 + $0x281] ss:$3 sm:$0xff]  ;;  %v5876_v45 = vld [vmem:[%s7041_s25 + $0x282] ss:$3 sm:$0xff]  ;;  %v5899_v10 = vld [vmem:[%s7041_s25 + $0x280] ss:$3 sm:$0xff] }
  0x30   : > { %805 = vrot.lane.b32.xlu0 %v5842_v11, %s6920_s26  ;;  %v5855_v22 = vld [vmem:[%s7041_s25 + $0x2e1] ss:$3 sm:$0xff]  ;;  %v5879_v46 = vld [vmem:[%s7041_s25 + $0x2e2] ss:$3 sm:$0xff]  ;;  %v5898_v11 = vld [vmem:[%s7041_s25 + $0x260] ss:$3 sm:$0xff] }
  0x31   : > { %v5854_v23 = vld [vmem:[%s7041_s25 + $0x2c1] ss:$3 sm:$0xff]  ;;  %v5878_v47 = vld [vmem:[%s7041_s25 + $0x2c2] ss:$3 sm:$0xff] }
  0x33   : > { %811 = vrot.lane.b32.xlu1 %v5845_v12, %s6920_s26 }
  0x34   : > { %809 = vrot.lane.b32.xlu0 %v5844_v13, %s6920_s26 }
  0x37   : > { %815 = vrot.lane.b32.xlu1 %v5847_v14, %s6920_s26  ;;  %v5901_v14 = vld [vmem:[%s7041_s25 + $0x2c0] ss:$3 sm:$0xff] }
  0x38   : > { %813 = vrot.lane.b32.xlu0 %v5846_v15, %s6920_s26  ;;  %v5900_v15 = vld [vmem:[%s7041_s25 + $0x2a0] ss:$3 sm:$0xff] }
  0x3b   : > { %819 = vrot.lane.b32.xlu1 %v5849_v16, %s6920_s26 }
  0x3c   : > { %817 = vrot.lane.b32.xlu0 %v5848_v17, %s6920_s26 }
  0x3f   : > { %823 = vrot.lane.b32.xlu1 %v5851_v18, %s6920_s26  ;;  %v5903_v18 = vld [vmem:[%s7041_s25 + $0x300] ss:$3 sm:$0xff] }
  0x40   : > { %821 = vrot.lane.b32.xlu0 %v5850_v19, %s6920_s26  ;;  %v5902_v19 = vld [vmem:[%s7041_s25 + $0x2e0] ss:$3 sm:$0xff] }
  0x43   : > { %827 = vrot.lane.b32.xlu1 %v5853_v20, %s6920_s26 }
  0x44   : > { %825 = vrot.lane.b32.xlu0 %v5852_v21, %s6920_s26 }
  0x47   : > { %831 = vrot.lane.b32.xlu1 %v5855_v22, %s6920_s26  ;;  %v7216_v22 = vld [vmem:[%s7041_s25 + $0x41] ss:$3 sm:$0xff] }
  0x48   : > { %829 = vrot.lane.b32.xlu0 %v5854_v23, %s6920_s26  ;;  %v7219_v23 = vld [vmem:[%s7041_s25 + $0x21] ss:$3 sm:$0xff] }
  0x4b   : > { %883 = vrot.lane.b32.xlu1 %v5857_v24, %s6921_s27 }
  0x4c   : > { %881 = vrot.lane.b32.xlu0 %v5856_v25, %s6921_s27 }
  0x4f   : > { %887 = vrot.lane.b32.xlu1 %v5859_v26, %s6921_s27  ;;  %v5907_v26 = vld [vmem:[%s7041_s25 + $0x81] ss:$3 sm:$0xff] }
  0x50   : > { %885 = vrot.lane.b32.xlu0 %v5858_v27, %s6921_s27  ;;  %v5906_v27 = vld [vmem:[%s7041_s25 + $0x61] ss:$3 sm:$0xff] }
  0x53   : > { %891 = vrot.lane.b32.xlu1 %v5861_v28, %s6921_s27 }
  0x54   : > { %889 = vrot.lane.b32.xlu0 %v5860_v29, %s6921_s27 }
  0x57   : > { %895 = vrot.lane.b32.xlu1 %v5863_v30, %s6921_s27  ;;  %v5909_v30 = vld [vmem:[%s7041_s25 + $0xc1] ss:$3 sm:$0xff] }
  0x58   : > { %893 = vrot.lane.b32.xlu0 %v5862_v31, %s6921_s27  ;;  %v5908_v31 = vld [vmem:[%s7041_s25 + $0xa1] ss:$3 sm:$0xff] }
  0x5b   : > { %899 = vrot.lane.b32.xlu1 %v5865_v32, %s6921_s27 }
  0x5c   : > { %897 = vrot.lane.b32.xlu0 %v5864_v33, %s6921_s27 }
  0x5f   : > { %903 = vrot.lane.b32.xlu1 %v5867_v34, %s6921_s27  ;;  %v5911_v34 = vld [vmem:[%s7041_s25 + $0x101] ss:$3 sm:$0xff] }
  0x60   : > { %901 = vrot.lane.b32.xlu0 %v5866_v35, %s6921_s27  ;;  %v5910_v35 = vld [vmem:[%s7041_s25 + $0xe1] ss:$3 sm:$0xff] }
  0x63   : > { %907 = vrot.lane.b32.xlu1 %v5869_v36, %s6921_s27 }
  0x64   : > { %905 = vrot.lane.b32.xlu0 %v5868_v37, %s6921_s27 }
  0x67   : > { %911 = vrot.lane.b32.xlu1 %v5871_v38, %s6921_s27  ;;  %v5913_v38 = vld [vmem:[%s7041_s25 + $0x141] ss:$3 sm:$0xff] }
  0x68   : > { %909 = vrot.lane.b32.xlu0 %v5870_v39, %s6921_s27  ;;  %v5912_v39 = vld [vmem:[%s7041_s25 + $0x121] ss:$3 sm:$0xff] }
  0x6b   : > { %915 = vrot.lane.b32.xlu1 %v5873_v40, %s6921_s27 }
  0x6c   : > { %913 = vrot.lane.b32.xlu0 %v5872_v41, %s6921_s27 }
  0x6f   : > { %919 = vrot.lane.b32.xlu1 %v5875_v42, %s6921_s27  ;;  %v5915_v42 = vld [vmem:[%s7041_s25 + $0x181] ss:$3 sm:$0xff] }
  0x70   : > { %917 = vrot.lane.b32.xlu0 %v5874_v43, %s6921_s27  ;;  %v5914_v43 = vld [vmem:[%s7041_s25 + $0x161] ss:$3 sm:$0xff] }
  0x73   : > { %923 = vrot.lane.b32.xlu1 %v5877_v44, %s6921_s27 }
  0x74   : > { %921 = vrot.lane.b32.xlu0 %v5876_v45, %s6921_s27 }
  0x77   : > { %927 = vrot.lane.b32.xlu1 %v5879_v46, %s6921_s27  ;;  %v5917_v46 = vld [vmem:[%s7041_s25 + $0x1c1] ss:$3 sm:$0xff] }
  0x78   : > { %925 = vrot.lane.b32.xlu0 %v5878_v47, %s6921_s27  ;;  %v5916_v47 = vld [vmem:[%s7041_s25 + $0x1a1] ss:$3 sm:$0xff] }
  0x7b   : > { %979 = vrot.lane.b32.xlu1 %v5881_v48, %s6922_s28 }
  0x7c   : > { %977 = vrot.lane.b32.xlu0 %v5880_v49, %s6922_s28 }
  0x7f   : > { %983 = vrot.lane.b32.xlu1 %v5883_v50, %s6922_s28  ;;  %v5919_v50 = vld [vmem:[%s7041_s25 + $0x201] ss:$3 sm:$0xff] }
  0x80   : > { %981 = vrot.lane.b32.xlu0 %v5882_v51, %s6922_s28  ;;  %v5918_v51 = vld [vmem:[%s7041_s25 + $0x1e1] ss:$3 sm:$0xff] }
  0x83   : > { %987 = vrot.lane.b32.xlu1 %v5885_v52, %s6922_s28 }
  0x84   : > { %985 = vrot.lane.b32.xlu0 %v5884_v53, %s6922_s28 }
  0x87   : > { %991 = vrot.lane.b32.xlu1 %v5887_v54, %s6922_s28  ;;  %v5921_v54 = vld [vmem:[%s7041_s25 + $0x241] ss:$3 sm:$0xff] }
  0x88   : > { %989 = vrot.lane.b32.xlu0 %v5886_v55, %s6922_s28  ;;  %v5920_v55 = vld [vmem:[%s7041_s25 + $0x221] ss:$3 sm:$0xff] }
  0x8b   : > { %995 = vrot.lane.b32.xlu1 %v5889_v56, %s6922_s28 }
  0x8c   : > { %993 = vrot.lane.b32.xlu0 %v5888_v57, %s6922_s28 }
  0x8d   : > { %v7161_v60 = vpop.permute.xlu1 %789 }
  0x8e   : > { %v7163_v61 = vpop.permute.xlu0 %785 }
  0x8f   : > { %999 = vrot.lane.b32.xlu1 %v5891_v58, %s6922_s28  ;;  %v5923_v58 = vld [vmem:[%s7041_s25 + $0x281] ss:$3 sm:$0xff] }
  0x90   : > { %997 = vrot.lane.b32.xlu0 %v5890_v59, %s6922_s28  ;;  %v5922_v59 = vld [vmem:[%s7041_s25 + $0x261] ss:$3 sm:$0xff] }
  0x91   : > { %v7169_v0 = vpop.permute.xlu1 %791 }
  0x92   : > { %v7171_v1 = vpop.permute.xlu0 %787 }
  0x93   : > { %1003 = vrot.lane.b32.xlu1 %v5893_v62, %s6922_s28 }
  0x94   : > { %1001 = vrot.lane.b32.xlu0 %v5892_v63, %s6922_s28 }
  0x95   : > { %v7177_v4 = vpop.permute.xlu1 %795 }
  0x96   : > { %v7179_v5 = vpop.permute.xlu0 %793 }
  0x97   : > { %1007 = vrot.lane.b32.xlu1 %v5895_v2, %s6922_s28  ;;  %v5925_v2 = vld [vmem:[%s7041_s25 + $0x2c1] ss:$3 sm:$0xff] }
  0x98   : > { %1005 = vrot.lane.b32.xlu0 %v5894_v3, %s6922_s28  ;;  %v5924_v3 = vld [vmem:[%s7041_s25 + $0x2a1] ss:$3 sm:$0xff] }
  0x99   : > { %v7185_v8 = vpop.permute.xlu1 %799 }
  0x9a   : > { %v7187_v9 = vpop.permute.xlu0 %797 }
  0x9b   : > { %1011 = vrot.lane.b32.xlu1 %v5897_v6, %s6922_s28 }
  0x9c   : > { %1009 = vrot.lane.b32.xlu0 %v5896_v7, %s6922_s28 }
  0x9d   : > { %v7193_v12 = vpop.permute.xlu1 %803 }
  0x9e   : > { %v7195_v13 = vpop.permute.xlu0 %801 }
  0x9f   : > { %1015 = vrot.lane.b32.xlu1 %v5899_v10, %s6922_s28  ;;  %v5927_v10 = vld [vmem:[%s7041_s25 + $0x301] ss:$3 sm:$0xff] }
  0xa0   : > { %1013 = vrot.lane.b32.xlu0 %v5898_v11, %s6922_s28  ;;  %v5926_v11 = vld [vmem:[%s7041_s25 + $0x2e1] ss:$3 sm:$0xff] }
  0xa1   : > { %v7201_v16 = vpop.permute.xlu1 %807 }
  0xa2   : > { %10540 = vst [vmem:[#allocation6_spill] sm:$0xff] %v7201_v16  ;;  %v7203_v17 = vpop.permute.xlu0 %805  ;;  %v5809_v16 = vld [vmem:[%s7041_s25 + $0x20] ss:$3 sm:$0xff] }
  0xa3   : > { %1019 = vrot.lane.b32.xlu1 %v5901_v14, %s6922_s28 }
  0xa4   : > { %1017 = vrot.lane.b32.xlu0 %v5900_v15, %s6922_s28 }
  0xa5   : > { %v7209_v20 = vpop.permute.xlu1 %811 }
  0xa6   : > { %10541 = vst [vmem:[#allocation7_spill] sm:$0xff] %v7209_v20  ;;  %v7211_v21 = vpop.permute.xlu0 %809 }
  0xa7   : > { %10542 = vst [vmem:[#allocation8_spill] sm:$0xff] %v7211_v21  ;;  %1023 = vrot.lane.b32.xlu1 %v5903_v18, %s6922_s28  ;;  %v7318_v18 = vld [vmem:[%s7041_s25 + $0x42] ss:$3 sm:$0xff] }
  0xa8   : > { %1021 = vrot.lane.b32.xlu0 %v5902_v19, %s6922_s28  ;;  %10557 = vst [vmem:[#allocation23_spill] sm:$0xff] %v7318_v18  ;;  %v7321_v19 = vld [vmem:[%s7041_s25 + $0x22] ss:$3 sm:$0xff] }
  0xa9   : > { %v7221_v24 = vpop.permute.xlu1 %815  ;;  %v6011_v21 = vld [vmem:[%s7041_s25 + $0x1a2] ss:$3 sm:$0xff] }
  0xaa   : > { %10543 = vst [vmem:[#allocation9_spill] sm:$0xff] %v7221_v24  ;;  %v7223_v25 = vpop.permute.xlu0 %813  ;;  %v6008_v24 = vld [vmem:[%s7041_s25 + $0x142] ss:$3 sm:$0xff] }
  0xab   : > { %10544 = vst [vmem:[#allocation10_spill] sm:$0xff] %v7223_v25  ;;  %1075 = vrot.lane.b32.xlu1 %v7216_v22, %s6923_s29 }
  0xac   : > { %1073 = vrot.lane.b32.xlu0 %v7219_v23, %s6923_s29 }
  0xad   : > { %v7231_v28 = vpop.permute.xlu1 %819 }
  0xae   : > { %10545 = vst [vmem:[#allocation11_spill] sm:$0xff] %v7231_v28  ;;  %v7233_v29 = vpop.permute.xlu0 %817 }
  0xaf   : > { %10546 = vst [vmem:[#allocation12_spill] sm:$0xff] %v7233_v29  ;;  %1079 = vrot.lane.b32.xlu1 %v5907_v26, %s6923_s29 }
  0xb0   : > { %1077 = vrot.lane.b32.xlu0 %v5906_v27, %s6923_s29 }
  0xb1   : > { %v7239_v32 = vpop.permute.xlu1 %823 }
  0xb2   : > { %10547 = vst [vmem:[#allocation13_spill] sm:$0xff] %v7239_v32  ;;  %v7241_v33 = vpop.permute.xlu0 %821 }
  0xb3   : > { %10548 = vst [vmem:[#allocation14_spill] sm:$0xff] %v7241_v33  ;;  %1083 = vrot.lane.b32.xlu1 %v5909_v30, %s6923_s29  ;;  %v7330_v30 = vld [vmem:[%s10523_s1 + $0x18] sm:$0x7] }
  0xb4   : > { %1081 = vrot.lane.b32.xlu0 %v5908_v31, %s6923_s29  ;;  %v7339_v31 = vld [vmem:[%s10523_s1 + $0x10] sm:$0xff]  ;;  %6378 = vmatprep.subr.msk.mxu0 %vm1806_vm0, %v7330_v30 }
  0xb5   : > { %v7247_v36 = vpop.permute.xlu1 %827  ;;  %6422 = vmatprep.subr.msk.mxu1 %vm1806_vm0, %v7330_v30  ;;  %6379 = vmatpush3.msk.msra.mxu0 %vm1806_vm0, %v7330_v30 }
  0xb6   : > { %10549 = vst [vmem:[#allocation15_spill] sm:$0xff] %v7247_v36  ;;  %v7249_v37 = vpop.permute.xlu0 %825  ;;  %6423 = vmatpush3.msk.msra.mxu1 %vm1806_vm0, %v7330_v30  ;;  %6380 = vmatprep.subr.mxu0 %v7339_v31 }
  0xb7   : > { %10550 = vst [vmem:[#allocation16_spill] sm:$0xff] %v7249_v37  ;;  %1087 = vrot.lane.b32.xlu1 %v5911_v34, %s6923_s29  ;;  %v5931_v34 = vld [vmem:[%s7041_s25 + $0x82] ss:$3 sm:$0xff]  ;;  %6424 = vmatprep.subr.mxu1 %v7339_v31 }
  0xb8   : > { %1085 = vrot.lane.b32.xlu0 %v5910_v35, %s6923_s29  ;;  %v5930_v35 = vld [vmem:[%s7041_s25 + $0x62] ss:$3 sm:$0xff]  ;;  %6381 = vmatpush3.msra.mxu0 %v7339_v31 }
  0xb9   : > { %v7255_v40 = vpop.permute.xlu1 %831  ;;  %6425 = vmatpush3.msra.mxu1 %v7339_v31 }
  0xba   : > { %10551 = vst [vmem:[#allocation17_spill] sm:$0xff] %v7255_v40  ;;  %v7257_v41 = vpop.permute.xlu0 %829 }
  0xbb   : > { %10552 = vst [vmem:[#allocation18_spill] sm:$0xff] %v7257_v41  ;;  %1091 = vrot.lane.b32.xlu1 %v5913_v38, %s6923_s29  ;;  %v6002_v41 = vld [vmem:[%s7041_s25 + $0x82] ss:$3 sm:$0xff] }
  0xbc   : > { %1089 = vrot.lane.b32.xlu0 %v5912_v39, %s6923_s29 }
  0xbd   : > { %v7263_v44 = vpop.permute.xlu1 %883 }
  0xbe   : > { %v7265_v45 = vpop.permute.xlu0 %881 }
  0xbf   : > { %1095 = vrot.lane.b32.xlu1 %v5915_v42, %s6923_s29  ;;  %v7359_v42 = vld [vmem:[%s10523_s1 + $0x8] sm:$0xff] }
  0xc0   : > { %1093 = vrot.lane.b32.xlu0 %v5914_v43, %s6923_s29  ;;  %v5952_v43 = vld [vmem:[%s7041_s25 + $0x40] ss:$3 sm:$0xff]  ;;  %6382 = vmatprep.subr.mxu0 %v7359_v42 }
  0xc1   : > { %v7271_v48 = vpop.permute.xlu1 %887  ;;  %6426 = vmatprep.subr.mxu1 %v7359_v42  ;;  %6383 = vmatpush3.msra.mxu0 %v7359_v42 }
  0xc2   : > { %v7273_v49 = vpop.permute.xlu0 %885  ;;  %6427 = vmatpush3.msra.mxu1 %v7359_v42 }
  0xc3   : > { %1099 = vrot.lane.b32.xlu1 %v5917_v46, %s6923_s29  ;;  %v5932_v46 = vld [vmem:[%s7041_s25 + $0xa2] ss:$3 sm:$0xff] }
  0xc4   : > { %1097 = vrot.lane.b32.xlu0 %v5916_v47, %s6923_s29 }
  0xc5   : > { %v7279_v52 = vpop.permute.xlu1 %891 }
  0xc6   : > { %v7281_v53 = vpop.permute.xlu0 %889 }
  0xc7   : > { %1103 = vrot.lane.b32.xlu1 %v5919_v50, %s6923_s29 }
  0xc8   : > { %1101 = vrot.lane.b32.xlu0 %v5918_v51, %s6923_s29  ;;  %v7376_v51 = vld [vmem:[%s10523_s1] sm:$0xff] }
  0xc9   : > { %v7287_v56 = vpop.permute.xlu1 %895  ;;  %6384 = vmatprep.subr.mxu0 %v7376_v51  ;;  %6428 = vmatprep.subr.mxu1 %v7376_v51 }
  0xca   : > { %v7289_v57 = vpop.permute.xlu0 %893  ;;  %6385 = vmatpush3.msra.mxu0 %v7376_v51  ;;  %6429 = vmatpush3.msra.mxu1 %v7376_v51 }
  0xcb   : > { %1107 = vrot.lane.b32.xlu1 %v5921_v54, %s6923_s29  ;;  %v7384_v54 = vld [vmem:[%s7041_s25 + $0x41] ss:$3 sm:$0xff]  ;;  %6466 = vmatprep.subr.msk.mxu0 %vm1806_vm0, %v7330_v30 }
  0xcc   : > { %1105 = vrot.lane.b32.xlu0 %v5920_v55, %s6923_s29  ;;  %10564 = vst [vmem:[#allocation30_spill] sm:$0xff] %v7384_v54  ;;  %v5953_v55 = vld [vmem:[%s7041_s25 + $0x60] ss:$3 sm:$0xff] }
  0xcd   : > { %v7295_v62 = vpop.permute.xlu1 %899 }
  0xce   : > { %v7297_v63 = vpop.permute.xlu0 %897 }
  0xcf   : > { %1111 = vrot.lane.b32.xlu1 %v5923_v58, %s6923_s29 }
  0xd0   : > { %1109 = vrot.lane.b32.xlu0 %v5922_v59, %s6923_s29 }
  0xd1   : > { %v7303_v6 = vpop.permute.xlu1 %903 }
  0xd2   : > { %10553 = vst [vmem:[#allocation19_spill] sm:$0xff] %v7303_v6  ;;  %v7305_v7 = vpop.permute.xlu0 %901 }
  0xd3   : > { %10554 = vst [vmem:[#allocation20_spill] sm:$0xff] %v7305_v7  ;;  %1115 = vrot.lane.b32.xlu1 %v5925_v2, %s6923_s29  ;;  %v7401_v2 = vld [vmem:[%s7041_s25 + $0x42] ss:$3 sm:$0xff] }
  0xd4   : > { %1113 = vrot.lane.b32.xlu0 %v5924_v3, %s6923_s29  ;;  %10567 = vst [vmem:[#allocation33_spill] sm:$0xff] %v7401_v2  ;;  %v7404_v3 = vld [vmem:[%s7041_s25 + $0x61] ss:$3 sm:$0xff] }
  0xd5   : > { %v7311_v14 = vpop.permute.xlu1 %907  ;;  %10568 = vst [vmem:[#allocation34_spill] sm:$0xff] %v7404_v3 }
  0xd6   : > { %10555 = vst [vmem:[#allocation21_spill] sm:$0xff] %v7311_v14  ;;  %v7313_v15 = vpop.permute.xlu0 %905  ;;  %v5986_v14 = vld [vmem:[%s7041_s25 + $0x181] ss:$3 sm:$0xff] }
  0xd7   : > { %10556 = vst [vmem:[#allocation22_spill] sm:$0xff] %v7313_v15  ;;  %1119 = vrot.lane.b32.xlu1 %v5927_v10, %s6923_s29 }
  0xd8   : > { %1117 = vrot.lane.b32.xlu0 %v5926_v11, %s6923_s29 }
  0xd9   : > { %v7323_v26 = vpop.permute.xlu1 %911 }
  0xda   : > { %10558 = vst [vmem:[#allocation24_spill] sm:$0xff] %v7323_v26  ;;  %v7325_v27 = vpop.permute.xlu0 %909 }
  0xdb   : > { %10559 = vst [vmem:[#allocation25_spill] sm:$0xff] %v7325_v27  ;;  %1171 = vrot.lane.b32.xlu1 %v7318_v18, %s6924_s17  ;;  %v6009_v27 = vld [vmem:[%s7041_s25 + $0x162] ss:$3 sm:$0xff] }
  0xdc   : > { %1169 = vrot.lane.b32.xlu0 %v7321_v19, %s6924_s17 }
  0xdd   : > { %v7347_v38 = vpop.permute.xlu1 %915 }
  0xde   : > { %10560 = vst [vmem:[#allocation26_spill] sm:$0xff] %v7347_v38  ;;  %v7349_v39 = vpop.permute.xlu0 %913  ;;  %v6004_v38 = vld [vmem:[%s7041_s25 + $0xc2] ss:$3 sm:$0xff] }
  0xdf   : > { %10561 = vst [vmem:[#allocation27_spill] sm:$0xff] %v7349_v39  ;;  %1175 = vrot.lane.b32.xlu1 %v5931_v34, %s6924_s17  ;;  %v5954_v34 = vld [vmem:[%s7041_s25 + $0x80] ss:$3 sm:$0xff]  ;;  %v6005_v39 = vld [vmem:[%s7041_s25 + $0xe2] ss:$3 sm:$0xff] }
  0xe0   : > { %1173 = vrot.lane.b32.xlu0 %v5930_v35, %s6924_s17  ;;  %v6001_v35 = vld [vmem:[%s7041_s25 + $0x62] ss:$3 sm:$0xff] }
  0xe1   : > { %v7368_v47 = vpop.permute.xlu1 %919 }
  0xe2   : > { %10562 = vst [vmem:[#allocation28_spill] sm:$0xff] %v7368_v47  ;;  %v7370_v50 = vpop.permute.xlu0 %917  ;;  %v5956_v47 = vld [vmem:[%s7041_s25 + $0xc0] ss:$3 sm:$0xff] }
  0xe3   : > { %10563 = vst [vmem:[#allocation29_spill] sm:$0xff] %v7370_v50  ;;  %1265 = vrot.lane.b32.xlu1 %v5952_v43, %s6925_s21  ;;  %v5980_v50 = vld [vmem:[%s7041_s25 + $0xc1] ss:$3 sm:$0xff] }
  0xe4   : > { %1177 = vrot.lane.b32.xlu0 %v5932_v46, %s6924_s17 }
  0xe5   : > { %v7389_v58 = vpop.permute.xlu1 %923 }
  0xe6   : > { %10565 = vst [vmem:[#allocation31_spill] sm:$0xff] %v7389_v58  ;;  %v7391_v59 = vpop.permute.xlu0 %921  ;;  %v5979_v58 = vld [vmem:[%s7041_s25 + $0xa1] ss:$3 sm:$0xff] }
  0xe7   : > { %10566 = vst [vmem:[#allocation32_spill] sm:$0xff] %v7391_v59  ;;  %1361 = vrot.lane.b32.xlu1 %v7384_v54, %s6926_s22  ;;  %v6003_v59 = vld [vmem:[%s7041_s25 + $0xa2] ss:$3 sm:$0xff]  ;;  %v5962_v54 = vld [vmem:[%s7041_s25 + $0x180] ss:$3 sm:$0xff] }
  0xe8   : > { %1267 = vrot.lane.b32.xlu0 %v5953_v55, %s6925_s21  ;;  %v5978_v55 = vld [vmem:[%s7041_s25 + $0x81] ss:$3 sm:$0xff] }
  0xe9   : > { %v7406_v10 = vpop.permute.xlu1 %927 }
  0xea   : > { %10569 = vst [vmem:[#allocation35_spill] sm:$0xff] %v7406_v10  ;;  %v7408_v11 = vpop.permute.xlu0 %925  ;;  %v5955_v10 = vld [vmem:[%s7041_s25 + $0xa0] ss:$3 sm:$0xff] }
  0xeb   : > { %10570 = vst [vmem:[#allocation36_spill] sm:$0xff] %v7408_v11  ;;  %1457 = vrot.lane.b32.xlu1 %v7401_v2, %s6927_s23  ;;  %v5958_v2 = vld [vmem:[%s7041_s25 + $0x100] ss:$3 sm:$0xff] }
  0xec   : > { %1363 = vrot.lane.b32.xlu0 %v7404_v3, %s6926_s22 }
  0xed   : > { %v7416_v43 = vpop.permute.xlu1 %979 }
  0xee   : > { %v7418_v46 = vpop.permute.xlu0 %977 }
  0xef   : > { %1269 = vrot.lane.b32.xlu1 %v5954_v34, %s6925_s21 }
  0xf0   : > { %1459 = vrot.lane.b32.xlu0 %v6001_v35, %s6927_s23  ;;  %v5933_v35 = vld [vmem:[%s7041_s25 + $0xc2] ss:$3 sm:$0xff] }
  0xf1   : > { %v7424_v40 = vpop.permute.xlu1 %983 }
  0xf2   : > { %v7426_v11 = vpop.permute.xlu0 %981 }
  0xf3   : > { %1365 = vrot.lane.b32.xlu1 %v5978_v55, %s6926_s22 }
  0xf4   : > { %1271 = vrot.lane.b32.xlu0 %v5955_v10, %s6925_s21  ;;  %v5957_v10 = vld [vmem:[%s7041_s25 + $0xe0] ss:$3 sm:$0xff] }
  0xf5   : > { %v7432_v36 = vpop.permute.xlu1 %987 }
  0xf6   : > { %v7434_v34 = vpop.permute.xlu0 %985 }
  0xf7   : > { %1461 = vrot.lane.b32.xlu1 %v6002_v41, %s6927_s23 }
  0xf8   : > { %1367 = vrot.lane.b32.xlu0 %v5979_v58, %s6926_s22  ;;  %v5981_v58 = vld [vmem:[%s7041_s25 + $0xe1] ss:$3 sm:$0xff] }
  0xf9   : > { %v7440_v37 = vpop.permute.xlu1 %991 }
  0xfa   : > { %v7442_v55 = vpop.permute.xlu0 %989 }
  0xfb   : > { %1179 = vrot.lane.b32.xlu1 %v5933_v35, %s6924_s17 }
  0xfc   : > { %1463 = vrot.lane.b32.xlu0 %v6003_v59, %s6927_s23  ;;  %v5934_v59 = vld [vmem:[%s7041_s25 + $0xe2] ss:$3 sm:$0xff] }
  0xfd   : > { %v7448_v32 = vpop.permute.xlu1 %995 }
  0xfe   : > { %v7450_v41 = vpop.permute.xlu0 %993 }
  0xff   : > { %1275 = vrot.lane.b32.xlu1 %v5957_v10, %s6925_s21 }
 0x100   : > { %1273 = vrot.lane.b32.xlu0 %v5956_v47, %s6925_s21  ;;  %v5935_v47 = vld [vmem:[%s7041_s25 + $0x102] ss:$3 sm:$0xff] }
 0x101   : > { %v7456_v33 = vpop.permute.xlu1 %999 }
 0x102   : > { %10571 = vst [vmem:[#allocation37_spill] sm:$0xff] %v7456_v33  ;;  %v7458_v35 = vpop.permute.xlu0 %997  ;;  %v6014_v33 = vld [vmem:[%s7041_s25 + $0x202] ss:$3 sm:$0xff] }
 0x103   : > { %10572 = vst [vmem:[#allocation38_spill] sm:$0xff] %v7458_v35  ;;  %1371 = vrot.lane.b32.xlu1 %v5981_v58, %s6926_s22 }
 0x104   : > { %1369 = vrot.lane.b32.xlu0 %v5980_v50, %s6926_s22  ;;  %v5959_v50 = vld [vmem:[%s7041_s25 + $0x120] ss:$3 sm:$0xff] }
 0x105   : > { %v7464_v28 = vpop.permute.xlu1 %1003 }
 0x106   : > { %10573 = vst [vmem:[#allocation39_spill] sm:$0xff] %v7464_v28  ;;  %v7466_v10 = vpop.permute.xlu0 %1001 }
 0x107   : > { %10574 = vst [vmem:[#allocation40_spill] sm:$0xff] %v7466_v10  ;;  %1181 = vrot.lane.b32.xlu1 %v5934_v59, %s6924_s17  ;;  %v6010_v10 = vld [vmem:[%s7041_s25 + $0x182] ss:$3 sm:$0xff] }
 0x108   : > { %1465 = vrot.lane.b32.xlu0 %v6004_v38, %s6927_s23  ;;  %v5983_v38 = vld [vmem:[%s7041_s25 + $0x121] ss:$3 sm:$0xff] }
 0x109   : > { %v7472_v29 = vpop.permute.xlu1 %1007 }
 0x10a   : > { %10575 = vst [vmem:[#allocation41_spill] sm:$0xff] %v7472_v29  ;;  %v7474_v58 = vpop.permute.xlu0 %1005  ;;  %v5982_v29 = vld [vmem:[%s7041_s25 + $0x101] ss:$3 sm:$0xff] }
 0x10b   : > { %10576 = vst [vmem:[#allocation42_spill] sm:$0xff] %v7474_v58  ;;  %1183 = vrot.lane.b32.xlu1 %v5935_v47, %s6924_s17 }
 0x10c   : > { %1467 = vrot.lane.b32.xlu0 %v6005_v39, %s6927_s23  ;;  %v5936_v39 = vld [vmem:[%s7041_s25 + $0x122] ss:$3 sm:$0xff] }
 0x10d   : > { %v7480_v26 = vpop.permute.xlu1 %1011 }
 0x10e   : > { %10577 = vst [vmem:[#allocation43_spill] sm:$0xff] %v7480_v26  ;;  %v7482_v59 = vpop.permute.xlu0 %1009  ;;  %v6006_v26 = vld [vmem:[%s7041_s25 + $0x102] ss:$3 sm:$0xff] }
 0x10f   : > { %10578 = vst [vmem:[#allocation44_spill] sm:$0xff] %v7482_v59  ;;  %1279 = vrot.lane.b32.xlu1 %v5959_v50, %s6925_s21 }
 0x110   : > { %1277 = vrot.lane.b32.xlu0 %v5958_v2, %s6925_s21  ;;  %v5937_v2 = vld [vmem:[%s7041_s25 + $0x142] ss:$3 sm:$0xff] }
 0x111   : > { %v7488_v3 = vpop.permute.xlu1 %1015 }
 0x112   : > { %10579 = vst [vmem:[#allocation45_spill] sm:$0xff] %v7488_v3  ;;  %v7490_v47 = vpop.permute.xlu0 %1013  ;;  %v6007_v3 = vld [vmem:[%s7041_s25 + $0x122] ss:$3 sm:$0xff] }
 0x113   : > { %10580 = vst [vmem:[#allocation46_spill] sm:$0xff] %v7490_v47  ;;  %1375 = vrot.lane.b32.xlu1 %v5983_v38, %s6926_s22 }
 0x114   : > { %1373 = vrot.lane.b32.xlu0 %v5982_v29, %s6926_s22  ;;  %v5961_v29 = vld [vmem:[%s7041_s25 + $0x160] ss:$3 sm:$0xff] }
 0x115   : > { %v7496_v59 = vpop.permute.xlu1 %1019 }
 0x116   : > { %10581 = vst [vmem:[#allocation47_spill] sm:$0xff] %v7496_v59  ;;  %v7498_v50 = vpop.permute.xlu0 %1017  ;;  %v5960_v59 = vld [vmem:[%s7041_s25 + $0x140] ss:$3 sm:$0xff] }
 0x117   : > { %10582 = vst [vmem:[#allocation48_spill] sm:$0xff] %v7498_v50  ;;  %1185 = vrot.lane.b32.xlu1 %v5936_v39, %s6924_s17 }
 0x118   : > { %1469 = vrot.lane.b32.xlu0 %v6006_v26, %s6927_s23  ;;  %v5985_v26 = vld [vmem:[%s7041_s25 + $0x161] ss:$3 sm:$0xff] }
 0x119   : > { %v7504_v47 = vpop.permute.xlu1 %1023 }
 0x11a   : > { %10583 = vst [vmem:[#allocation49_spill] sm:$0xff] %v7504_v47  ;;  %v7506_v38 = vpop.permute.xlu0 %1021  ;;  %v5984_v47 = vld [vmem:[%s7041_s25 + $0x141] ss:$3 sm:$0xff] }
 0x11b   : > { %10584 = vst [vmem:[#allocation50_spill] sm:$0xff] %v7506_v38  ;;  %1187 = vrot.lane.b32.xlu1 %v5937_v2, %s6924_s17 }
 0x11c   : > { %1471 = vrot.lane.b32.xlu0 %v6007_v3, %s6927_s23  ;;  %v5938_v3 = vld [vmem:[%s7041_s25 + $0x162] ss:$3 sm:$0xff] }
 0x11d   : > { %v7512_v50 = vpop.permute.xlu1 %1075 }
 0x11e   : > { %v7514_v39 = vpop.permute.xlu0 %1073 }
 0x11f   : > { %1283 = vrot.lane.b32.xlu1 %v5961_v29, %s6925_s21 }
 0x120   : > { %1281 = vrot.lane.b32.xlu0 %v5960_v59, %s6925_s21  ;;  %v5939_v59 = vld [vmem:[%s7041_s25 + $0x182] ss:$3 sm:$0xff] }
 0x121   : > { %v7520_v38 = vpop.permute.xlu1 %1079 }
 0x122   : > { %v7522_v2 = vpop.permute.xlu0 %1077 }
 0x123   : > { %1379 = vrot.lane.b32.xlu1 %v5985_v26, %s6926_s22 }
 0x124   : > { %1377 = vrot.lane.b32.xlu0 %v5984_v47, %s6926_s22  ;;  %v5963_v47 = vld [vmem:[%s7041_s25 + $0x1a0] ss:$3 sm:$0xff] }
 0x125   : > { %v7528_v58 = vpop.permute.xlu1 %1083 }
 0x126   : > { %v7530_v29 = vpop.permute.xlu0 %1081 }
 0x127   : > { %1189 = vrot.lane.b32.xlu1 %v5938_v3, %s6924_s17 }
 0x128   : > { %1473 = vrot.lane.b32.xlu0 %v6008_v24, %s6927_s23  ;;  %v5987_v24 = vld [vmem:[%s7041_s25 + $0x1a1] ss:$3 sm:$0xff] }
 0x129   : > { %v7536_v25 = vpop.permute.xlu1 %1087 }
 0x12a   : > { %v7538_v26 = vpop.permute.xlu0 %1085 }
 0x12b   : > { %1191 = vrot.lane.b32.xlu1 %v5939_v59, %s6924_s17 }
 0x12c   : > { %1475 = vrot.lane.b32.xlu0 %v6009_v27, %s6927_s23  ;;  %v5940_v27 = vld [vmem:[%s7041_s25 + $0x1a2] ss:$3 sm:$0xff] }
 0x12d   : > { %v7544_v28 = vpop.permute.xlu1 %1091 }
 0x12e   : > { %v7546_v3 = vpop.permute.xlu0 %1089 }
 0x12f   : > { %1287 = vrot.lane.b32.xlu1 %v5963_v47, %s6925_s21 }
 0x130   : > { %1285 = vrot.lane.b32.xlu0 %v5962_v54, %s6925_s21  ;;  %v5941_v54 = vld [vmem:[%s7041_s25 + $0x1c2] ss:$3 sm:$0xff] }
 0x131   : > { %v7552_v20 = vpop.permute.xlu1 %1095 }
 0x132   : > { %10585 = vst [vmem:[#allocation51_spill] sm:$0xff] %v7552_v20  ;;  %v7554_v59 = vpop.permute.xlu0 %1093 }
 0x133   : > { %10586 = vst [vmem:[#allocation52_spill] sm:$0xff] %v7554_v59  ;;  %1383 = vrot.lane.b32.xlu1 %v5987_v24, %s6926_s22  ;;  %v6015_v59 = vld [vmem:[%s7041_s25 + $0x222] ss:$3 sm:$0xff] }
 0x134   : > { %1381 = vrot.lane.b32.xlu0 %v5986_v14, %s6926_s22  ;;  %v5965_v14 = vld [vmem:[%s7041_s25 + $0x1e0] ss:$3 sm:$0xff] }
 0x135   : > { %v7560_v15 = vpop.permute.xlu1 %1099 }
 0x136   : > { %10587 = vst [vmem:[#allocation53_spill] sm:$0xff] %v7560_v15  ;;  %v7562_v47 = vpop.permute.xlu0 %1097  ;;  %v5964_v15 = vld [vmem:[%s7041_s25 + $0x1c0] ss:$3 sm:$0xff] }
 0x137   : > { %10588 = vst [vmem:[#allocation54_spill] sm:$0xff] %v7562_v47  ;;  %1193 = vrot.lane.b32.xlu1 %v5940_v27, %s6924_s17 }
 0x138   : > { %1477 = vrot.lane.b32.xlu0 %v6010_v10, %s6927_s23  ;;  %v5989_v10 = vld [vmem:[%s7041_s25 + $0x1e1] ss:$3 sm:$0xff] }
 0x139   : > { %v7568_v18 = vpop.permute.xlu1 %1103 }
 0x13a   : > { %10589 = vst [vmem:[#allocation55_spill] sm:$0xff] %v7568_v18  ;;  %v7570_v24 = vpop.permute.xlu0 %1101  ;;  %v5988_v18 = vld [vmem:[%s7041_s25 + $0x1c1] ss:$3 sm:$0xff] }
 0x13b   : > { %10590 = vst [vmem:[#allocation56_spill] sm:$0xff] %v7570_v24  ;;  %1195 = vrot.lane.b32.xlu1 %v5941_v54, %s6924_s17 }
 0x13c   : > { %1479 = vrot.lane.b32.xlu0 %v6011_v21, %s6927_s23  ;;  %v5942_v21 = vld [vmem:[%s7041_s25 + $0x1e2] ss:$3 sm:$0xff] }
 0x13d   : > { %v7576_v47 = vpop.permute.xlu1 %1107 }
 0x13e   : > { %10591 = vst [vmem:[#allocation57_spill] sm:$0xff] %v7576_v47  ;;  %v7578_v27 = vpop.permute.xlu0 %1105  ;;  %v6012_v47 = vld [vmem:[%s7041_s25 + $0x1c2] ss:$3 sm:$0xff] }
 0x13f   : > { %10592 = vst [vmem:[#allocation58_spill] sm:$0xff] %v7578_v27  ;;  %1291 = vrot.lane.b32.xlu1 %v5965_v14, %s6925_s21 }
 0x140   : > { %1289 = vrot.lane.b32.xlu0 %v5964_v15, %s6925_s21  ;;  %v5943_v15 = vld [vmem:[%s7041_s25 + $0x202] ss:$3 sm:$0xff] }
 0x141   : > { %v7584_v24 = vpop.permute.xlu1 %1111 }
 0x142   : > { %10593 = vst [vmem:[#allocation59_spill] sm:$0xff] %v7584_v24  ;;  %v7586_v54 = vpop.permute.xlu0 %1109  ;;  %v6013_v24 = vld [vmem:[%s7041_s25 + $0x1e2] ss:$3 sm:$0xff] }
 0x143   : > { %10594 = vst [vmem:[#allocation60_spill] sm:$0xff] %v7586_v54  ;;  %1387 = vrot.lane.b32.xlu1 %v5989_v10, %s6926_s22  ;;  %v5966_v10 = vld [vmem:[%s7041_s25 + $0x200] ss:$3 sm:$0xff] }
 0x144   : > { %1385 = vrot.lane.b32.xlu0 %v5988_v18, %s6926_s22  ;;  %v5967_v18 = vld [vmem:[%s7041_s25 + $0x220] ss:$3 sm:$0xff] }
 0x145   : > { %v7592_v27 = vpop.permute.xlu1 %1115 }
 0x146   : > { %10595 = vst [vmem:[#allocation61_spill] sm:$0xff] %v7592_v27  ;;  %v7594_v14 = vpop.permute.xlu0 %1113 }
 0x147   : > { %10596 = vst [vmem:[#allocation62_spill] sm:$0xff] %v7594_v14  ;;  %1197 = vrot.lane.b32.xlu1 %v5942_v21, %s6924_s17  ;;  %v5990_v21 = vld [vmem:[%s7041_s25 + $0x201] ss:$3 sm:$0xff] }
 0x148   : > { %1481 = vrot.lane.b32.xlu0 %v6012_v47, %s6927_s23  ;;  %v5991_v47 = vld [vmem:[%s7041_s25 + $0x221] ss:$3 sm:$0xff] }
 0x149   : > { %v7600_v54 = vpop.permute.xlu1 %1119 }
 0x14a   : > { %10597 = vst [vmem:[#allocation63_spill] sm:$0xff] %v7600_v54  ;;  %v7602_v20 = vpop.permute.xlu0 %1117 }
 0x14b   : > { %10598 = vst [vmem:[#allocation64_spill] sm:$0xff] %v7602_v20  ;;  %1199 = vrot.lane.b32.xlu1 %v5943_v15, %s6924_s17  ;;  %v5944_v15 = vld [vmem:[%s7041_s25 + $0x222] ss:$3 sm:$0xff] }
 0x14c   : > { %1483 = vrot.lane.b32.xlu0 %v6013_v24, %s6927_s23  ;;  %v330_v24 = vld [vmem:[%s7041_s25] ss:$3 sm:$0xff] }
 0x14d   : > { %v1172_v27 = vpop.permute.xlu1 %1171  ;;  %v1530_v6 = vsel %vm1529_vm1, %v330_v24, %v7163_v61 }
 0x14e   : > { %v1170_v14 = vpop.permute.xlu0 %1169 }
 0x14f   : > { %1295 = vrot.lane.b32.xlu1 %v5967_v18, %s6925_s21 }
 0x150   : > { %1293 = vrot.lane.b32.xlu0 %v5966_v10, %s6925_s21 }
 0x151   : > { %v7612_v54 = vpop.permute.xlu1 %1175 }
 0x152   : > { %v7614_v20 = vpop.permute.xlu0 %1173 }
 0x153   : > { %1391 = vrot.lane.b32.xlu1 %v5991_v47, %s6926_s22  ;;  %v1555_v47 = vsel %vm1554_vm2, %v1530_v6, %v7265_v45 }
 0x154   : > { %1389 = vrot.lane.b32.xlu0 %v5990_v21, %s6926_s22  ;;  %v5945_v21 = vld [vmem:[%s7041_s25 + $0x242] ss:$3 sm:$0xff]  ;;  %v1580_v35 = vsel %vm1579_vm3, %v1555_v47, %v7418_v46 }
 0x155   : > { %v1266_v18 = vpop.permute.xlu1 %1265  ;;  %v1605_v24 = vsel %vm1604_vm4, %v1580_v35, %v7514_v39  ;;  %v5968_v35 = vld [vmem:[%s7041_s25 + $0x240] ss:$3 sm:$0xff] }
 0x156   : > { %v7621_v10 = vpop.permute.xlu0 %1177  ;;  %v1630_v45 = vsel %vm1629_vm5, %v1605_v24, %v1170_v14 }
 0x157   : > { %1201 = vrot.lane.b32.xlu1 %v5944_v15, %s6924_s17  ;;  %v1655_v46 = vsel %vm1654_vm6, %v1630_v45, %v1266_v18  ;;  %v5969_v15 = vld [vmem:[%s7041_s25 + $0x260] ss:$3 sm:$0xff] }
 0x158   : > { %1485 = vrot.lane.b32.xlu0 %v6014_v33, %s6927_s23  ;;  %v1531_v33 = vsel %vm1529_vm1, %v5809_v16, %v7171_v1  ;;  %v5810_v18 = vld [vmem:[%s7041_s25 + $0x40] ss:$3 sm:$0xff] }
 0x159   : > { %v1362_v7 = vpop.permute.xlu1 %1361  ;;  %v1556_v6 = vsel %vm1554_vm2, %v1531_v33, %v7263_v44 }
 0x15a   : > { %v1268_v61 = vpop.permute.xlu0 %1267  ;;  %v1581_v1 = vsel %vm1579_vm3, %v1556_v6, %v7416_v43  ;;  %v1680_v16 = vsel %vm1679_vm7, %v1655_v46, %v1362_v7  ;;  %v5993_v43 = vld [vmem:[%s7041_s25 + $0x261] ss:$3 sm:$0xff]  ;;  %v5811_v6 = vld [vmem:[%s7041_s25 + $0x60] ss:$3 sm:$0xff]  ;;  %v5946_v46 = vld [vmem:[%s7041_s25 + $0x262] ss:$3 sm:$0xff] }
 0x15b   : > { %1203 = vrot.lane.b32.xlu1 %v5945_v21, %s6924_s17  ;;  %v5992_v21 = vld [vmem:[%s7041_s25 + $0x241] ss:$3 sm:$0xff] }
 0x15c   : > { %1487 = vrot.lane.b32.xlu0 %v6015_v59, %s6927_s23  ;;  %v1606_v59 = vsel %vm1604_vm4, %v1581_v1, %v7512_v50 }
 0x15d   : > { %v1458_v39 = vpop.permute.xlu1 %1457  ;;  %v1631_v44 = vsel %vm1629_vm5, %v1606_v59, %v1172_v27  ;;  %v1532_v27 = vsel %vm1529_vm1, %v5810_v18, %v7161_v60  ;;  %v5971_v18 = vld [vmem:[%s7041_s25 + $0x2a0] ss:$3 sm:$0xff] }
 0x15e   : > { %v1364_v14 = vpop.permute.xlu0 %1363  ;;  %v1705_v47 = vsel %vm1704_vm8, %v1680_v16, %v1458_v39  ;;  %v1656_v7 = vsel %vm1654_vm6, %v1631_v44, %v1268_v61  ;;  %v1557_v61 = vsel %vm1554_vm2, %v1532_v27, %v7273_v49  ;;  %v1533_v49 = vsel %vm1529_vm1, %v5811_v6, %v7169_v0 }
 0x15f   : > { %1299 = vrot.lane.b32.xlu1 %v5969_v15, %s6925_s21  ;;  %6386 = vmatprep.mubr.msk.f32.mxu0 %vm1733_vm9, %v1705_v47  ;;  %v1681_v50 = vsel %vm1679_vm7, %v1656_v7, %v1364_v14  ;;  %v6016_v15 = vld [vmem:[%s7041_s25 + $0x242] ss:$3 sm:$0xff] }
 0x160   : > { %1297 = vrot.lane.b32.xlu0 %v5968_v35, %s6925_s21  ;;  %v1582_v35 = vsel %vm1579_vm3, %v1557_v61, %v7426_v11  ;;  %v1558_v11 = vsel %vm1554_vm2, %v1533_v49, %v7271_v48  ;;  %v5947_v14 = vld [vmem:[%s7041_s25 + $0x282] ss:$3 sm:$0xff] }
 0x161   : > { %v1270_v24 = vpop.permute.xlu1 %1269  ;;  %v1607_v60 = vsel %vm1604_vm4, %v1582_v35, %v7522_v2  ;;  %v6017_v2 = vld [vmem:[%s7041_s25 + $0x262] ss:$3 sm:$0xff]  ;;  %v1583_v0 = vsel %vm1579_vm3, %v1558_v11, %v7424_v40 }
 0x162   : > { %v1460_v33 = vpop.permute.xlu0 %1459  ;;  %v1632_v39 = vsel %vm1629_vm5, %v1607_v60, %v7614_v20  ;;  %v1608_v48 = vsel %vm1604_vm4, %v1583_v0, %v7520_v38  ;;  %v5970_v38 = vld [vmem:[%s7041_s25 + $0x280] ss:$3 sm:$0xff]  ;;  %v5948_v61 = vld [vmem:[%s7041_s25 + $0x2a2] ss:$3 sm:$0xff] }
 0x163   : > { %v1706_v45 = vsel %vm1704_vm8, %v1681_v50, %v1460_v33  ;;  %1395 = vrot.lane.b32.xlu1 %v5993_v43, %s6926_s22  ;;  %v5995_v50 = vld [vmem:[%s7041_s25 + $0x2a1] ss:$3 sm:$0xff]  ;;  %v5949_v49 = vld [vmem:[%s7041_s25 + $0x2c2] ss:$3 sm:$0xff]  ;;  %v5972_v0 = vld [vmem:[%s7041_s25 + $0x2c0] ss:$3 sm:$0xff] }
 0x164   : > { %1393 = vrot.lane.b32.xlu0 %v5992_v21, %s6926_s22  ;;  %6387 = vmatmul.mubr.msk.f32.vlgmr.msra.gmra.mxu0 %vm1733_vm9, %v1706_v45  ;;  %v5812_v21 = vld [vmem:[%s7041_s25 + $0x80] ss:$3 sm:$0xff] }
 0x165   : > { %v1366_v1 = vpop.permute.xlu1 %1365  ;;  %6467 = vmatpush3.msk.msra.mxu0 %vm1806_vm0, %v7330_v30  ;;  %v1657_v30 = vsel %vm1654_vm6, %v1632_v39, %v1270_v24  ;;  %v5994_v24 = vld [vmem:[%s7041_s25 + $0x281] ss:$3 sm:$0xff]  ;;  %v1534_v27 = vsel %vm1529_vm1, %v5812_v21, %v7179_v5  ;;  %v6019_v39 = vld [vmem:[%s7041_s25 + $0x2a2] ss:$3 sm:$0xff]  ;;  %vm4846_vm0 = vcmask 916480  }
 0x166   : > { %v1272_v16 = vpop.permute.xlu0 %1271  ;;  %6468 = vmatprep.subr.mxu0 %v7339_v31  ;;  %v1682_v20 = vsel %vm1679_vm7, %v1657_v30, %v1366_v1  ;;  %v1559_v6 = vsel %vm1554_vm2, %v1534_v27, %v7281_v53  ;;  %v6049_v27 = vld [vmem:[%s7041_s25 + $0x3] ss:$3 sm:$0xff] }
 0x167   : > { %1205 = vrot.lane.b32.xlu1 %v5946_v46, %s6924_s17  ;;  %6469 = vmatpush3.msra.mxu0 %v7339_v31  ;;  %v1633_v31 = vsel %vm1629_vm5, %v1608_v48, %v7612_v54  ;;  %v6018_v46 = vld [vmem:[%s7041_s25 + $0x282] ss:$3 sm:$0xff]  ;;  %v5814_v48 = vld [vmem:[%s7041_s25 + $0xc0] ss:$3 sm:$0xff] }
 0x168   : > { %1489 = vrot.lane.b32.xlu0 %v6016_v15, %s6927_s23  ;;  %6470 = vmatprep.subr.mxu0 %v7359_v42  ;;  %v1658_v40 = vsel %vm1654_vm6, %v1633_v31, %v1272_v16  ;;  %v1584_v15 = vsel %vm1579_vm3, %v1559_v6, %v7434_v34 }
 0x169   : > { %v1462_v59 = vpop.permute.xlu1 %1461  ;;  %6471 = vmatpush3.msra.mxu0 %v7359_v42  ;;  %v1609_v5 = vsel %vm1604_vm4, %v1584_v15, %v7530_v29 }
 0x16a   : > { %v1368_v47 = vpop.permute.xlu0 %1367  ;;  %v1707_v44 = vsel %vm1704_vm8, %v1682_v20, %v1462_v59  ;;  %6472 = vmatprep.subr.mxu0 %v7376_v51  ;;  %v1634_v60 = vsel %vm1629_vm5, %v1609_v5, %v7621_v10 }
 0x16b   : > { %1207 = vrot.lane.b32.xlu1 %v5947_v14, %s6924_s17  ;;  %6389 = vmatprep.mubr.msk.f32.mxu0 %vm1733_vm9, %v1707_v44  ;;  %v1683_v42 = vsel %vm1679_vm7, %v1658_v40, %v1368_v47  ;;  %v5996_v44 = vld [vmem:[%s7041_s25 + $0x2c1] ss:$3 sm:$0xff] }
 0x16c   : > { %1491 = vrot.lane.b32.xlu0 %v6017_v2, %s6927_s23  ;;  %6473 = vmatpush3.msra.mxu0 %v7376_v51  ;;  %v5813_v51 = vld [vmem:[%s7041_s25 + $0xa0] ss:$3 sm:$0xff] }
 0x16d   : > { %v1180_v7 = vpop.permute.xlu1 %1179  ;;  %v1535_v16 = vsel %vm1529_vm1, %v5813_v51, %v7177_v4 }
 0x16e   : > { %v1464_v43 = vpop.permute.xlu0 %1463  ;;  %v1560_v53 = vsel %vm1554_vm2, %v1535_v16, %v7279_v52 }
 0x16f   : > { %v1708_v54 = vsel %vm1704_vm8, %v1683_v42, %v1464_v43  ;;  %1303 = vrot.lane.b32.xlu1 %v5971_v18, %s6925_s21  ;;  %v1585_v29 = vsel %vm1579_vm3, %v1560_v53, %v7432_v36  ;;  %v5973_v36 = vld [vmem:[%s7041_s25 + $0x2e0] ss:$3 sm:$0xff]  ;;  %v1536_v18 = vsel %vm1529_vm1, %v5814_v48, %v7187_v9  ;;  %v6020_v43 = vld [vmem:[%s7041_s25 + $0x2c2] ss:$3 sm:$0xff] }
 0x170   : > { %1301 = vrot.lane.b32.xlu0 %v5970_v38, %s6925_s21  ;;  %6390 = vmatmul.mubr.msk.f32.gmra.mxu0 %vm1733_vm9, %v1708_v54  ;;  %v1610_v30 = vsel %vm1604_vm4, %v1585_v29, %v7528_v58  ;;  %v7764_v38 = vld [vmem:[%s7041_s25 + $0x2] ss:$3 sm:$0xff]  ;;  %v5815_v42 = vld [vmem:[%s7041_s25 + $0xe0] ss:$3 sm:$0xff]  ;;  %v5997_v54 = vld [vmem:[%s7041_s25 + $0x2e1] ss:$3 sm:$0xff] }
 0x171   : > { %v1276_v33 = vpop.permute.xlu1 %1275  ;;  %v1635_v52 = vsel %vm1629_vm5, %v1610_v30, %v1180_v7  ;;  %v1561_v7 = vsel %vm1554_vm2, %v1536_v18, %v7289_v57  ;;  %v5816_v53 = vld [vmem:[%s7041_s25 + $0x100] ss:$3 sm:$0xff] }
 0x172   : > { %v1274_v45 = vpop.permute.xlu0 %1273  ;;  %v1660_v2 = vsel %vm1654_vm6, %v1635_v52, %v1276_v33  ;;  %v1586_v21 = vsel %vm1579_vm3, %v1561_v7, %v7442_v55  ;;  %v1537_v33 = vsel %vm1529_vm1, %v5815_v42, %v7185_v8  ;;  %v1538_v29 = vsel %vm1529_vm1, %v5816_v53, %v7195_v13 }
 0x173   : > { %1399 = vrot.lane.b32.xlu1 %v5995_v50, %s6926_s22  ;;  %v1659_v34 = vsel %vm1654_vm6, %v1634_v60, %v1274_v45  ;;  %v1611_v9 = vsel %vm1604_vm4, %v1586_v21, %v7538_v26  ;;  %v1562_v57 = vsel %vm1554_vm2, %v1537_v33, %v7287_v56  ;;  %v7796_v56 = vld [vmem:[%s7041_s25 + $0x22] ss:$3 sm:$0xff] }
 0x174   : > { %1397 = vrot.lane.b32.xlu0 %v5994_v24, %s6926_s22  ;;  %v1587_v26 = vsel %vm1579_vm3, %v1562_v57, %v7440_v37  ;;  %v10601_v57 = vld [vmem:[#allocation52_spill] sm:$0xff] }
 0x175   : > { %v1372_v35 = vpop.permute.xlu1 %1371 }
 0x176   : > { %v1370_v1 = vpop.permute.xlu0 %1369  ;;  %v1685_v20 = vsel %vm1679_vm7, %v1660_v2, %v1372_v35  ;;  %v6021_v35 = vld [vmem:[%s7041_s25 + $0x2e2] ss:$3 sm:$0xff] }
 0x177   : > { %1209 = vrot.lane.b32.xlu1 %v5948_v61, %s6924_s17  ;;  %v1684_v4 = vsel %vm1679_vm7, %v1659_v34, %v1370_v1  ;;  %v1612_v61 = vsel %vm1604_vm4, %v1587_v26, %v7536_v25  ;;  %v5950_v25 = vld [vmem:[%s7041_s25 + $0x2e2] ss:$3 sm:$0xff]  ;;  %v6050_v34 = vld [vmem:[%s7041_s25 + $0x23] ss:$3 sm:$0xff] }
 0x178   : > { %1493 = vrot.lane.b32.xlu0 %v6018_v46, %s6927_s23 }
 0x179   : > { %v1182_v11 = vpop.permute.xlu1 %1181 }
 0x17a   : > { %v1466_v10 = vpop.permute.xlu0 %1465  ;;  %v1636_v45 = vsel %vm1629_vm5, %v1611_v9, %v1182_v11  ;;  %v1563_v11 = vsel %vm1554_vm2, %v1538_v29, %v7297_v63 }
 0x17b   : > { %v1709_v14 = vsel %vm1704_vm8, %v1684_v4, %v1466_v10  ;;  %1211 = vrot.lane.b32.xlu1 %v5949_v49, %s6924_s17  ;;  %v5817_v4 = vld [vmem:[%s7041_s25 + $0x120] ss:$3 sm:$0xff]  ;;  %v5951_v10 = vld [vmem:[%s7041_s25 + $0x302] ss:$3 sm:$0xff]  ;;  %v1588_v30 = vsel %vm1579_vm3, %v1563_v11, %v7450_v41 }
 0x17c   : > { %1495 = vrot.lane.b32.xlu0 %v6019_v39, %s6927_s23  ;;  %6392 = vmatprep.mubr.msk.f32.mxu0 %vm1733_vm9, %v1709_v14  ;;  %v1613_v2 = vsel %vm1604_vm4, %v1588_v30, %v7546_v3  ;;  %v1539_v13 = vsel %vm1529_vm1, %v5817_v4, %v7193_v12  ;;  %v5974_v41 = vld [vmem:[%s7041_s25 + $0x300] ss:$3 sm:$0xff] }
 0x17d   : > { %v1184_v58 = vpop.permute.xlu1 %1183  ;;  %v1564_v63 = vsel %vm1554_vm2, %v1539_v13, %v7295_v62  ;;  %v5820_v30 = vld [vmem:[%s7041_s25 + $0x180] ss:$3 sm:$0xff] }
 0x17e   : > { %v1468_v59 = vpop.permute.xlu0 %1467  ;;  %v1637_v15 = vsel %vm1629_vm5, %v1612_v61, %v1184_v58 }
 0x17f   : > { %v1710_v47 = vsel %vm1704_vm8, %v1685_v20, %v1468_v59  ;;  %1307 = vrot.lane.b32.xlu1 %v5973_v36, %s6925_s21 }
 0x180   : > { %1305 = vrot.lane.b32.xlu0 %v5972_v0, %s6925_s21  ;;  %6393 = vmatmul.mubr.msk.f32.gmra.mxu0 %vm1733_vm9, %v1710_v47  ;;  %v1589_v0 = vsel %vm1579_vm3, %v1564_v63, %v7448_v32 }
 0x181   : > { %v1280_v31 = vpop.permute.xlu1 %1279  ;;  %v1614_v58 = vsel %vm1604_vm4, %v1589_v0, %v7544_v28  ;;  %v6051_v0 = vld [vmem:[%s7041_s25 + $0x43] ss:$3 sm:$0xff] }
 0x182   : > { %v1278_v40 = vpop.permute.xlu0 %1277  ;;  %v1662_v37 = vsel %vm1654_vm6, %v1637_v15, %v1280_v31  ;;  %v5975_v31 = vld [vmem:[%s7041_s25 + $0x320] ss:$3 sm:$0xff] }
 0x183   : > { %2139 = vrot.lane.b32.xlu1 %v7764_v38, %s6920_s26  ;;  %v1661_v55 = vsel %vm1654_vm6, %v1636_v45, %v1278_v40  ;;  %v6146_v40 = vld [vmem:[%s7041_s25 + $0x4] ss:$3 sm:$0xff]  ;;  %v10604_v15 = vld [vmem:[#allocation37_spill] sm:$0xff] }
 0x184   : > { %1401 = vrot.lane.b32.xlu0 %v5996_v44, %s6926_s22 }
 0x185   : > { %v1376_v50 = vpop.permute.xlu1 %1375 }
 0x186   : > { %v1374_v24 = vpop.permute.xlu0 %1373  ;;  %v1687_v1 = vsel %vm1679_vm7, %v1662_v37, %v1376_v50  ;;  %v5998_v50 = vld [vmem:[%s7041_s25 + $0x301] ss:$3 sm:$0xff] }
 0x187   : > { %1497 = vrot.lane.b32.xlu1 %v6020_v43, %s6927_s23  ;;  %v1686_v51 = vsel %vm1679_vm7, %v1661_v55, %v1374_v24  ;;  %v5819_v43 = vld [vmem:[%s7041_s25 + $0x160] ss:$3 sm:$0xff] }
 0x188   : > { %1403 = vrot.lane.b32.xlu0 %v5997_v54, %s6926_s22  ;;  %v10599_v54 = vld [vmem:[#allocation20_spill] sm:$0xff]  ;;  %v10600_v24 = vld [vmem:[#allocation38_spill] sm:$0xff] }
 0x189   : > { %v1186_v8 = vpop.permute.xlu1 %1185 }
 0x18a   : > { %v1470_v6 = vpop.permute.xlu0 %1469 }
 0x18b   : > { %v1711_v46 = vsel %vm1704_vm8, %v1686_v51, %v1470_v6  ;;  %2235 = vrot.lane.b32.xlu1 %v6049_v27, %s6921_s27  ;;  %v7870_v51 = vld [vmem:[%s7041_s25 + $0x42] ss:$3 sm:$0xff] }
 0x18c   : > { %2141 = vrot.lane.b32.xlu0 %v7796_v56, %s6920_s26  ;;  %6395 = vmatprep.mubr.msk.f32.mxu0 %vm1733_vm9, %v1711_v46  ;;  %v6073_v46 = vld [vmem:[%s7041_s25 + $0x23] ss:$3 sm:$0xff] }
 0x18d   : > { %v1188_v5 = vpop.permute.xlu1 %1187 }
 0x18e   : > { %v1472_v16 = vpop.permute.xlu0 %1471  ;;  %v1639_v62 = vsel %vm1629_vm5, %v1614_v58, %v1188_v5  ;;  %v10605_v5 = vld [vmem:[#allocation51_spill] sm:$0xff] }
 0x18f   : > { %v1712_v60 = vsel %vm1704_vm8, %v1687_v1, %v1472_v16  ;;  %1499 = vrot.lane.b32.xlu1 %v6021_v35, %s6927_s23 }
 0x190   : > { %1213 = vrot.lane.b32.xlu0 %v5950_v25, %s6924_s17  ;;  %6396 = vmatmul.mubr.msk.f32.gmra.mxu0 %vm1733_vm9, %v1712_v60 }
 0x191   : > { %v1284_v49 = vpop.permute.xlu1 %1283 }
 0x192   : > { %v1282_v39 = vpop.permute.xlu0 %1281  ;;  %v1664_v32 = vsel %vm1654_vm6, %v1639_v62, %v1284_v49 }
 0x193   : > { %2307 = vrot.lane.b32.xlu1 %v7219_v23, %s6922_s28  ;;  %v1638_v23 = vsel %vm1629_vm5, %v1613_v2, %v1186_v8  ;;  %v10603_v8 = vld [vmem:[#allocation19_spill] sm:$0xff] }
 0x194   : > { %2237 = vrot.lane.b32.xlu0 %v6050_v34, %s6921_s27  ;;  %v1663_v36 = vsel %vm1654_vm6, %v1638_v23, %v1282_v39  ;;  %v6147_v39 = vld [vmem:[%s7041_s25 + $0x24] ss:$3 sm:$0xff] }
 0x195   : > { %v1380_v14 = vpop.permute.xlu1 %1379  ;;  %v10607_v23 = vld [vmem:[#allocation8_spill] sm:$0xff] }
 0x196   : > { %v1378_v52 = vpop.permute.xlu0 %1377  ;;  %v1689_v47 = vsel %vm1679_vm7, %v1664_v32, %v1380_v14  ;;  %v6022_v14 = vld [vmem:[%s7041_s25 + $0x302] ss:$3 sm:$0xff]  ;;  %v1542_v63 = vsel %vm1529_vm1, %v5820_v30, %v10607_v23  ;;  %v6713_v30 = vld [vmem:[%s7041_s25 + $0x61] ss:$3 sm:$0xff] }
 0x197   : > { %1215 = vrot.lane.b32.xlu1 %v5951_v10, %s6924_s17  ;;  %v1688_v3 = vsel %vm1679_vm7, %v1663_v36, %v1378_v52  ;;  %v5999_v52 = vld [vmem:[%s7041_s25 + $0x321] ss:$3 sm:$0xff]  ;;  %v5821_v36 = vld [vmem:[%s7041_s25 + $0x1a0] ss:$3 sm:$0xff] }
 0x198   : > { %3404 = vrot.lane.b32.xlu0 %v6049_v27, %s6920_s26  ;;  %v10602_v27 = vld [vmem:[#allocation6_spill] sm:$0xff]  ;;  %v10611_v32 = vld [vmem:[#allocation7_spill] sm:$0xff] }
 0x199   : > { %v1190_v20 = vpop.permute.xlu1 %1189 }
 0x19a   : > { %v1474_v12 = vpop.permute.xlu0 %1473 }
 0x19b   : > { %v1713_v59 = vsel %vm1704_vm8, %v1688_v3, %v1474_v12  ;;  %2309 = vrot.lane.b32.xlu1 %v7216_v22, %s6922_s28  ;;  %v5818_v22 = vld [vmem:[%s7041_s25 + $0x140] ss:$3 sm:$0xff] }
 0x19c   : > { %1309 = vrot.lane.b32.xlu0 %v5974_v41, %s6925_s21  ;;  %6398 = vmatprep.mubr.msk.f32.mxu0 %vm1733_vm9, %v1713_v59  ;;  %v1540_v7 = vsel %vm1529_vm1, %v5818_v22, %v7203_v17  ;;  %v1541_v17 = vsel %vm1529_vm1, %v5819_v43, %v10602_v27  ;;  %v10609_v3 = vld [vmem:[#allocation40_spill] sm:$0xff]  ;;  %v10610_v59 = vld [vmem:[#allocation54_spill] sm:$0xff] }
 0x19d   : > { %v1192_v48 = vpop.permute.xlu1 %1191  ;;  %v1565_v21 = vsel %vm1554_vm2, %v1540_v7, %v10599_v54  ;;  %v1566_v6 = vsel %vm1554_vm2, %v1541_v17, %v10603_v8  ;;  %v5822_v8 = vld [vmem:[%s7041_s25 + $0x1c0] ss:$3 sm:$0xff] }
 0x19e   : > { %v1476_v28 = vpop.permute.xlu0 %1475  ;;  %v1590_v9 = vsel %vm1579_vm3, %v1565_v21, %v10600_v24  ;;  %v1591_v37 = vsel %vm1579_vm3, %v1566_v6, %v10604_v15  ;;  %v10614_v21 = vld [vmem:[#allocation53_spill] sm:$0xff]  ;;  %v7946_v6 = vld [vmem:[%s7041_s25 + $0x63] ss:$3 sm:$0xff] }
 0x19f   : > { %v1714_v44 = vsel %vm1704_vm8, %v1689_v47, %v1476_v28  ;;  %3406 = vrot.lane.b32.xlu1 %v6050_v34, %s6920_s26  ;;  %v1615_v55 = vsel %vm1604_vm4, %v1590_v9, %v10601_v57  ;;  %v1616_v16 = vsel %vm1604_vm4, %v1591_v37, %v10605_v5  ;;  %v10606_v34 = vld [vmem:[#allocation23_spill] sm:$0xff]  ;;  %v1543_v47 = vsel %vm1529_vm1, %v5821_v36, %v10611_v32 }
 0x1a0   : > { %2379 = vrot.lane.b32.xlu0 %v7321_v19, %s6923_s29  ;;  %6399 = vmatmul.mubr.msk.f32.gmra.mxu0 %vm1733_vm9, %v1714_v44  ;;  %v1640_v26 = vsel %vm1629_vm5, %v1615_v55, %v1190_v20  ;;  %v1641_v53 = vsel %vm1629_vm5, %v1616_v16, %v1192_v48  ;;  %v7918_v28 = vld [vmem:[%s7041_s25 + $0x62] ss:$3 sm:$0xff]  ;;  %v10612_v44 = vld [vmem:[#allocation21_spill] sm:$0xff] }
 0x1a1   : > { %v1288_v18 = vpop.permute.xlu1 %1287  ;;  %v1568_v22 = vsel %vm1554_vm2, %v1543_v47, %v10612_v44  ;;  %v10618_v16 = vld [vmem:[#allocation42_spill] sm:$0xff] }
 0x1a2   : > { %v1286_v42 = vpop.permute.xlu0 %1285  ;;  %v1666_v49 = vsel %vm1654_vm6, %v1641_v53, %v1288_v18  ;;  %v10613_v18 = vld [vmem:[#allocation39_spill] sm:$0xff] }
 0x1a3   : > { %1311 = vrot.lane.b32.xlu1 %v5975_v31, %s6925_s21  ;;  %v1665_v61 = vsel %vm1654_vm6, %v1640_v26, %v1286_v42  ;;  %v1593_v42 = vsel %vm1579_vm3, %v1568_v22, %v10613_v18  ;;  %v6712_v26 = vld [vmem:[%s7041_s25 + $0x42] ss:$3 sm:$0xff] }
 0x1a4   : > { %3500 = vrot.lane.b32.xlu0 %v6146_v40, %s6921_s27  ;;  %v6074_v40 = vld [vmem:[%s7041_s25 + $0x43] ss:$3 sm:$0xff] }
 0x1a5   : > { %v1384_v33 = vpop.permute.xlu1 %1383  ;;  %v10626_v18 = vld [vmem:[#allocation12_spill] sm:$0xff] }
 0x1a6   : > { %v1382_v45 = vpop.permute.xlu0 %1381  ;;  %v1691_v29 = vsel %vm1679_vm7, %v1666_v49, %v1384_v33  ;;  %v10615_v33 = vld [vmem:[#allocation30_spill] sm:$0xff]  ;;  %v10619_v49 = vld [vmem:[#allocation56_spill] sm:$0xff] }
 0x1a7   : > { %2143 = vrot.lane.b32.xlu1 %v7870_v51, %s6920_s26  ;;  %v1690_v35 = vsel %vm1679_vm7, %v1665_v61, %v1382_v45  ;;  %v6023_v61 = vld [vmem:[%s7041_s25 + $0x322] ss:$3 sm:$0xff] }
 0x1a8   : > { %1405 = vrot.lane.b32.xlu0 %v5998_v50, %s6926_s22  ;;  %v1618_v50 = vsel %vm1604_vm4, %v1593_v42, %v10614_v21 }
 0x1a9   : > { %v1194_v25 = vpop.permute.xlu1 %1193 }
 0x1aa   : > { %v1478_v1 = vpop.permute.xlu0 %1477 }
 0x1ab   : > { %v1715_v60 = vsel %vm1704_vm8, %v1690_v35, %v1478_v1  ;;  %2475 = vrot.lane.b32.xlu1 %v6073_v46, %s6924_s17  ;;  %v10616_v35 = vld [vmem:[#allocation10_spill] sm:$0xff]  ;;  %v10617_v1 = vld [vmem:[#allocation25_spill] sm:$0xff] }
 0x1ac   : > { %2381 = vrot.lane.b32.xlu0 %v10606_v34, %s6923_s29  ;;  %6401 = vmatprep.mubr.msk.f32.mxu0 %vm1733_vm9, %v1715_v60 }
 0x1ad   : > { %v1196_v4 = vpop.permute.xlu1 %1195 }
 0x1ae   : > { %v1480_v11 = vpop.permute.xlu0 %1479  ;;  %v1643_v9 = vsel %vm1629_vm5, %v1618_v50, %v1196_v4  ;;  %v8003_v50 = vld [vmem:[%s7041_s25 + $0x43] ss:$3 sm:$0xff] }
 0x1af   : > { %v1716_v10 = vsel %vm1704_vm8, %v1691_v29, %v1480_v11  ;;  %3572 = vrot.lane.b32.xlu1 %v7321_v19, %s6922_s28  ;;  %v10608_v19 = vld [vmem:[#allocation22_spill] sm:$0xff]  ;;  %v10620_v29 = vld [vmem:[#allocation9_spill] sm:$0xff] }
 0x1b0   : > { %3502 = vrot.lane.b32.xlu0 %v6147_v39, %s6921_s27  ;;  %6402 = vmatmul.mubr.msk.f32.gmra.mxu0 %vm1733_vm9, %v1716_v10  ;;  %v1567_v41 = vsel %vm1554_vm2, %v1542_v63, %v10608_v19  ;;  %v10621_v10 = vld [vmem:[#allocation34_spill] sm:$0xff] }
 0x1b1   : > { %v1292_v2 = vpop.permute.xlu1 %1291  ;;  %v1592_v20 = vsel %vm1579_vm3, %v1567_v41, %v10609_v3  ;;  %v10624_v41 = vld [vmem:[#allocation55_spill] sm:$0xff] }
 0x1b2   : > { %v1290_v13 = vpop.permute.xlu0 %1289  ;;  %v1617_v62 = vsel %vm1604_vm4, %v1592_v20, %v10610_v59  ;;  %v1668_v45 = vsel %vm1654_vm6, %v1643_v9, %v1292_v2 }
 0x1b3   : > { %1501 = vrot.lane.b32.xlu1 %v6022_v14, %s6927_s23  ;;  %v1642_v48 = vsel %vm1629_vm5, %v1617_v62, %v1194_v25  ;;  %v1544_v25 = vsel %vm1529_vm1, %v5822_v8, %v10616_v35  ;;  %v10622_v14 = vld [vmem:[#allocation24_spill] sm:$0xff] }
 0x1b4   : > { %1407 = vrot.lane.b32.xlu0 %v5999_v52, %s6926_s22  ;;  %v1667_v31 = vsel %vm1654_vm6, %v1642_v48, %v1290_v13  ;;  %v1569_v5 = vsel %vm1554_vm2, %v1544_v25, %v10617_v1  ;;  %v10623_v13 = vld [vmem:[#allocation41_spill] sm:$0xff]  ;;  %v6170_v62 = vld [vmem:[%s7041_s25 + $0x24] ss:$3 sm:$0xff]  ;;  %v8015_v8 = vld [vmem:[%s7041_s25 + $0x62] ss:$3 sm:$0xff] }
 0x1b5   : > { %v1388_v12 = vpop.permute.xlu1 %1387  ;;  %v1594_v60 = vsel %vm1579_vm3, %v1569_v5, %v10618_v16  ;;  %v6148_v35 = vld [vmem:[%s7041_s25 + $0x44] ss:$3 sm:$0xff] }
 0x1b6   : > { %v1386_v58 = vpop.permute.xlu0 %1385  ;;  %v1693_v57 = vsel %vm1679_vm7, %v1668_v45, %v1388_v12  ;;  %v1619_v39 = vsel %vm1604_vm4, %v1594_v60, %v10619_v49  ;;  %v10632_v25 = vld [vmem:[#allocation43_spill] sm:$0xff]  ;;  %v10633_v60 = vld [vmem:[#allocation57_spill] sm:$0xff] }
 0x1b7   : > { %2239 = vrot.lane.b32.xlu1 %v6051_v0, %s6921_s27  ;;  %v1692_v7 = vsel %vm1679_vm7, %v1667_v31, %v1386_v58  ;;  %v10625_v58 = vld [vmem:[#allocation33_spill] sm:$0xff] }
 0x1b8   : > { %2145 = vrot.lane.b32.xlu0 %v7918_v28, %s6920_s26 }
 0x1b9   : > { %v1198_v43 = vpop.permute.xlu1 %1197 }
 0x1ba   : > { %v1482_v54 = vpop.permute.xlu0 %1481  ;;  %v1644_v11 = vsel %vm1629_vm5, %v1619_v39, %v1198_v43  ;;  %v6715_v43 = vld [vmem:[%s7041_s25 + $0x81] ss:$3 sm:$0xff] }
 0x1bb   : > { %v1717_v24 = vsel %vm1704_vm8, %v1692_v7, %v1482_v54  ;;  %2547 = vrot.lane.b32.xlu1 %v10615_v33, %s6925_s21  ;;  %v7993_v7 = vld [vmem:[%s7041_s25 + $0x62] ss:$3 sm:$0xff]  ;;  %v5825_v54 = vld [vmem:[%s7041_s25 + $0x220] ss:$3 sm:$0xff] }
 0x1bc   : > { %2477 = vrot.lane.b32.xlu0 %v6074_v40, %s6924_s17  ;;  %6404 = vmatprep.mubr.msk.f32.mxu0 %vm1733_vm9, %v1717_v24  ;;  %v10628_v24 = vld [vmem:[#allocation44_spill] sm:$0xff] }
 0x1bd   : > { %v1200_v55 = vpop.permute.xlu1 %1199 }
 0x1be   : > { %v1484_v27 = vpop.permute.xlu0 %1483 }
 0x1bf   : > { %v1718_v17 = vsel %vm1704_vm8, %v1693_v57, %v1484_v27  ;;  %3644 = vrot.lane.b32.xlu1 %v6073_v46, %s6923_s29  ;;  %v5823_v46 = vld [vmem:[%s7041_s25 + $0x1e0] ss:$3 sm:$0xff] }
 0x1c0   : > { %3574 = vrot.lane.b32.xlu0 %v6712_v26, %s6922_s28  ;;  %6405 = vmatmul.mubr.msk.f32.gmra.mxu0 %vm1733_vm9, %v1718_v17  ;;  %v1545_v4 = vsel %vm1529_vm1, %v5823_v46, %v10620_v29  ;;  %v10629_v57 = vld [vmem:[#allocation58_spill] sm:$0xff]  ;;  %v10630_v27 = vld [vmem:[#allocation11_spill] sm:$0xff] }
 0x1c1   : > { %v1296_v15 = vpop.permute.xlu1 %1295  ;;  %v1570_v52 = vsel %vm1554_vm2, %v1545_v4, %v10622_v14  ;;  %v1547_v17 = vsel %vm1529_vm1, %v5825_v54, %v10630_v27  ;;  %v6171_v29 = vld [vmem:[%s7041_s25 + $0x44] ss:$3 sm:$0xff]  ;;  %v6717_v14 = vld [vmem:[%s7041_s25 + $0x42] ss:$3 sm:$0xff]  ;;  %v10640_v54 = vld [vmem:[#allocation45_spill] sm:$0xff] }
 0x1c2   : > { %v1294_v37 = vpop.permute.xlu0 %1293  ;;  %v1595_v23 = vsel %vm1579_vm3, %v1570_v52, %v10623_v13  ;;  %v10634_v13 = vld [vmem:[#allocation14_spill] sm:$0xff] }
 0x1c3   : > { %2241 = vrot.lane.b32.xlu1 %v7946_v6, %s6921_s27  ;;  %v1669_v2 = vsel %vm1654_vm6, %v1644_v11, %v1294_v37  ;;  %v1620_v3 = vsel %vm1604_vm4, %v1595_v23, %v10624_v41  ;;  %v10635_v41 = vld [vmem:[#allocation29_spill] sm:$0xff] }
 0x1c4   : > { %1503 = vrot.lane.b32.xlu0 %v6023_v61, %s6927_s23  ;;  %v1645_v12 = vsel %vm1629_vm5, %v1620_v3, %v1200_v55  ;;  %v10631_v61 = vld [vmem:[#allocation26_spill] sm:$0xff] }
 0x1c5   : > { %v1392_v53 = vpop.permute.xlu1 %1391  ;;  %v1670_v59 = vsel %vm1654_vm6, %v1645_v12, %v1296_v15  ;;  %v1572_v15 = vsel %vm1554_vm2, %v1547_v17, %v10631_v61  ;;  %v6075_v12 = vld [vmem:[%s7041_s25 + $0x63] ss:$3 sm:$0xff] }
 0x1c6   : > { %v1390_v34 = vpop.permute.xlu0 %1389  ;;  %v1695_v32 = vsel %vm1679_vm7, %v1670_v59, %v1392_v53  ;;  %v1597_v46 = vsel %vm1579_vm3, %v1572_v15, %v10632_v25 }
 0x1c7   : > { %2549 = vrot.lane.b32.xlu1 %v10621_v10, %s6925_s21  ;;  %v1694_v63 = vsel %vm1679_vm7, %v1669_v2, %v1390_v34  ;;  %v1622_v53 = vsel %vm1604_vm4, %v1597_v46, %v10633_v60  ;;  %v10642_v46 = vld [vmem:[#allocation16_spill] sm:$0xff] }
 0x1c8   : > { %2311 = vrot.lane.b32.xlu0 %v6713_v30, %s6922_s28  ;;  %v10644_v60 = vld [vmem:[#allocation48_spill] sm:$0xff] }
 0x1c9   : > { %v1202_v36 = vpop.permute.xlu1 %1201 }
 0x1ca   : > { %v1486_v19 = vpop.permute.xlu0 %1485 }
 0x1cb   : > { %v1719_v20 = vsel %vm1704_vm8, %v1694_v63, %v1486_v19  ;;  %3408 = vrot.lane.b32.xlu1 %v6051_v0, %s6920_s26  ;;  %v5824_v0 = vld [vmem:[%s7041_s25 + $0x200] ss:$3 sm:$0xff]  ;;  %v8046_v63 = vld [vmem:[%s7041_s25 + $0x82] ss:$3 sm:$0xff] }
 0x1cc   : > { %2619 = vrot.lane.b32.xlu0 %v10625_v58, %s6926_s22  ;;  %6407 = vmatprep.mubr.msk.f32.mxu0 %vm1733_vm9, %v1719_v20  ;;  %v1546_v42 = vsel %vm1529_vm1, %v5824_v0, %v10626_v18  ;;  %v5827_v19 = vld [vmem:[%s7041_s25 + $0x260] ss:$3 sm:$0xff] }
 0x1cd   : > { %v1204_v47 = vpop.permute.xlu1 %1203  ;;  %v8059_v20 = vld [vmem:[%s7041_s25 + $0x63] ss:$3 sm:$0xff] }
 0x1ce   : > { %v1488_v48 = vpop.permute.xlu0 %1487  ;;  %v1647_v49 = vsel %vm1629_vm5, %v1622_v53, %v1204_v47  ;;  %v10636_v58 = vld [vmem:[#allocation46_spill] sm:$0xff]  ;;  %v10637_v47 = vld [vmem:[#allocation60_spill] sm:$0xff] }
 0x1cf   : > { %v1720_v44 = vsel %vm1704_vm8, %v1695_v32, %v1488_v48  ;;  %3740 = vrot.lane.b32.xlu1 %v6170_v62, %s6924_s17 }
 0x1d0   : > { %3646 = vrot.lane.b32.xlu0 %v6074_v40, %s6923_s29  ;;  %6408 = vmatmul.mubr.msk.f32.gmra.mxu0 %vm1733_vm9, %v1720_v44  ;;  %v10627_v40 = vld [vmem:[#allocation27_spill] sm:$0xff]  ;;  %v10638_v44 = vld [vmem:[#allocation13_spill] sm:$0xff] }
 0x1d1   : > { %v1300_v22 = vpop.permute.xlu1 %1299  ;;  %v1571_v21 = vsel %vm1554_vm2, %v1546_v42, %v10627_v40  ;;  %v1549_v0 = vsel %vm1529_vm1, %v5827_v19, %v10638_v44  ;;  %v10647_v19 = vld [vmem:[#allocation31_spill] sm:$0xff] }
 0x1d2   : > { %v1298_v31 = vpop.permute.xlu0 %1297  ;;  %v1596_v9 = vsel %vm1579_vm3, %v1571_v21, %v10628_v24  ;;  %v1672_v39 = vsel %vm1654_vm6, %v1647_v49, %v1300_v22  ;;  %v6054_v44 = vld [vmem:[%s7041_s25 + $0xa3] ss:$3 sm:$0xff] }
 0x1d3   : > { %2383 = vrot.lane.b32.xlu1 %v7993_v7, %s6923_s29  ;;  %v1621_v55 = vsel %vm1604_vm4, %v1596_v9, %v10629_v57 }
 0x1d4   : > { %2313 = vrot.lane.b32.xlu0 %v6715_v43, %s6922_s28  ;;  %v1646_v26 = vsel %vm1629_vm5, %v1621_v55, %v1202_v36  ;;  %v8051_v36 = vld [vmem:[%s7041_s25 + $0x82] ss:$3 sm:$0xff]  ;;  %v6149_v43 = vld [vmem:[%s7041_s25 + $0x64] ss:$3 sm:$0xff] }
 0x1d5   : > { %v1396_v33 = vpop.permute.xlu1 %1395  ;;  %v1671_v37 = vsel %vm1654_vm6, %v1646_v26, %v1298_v31  ;;  %v10639_v31 = vld [vmem:[#allocation28_spill] sm:$0xff] }
 0x1d6   : > { %v1394_v45 = vpop.permute.xlu0 %1393  ;;  %v1697_v4 = vsel %vm1679_vm7, %v1672_v39, %v1396_v33  ;;  %v1574_v18 = vsel %vm1554_vm2, %v1549_v0, %v10639_v31  ;;  %v10641_v33 = vld [vmem:[#allocation59_spill] sm:$0xff]  ;;  %v10645_v39 = vld [vmem:[#allocation62_spill] sm:$0xff] }
 0x1d7   : > { %2715 = vrot.lane.b32.xlu1 %v8003_v50, %s6927_s23  ;;  %v1696_v1 = vsel %vm1679_vm7, %v1671_v37, %v1394_v45  ;;  %v1599_v40 = vsel %vm1579_vm3, %v1574_v18, %v10640_v54  ;;  %v6053_v37 = vld [vmem:[%s7041_s25 + $0x83] ss:$3 sm:$0xff]  ;;  %v6723_v54 = vld [vmem:[%s7041_s25 + $0x82] ss:$3 sm:$0xff] }
 0x1d8   : > { %2621 = vrot.lane.b32.xlu0 %v8015_v8, %s6926_s22  ;;  %v1624_v45 = vsel %vm1604_vm4, %v1599_v40, %v10641_v33  ;;  %v6724_v40 = vld [vmem:[%s7041_s25 + $0xa1] ss:$3 sm:$0xff] }
 0x1d9   : > { %v1206_v5 = vpop.permute.xlu1 %1205  ;;  %v6172_v33 = vld [vmem:[%s7041_s25 + $0x64] ss:$3 sm:$0xff] }
 0x1da   : > { %v1490_v16 = vpop.permute.xlu0 %1489 }
 0x1db   : > { %v1721_v34 = vsel %vm1704_vm8, %v1696_v1, %v1490_v16  ;;  %3504 = vrot.lane.b32.xlu1 %v6148_v35, %s6921_s27  ;;  %v6076_v16 = vld [vmem:[%s7041_s25 + $0x83] ss:$3 sm:$0xff] }
 0x1dc   : > { %3410 = vrot.lane.b32.xlu0 %v7946_v6, %s6920_s26  ;;  %6410 = vmatprep.mubr.msk.f32.mxu0 %vm1733_vm9, %v1721_v34  ;;  %v5826_v6 = vld [vmem:[%s7041_s25 + $0x240] ss:$3 sm:$0xff] }
 0x1dd   : > { %v1208_v11 = vpop.permute.xlu1 %1207  ;;  %v1548_v23 = vsel %vm1529_vm1, %v5826_v6, %v10634_v13  ;;  %v10646_v13 = vld [vmem:[#allocation15_spill] sm:$0xff] }
 0x1de   : > { %v1492_v10 = vpop.permute.xlu0 %1491  ;;  %v1573_v3 = vsel %vm1554_vm2, %v1548_v23, %v10635_v41  ;;  %v1649_v55 = vsel %vm1629_vm5, %v1624_v45, %v1208_v11  ;;  %v6721_v11 = vld [vmem:[%s7041_s25 + $0x81] ss:$3 sm:$0xff] }
 0x1df   : > { %v1722_v30 = vsel %vm1704_vm8, %v1697_v4, %v1492_v10  ;;  %3812 = vrot.lane.b32.xlu1 %v6717_v14, %s6925_s21  ;;  %v1598_v59 = vsel %vm1579_vm3, %v1573_v3, %v10636_v58  ;;  %v5829_v10 = vld [vmem:[%s7041_s25 + $0x2a0] ss:$3 sm:$0xff]  ;;  %v6194_v3 = vld [vmem:[%s7041_s25 + $0x44] ss:$3 sm:$0xff] }
 0x1e0   : > { %3742 = vrot.lane.b32.xlu0 %v6171_v29, %s6924_s17  ;;  %6411 = vmatmul.mubr.msk.f32.gmra.mxu0 %vm1733_vm9, %v1722_v30  ;;  %v1623_v48 = vsel %vm1604_vm4, %v1598_v59, %v10637_v47  ;;  %v1551_v23 = vsel %vm1529_vm1, %v5829_v10, %v10646_v13  ;;  %v10648_v58 = vld [vmem:[#allocation47_spill] sm:$0xff]  ;;  %v10649_v47 = vld [vmem:[#allocation61_spill] sm:$0xff] }
 0x1e1   : > { %v1304_v52 = vpop.permute.xlu1 %1303  ;;  %v1648_v22 = vsel %vm1629_vm5, %v1623_v48, %v1206_v5  ;;  %v8101_v5 = vld [vmem:[%s7041_s25 + $0xa2] ss:$3 sm:$0xff]  ;;  %v1576_v41 = vsel %vm1554_vm2, %v1551_v23, %v10647_v19  ;;  %v6100_v23 = vld [vmem:[%s7041_s25 + $0xa3] ss:$3 sm:$0xff] }
 0x1e2   : > { %v1302_v2 = vpop.permute.xlu0 %1301  ;;  %v1674_v27 = vsel %vm1654_vm6, %v1649_v55, %v1304_v52  ;;  %v1601_v59 = vsel %vm1579_vm3, %v1576_v41, %v10648_v58  ;;  %v6077_v19 = vld [vmem:[%s7041_s25 + $0xa3] ss:$3 sm:$0xff] }
 0x1e3   : > { %2385 = vrot.lane.b32.xlu1 %v8046_v63, %s6923_s29  ;;  %v1673_v42 = vsel %vm1654_vm6, %v1648_v22, %v1302_v2 }
 0x1e4   : > { %2147 = vrot.lane.b32.xlu0 %v8051_v36, %s6920_s26 }
 0x1e5   : > { %v1400_v62 = vpop.permute.xlu1 %1399 }
 0x1e6   : > { %v1398_v32 = vpop.permute.xlu0 %1397  ;;  %v1699_v17 = vsel %vm1679_vm7, %v1674_v27, %v1400_v62 }
 0x1e7   : > { %2717 = vrot.lane.b32.xlu1 %v8059_v20, %s6927_s23  ;;  %v1698_v21 = vsel %vm1679_vm7, %v1673_v42, %v1398_v32  ;;  %v6722_v42 = vld [vmem:[%s7041_s25 + $0xa1] ss:$3 sm:$0xff] }
 0x1e8   : > { %2479 = vrot.lane.b32.xlu0 %v6075_v12, %s6924_s17 }
 0x1e9   : > { %v1210_v24 = vpop.permute.xlu1 %1209 }
 0x1ea   : > { %v1494_v9 = vpop.permute.xlu0 %1493 }
 0x1eb   : > { %v1723_v57 = vsel %vm1704_vm8, %v1698_v21, %v1494_v9  ;;  %3576 = vrot.lane.b32.xlu1 %v7993_v7, %s6922_s28  ;;  %v5828_v7 = vld [vmem:[%s7041_s25 + $0x280] ss:$3 sm:$0xff]  ;;  %v6195_v9 = vld [vmem:[%s7041_s25 + $0x64] ss:$3 sm:$0xff] }
 0x1ec   : > { %3506 = vrot.lane.b32.xlu0 %v6149_v43, %s6921_s27  ;;  %6413 = vmatprep.mubr.msk.f32.mxu0 %vm1733_vm9, %v1723_v57  ;;  %v1550_v1 = vsel %vm1529_vm1, %v5828_v7, %v10642_v46 }
 0x1ed   : > { %v1212_v26 = vpop.permute.xlu1 %1211 }
 0x1ee   : > { %v1496_v61 = vpop.permute.xlu0 %1495 }
 0x1ef   : > { %v1724_v15 = vsel %vm1704_vm8, %v1699_v17, %v1496_v61  ;;  %3884 = vrot.lane.b32.xlu1 %v8003_v50, %s6926_s22  ;;  %v10643_v50 = vld [vmem:[#allocation32_spill] sm:$0xff] }
 0x1f0   : > { %3814 = vrot.lane.b32.xlu0 %v8015_v8, %s6925_s21  ;;  %6414 = vmatmul.mubr.msk.f32.gmra.mxu0 %vm1733_vm9, %v1724_v15  ;;  %v1575_v8 = vsel %vm1554_vm2, %v1550_v1, %v10643_v50  ;;  %v6725_v17 = vld [vmem:[%s7041_s25 + $0xa2] ss:$3 sm:$0xff]  ;;  %v6099_v61 = vld [vmem:[%s7041_s25 + $0x83] ss:$3 sm:$0xff]  ;;  %v6173_v50 = vld [vmem:[%s7041_s25 + $0x84] ss:$3 sm:$0xff] }
 0x1f1   : > { %v1308_v35 = vpop.permute.xlu1 %1307  ;;  %v1600_v53 = vsel %vm1579_vm3, %v1575_v8, %v10644_v60  ;;  %v5830_v1 = vld [vmem:[%s7041_s25 + $0x2c0] ss:$3 sm:$0xff] }
 0x1f2   : > { %v1306_v25 = vpop.permute.xlu0 %1305  ;;  %v1625_v29 = vsel %vm1604_vm4, %v1600_v53, %v10645_v39  ;;  %v10650_v60 = vld [vmem:[#allocation18_spill] sm:$0xff] }
 0x1f3   : > { %2243 = vrot.lane.b32.xlu1 %v6053_v37, %s6921_s27  ;;  %v1650_v4 = vsel %vm1629_vm5, %v1625_v29, %v1210_v24  ;;  %v1552_v53 = vsel %vm1529_vm1, %v5830_v1, %v10650_v60  ;;  %v10652_v29 = vld [vmem:[#allocation50_spill] sm:$0xff] }
 0x1f4   : > { %2149 = vrot.lane.b32.xlu0 %v8101_v5, %s6920_s26  ;;  %v1675_v30 = vsel %vm1654_vm6, %v1650_v4, %v1306_v25 }
 0x1f5   : > { %v8110_v34 = vpop.permute.xlu1 %2139 }
 0x1f6   : > { %v1402_v49 = vpop.permute.xlu0 %1401 }
 0x1f7   : > { %2551 = vrot.lane.b32.xlu1 %v6721_v11, %s6925_s21  ;;  %v1700_v14 = vsel %vm1679_vm7, %v1675_v30, %v1402_v49  ;;  %v10651_v49 = vld [vmem:[#allocation36_spill] sm:$0xff] }
 0x1f8   : > { %2481 = vrot.lane.b32.xlu0 %v6076_v16, %s6924_s17  ;;  %v1577_v39 = vsel %vm1554_vm2, %v1552_v53, %v10651_v49  ;;  %v10653_v30 = vld [vmem:[#allocation64_spill] sm:$0xff] }
 0x1f9   : > { %v1498_v6 = vpop.permute.xlu1 %1497  ;;  %v1602_v4 = vsel %vm1579_vm3, %v1577_v39, %v10652_v29  ;;  %v6196_v39 = vld [vmem:[%s7041_s25 + $0x84] ss:$3 sm:$0xff] }
 0x1fa   : > { %v1404_v52 = vpop.permute.xlu0 %1403  ;;  %v1725_v2 = vsel %vm1704_vm8, %v1700_v14, %v1498_v6  ;;  %v1627_v14 = vsel %vm1604_vm4, %v1602_v4, %v10653_v30  ;;  %v6056_v30 = vld [vmem:[%s7041_s25 + $0xe3] ss:$3 sm:$0xff] }
 0x1fb   : > { %3648 = vrot.lane.b32.xlu1 %v6075_v12, %s6923_s29  ;;  %6416 = vmatprep.mubr.msk.f32.mxu0 %vm1733_vm9, %v1725_v2  ;;  %v1626_v12 = vsel %vm1604_vm4, %v1601_v59, %v10649_v47  ;;  %v8214_v2 = vld [vmem:[%s7041_s25 + $0xc2] ss:$3 sm:$0xff]  ;;  %v6151_v47 = vld [vmem:[%s7041_s25 + $0xa4] ss:$3 sm:$0xff] }
 0x1fc   : > { %3578 = vrot.lane.b32.xlu0 %v8046_v63, %s6922_s28  ;;  %v1651_v63 = vsel %vm1629_vm5, %v1626_v12, %v1212_v26  ;;  %v6726_v26 = vld [vmem:[%s7041_s25 + $0xc1] ss:$3 sm:$0xff] }
 0x1fd   : > { %v8133_v62 = vpop.permute.xlu1 %2235  ;;  %v1676_v48 = vsel %vm1654_vm6, %v1651_v63, %v1308_v35  ;;  %v6150_v35 = vld [vmem:[%s7041_s25 + $0x84] ss:$3 sm:$0xff] }
 0x1fe   : > { %v8135_v32 = vpop.permute.xlu0 %2141  ;;  %v1701_v0 = vsel %vm1679_vm7, %v1676_v48, %v1404_v52  ;;  %v6728_v52 = vld [vmem:[%s7041_s25 + $0xc2] ss:$3 sm:$0xff]  ;;  %v5831_v48 = vld [vmem:[%s7041_s25 + $0x2e0] ss:$3 sm:$0xff] }
 0x1ff   : > { %3980 = vrot.lane.b32.xlu1 %v6194_v3, %s6927_s23 }
 0x200   : > { %3886 = vrot.lane.b32.xlu0 %v8059_v20, %s6926_s22 }
 0x201   : > { %v1500_v22 = vpop.permute.xlu1 %1499 }
 0x202   : > { %v1214_v31 = vpop.permute.xlu0 %1213  ;;  %v1726_v18 = vsel %vm1704_vm8, %v1701_v0, %v1500_v22  ;;  %v10654_v22 = vld [vmem:[#allocation17_spill] sm:$0xff] }
 0x203   : > { %2315 = vrot.lane.b32.xlu1 %v6722_v42, %s6922_s28  ;;  %6417 = vmatmul.mubr.msk.f32.gmra.mxu0 %vm1733_vm9, %v1726_v18  ;;  %v1652_v6 = vsel %vm1629_vm5, %v1627_v14, %v1214_v31  ;;  %v1553_v31 = vsel %vm1529_vm1, %v5831_v48, %v10654_v22  ;;  %v10655_v18 = vld [vmem:[#allocation35_spill] sm:$0xff] }
 0x204   : > { %2245 = vrot.lane.b32.xlu0 %v6054_v44, %s6921_s27  ;;  %v1578_v42 = vsel %vm1554_vm2, %v1553_v31, %v10655_v18  ;;  %v6735_v48 = vld [vmem:[%s7041_s25 + $0xe1] ss:$3 sm:$0xff] }
 0x205   : > { %v8151_v43 = vpop.permute.xlu1 %2307 }
 0x206   : > { %v8153_v20 = vpop.permute.xlu0 %2237 }
 0x207   : > { %2623 = vrot.lane.b32.xlu1 %v6723_v54, %s6926_s22 }
 0x208   : > { %2553 = vrot.lane.b32.xlu0 %v6724_v40, %s6925_s21  ;;  %v10656_v40 = vld [vmem:[#allocation49_spill] sm:$0xff] }
 0x209   : > { %v8159_v21 = vpop.permute.xlu1 %1215 }
 0x20a   : > { %v8161_v24 = vpop.permute.xlu0 %3404 }
 0x20b   : > { %3650 = vrot.lane.b32.xlu1 %v6076_v16, %s6923_s29 }
 0x20c   : > { %3412 = vrot.lane.b32.xlu0 %v6053_v37, %s6920_s26  ;;  %v6727_v37 = vld [vmem:[%s7041_s25 + $0xa2] ss:$3 sm:$0xff] }
 0x20d   : > { %v8167_v45 = vpop.permute.xlu1 %2309 }
 0x20e   : > { %v1310_v57 = vpop.permute.xlu0 %1309 }
 0x20f   : > { %3982 = vrot.lane.b32.xlu1 %v6195_v9, %s6927_s23  ;;  %v1677_v13 = vsel %vm1654_vm6, %v1652_v6, %v1310_v57  ;;  %v1603_v9 = vsel %vm1579_vm3, %v1578_v42, %v10656_v40 }
 0x210   : > { %3744 = vrot.lane.b32.xlu0 %v6172_v33, %s6924_s17 }
 0x211   : > { %v8171_v55 = vpop.permute.xlu1 %3406 }
 0x212   : > { %v8173_v27 = vpop.permute.xlu0 %2379 }
 0x213   : > { %2387 = vrot.lane.b32.xlu1 %v6725_v17, %s6923_s29 }
 0x214   : > { %2317 = vrot.lane.b32.xlu0 %v6726_v26, %s6922_s28 }
 0x215   : > { %v1312_v15 = vpop.permute.xlu1 %1311 }
 0x216   : > { %v8180_v7 = vpop.permute.xlu0 %3500 }
 0x217   : > { %2719 = vrot.lane.b32.xlu1 %v6099_v61, %s6927_s23 }
 0x218   : > { %2625 = vrot.lane.b32.xlu0 %v6727_v37, %s6926_s22 }
 0x219   : > { %v8186_v25 = vpop.permute.xlu1 %2143 }
 0x21a   : > { %v1406_v46 = vpop.permute.xlu0 %1405 }
 0x21b   : > { %3508 = vrot.lane.b32.xlu1 %v6150_v35, %s6921_s27  ;;  %v1702_v41 = vsel %vm1679_vm7, %v1677_v13, %v1406_v46  ;;  %v6078_v46 = vld [vmem:[%s7041_s25 + $0xc3] ss:$3 sm:$0xff]  ;;  %v6732_v13 = vld [vmem:[%s7041_s25 + $0x1] ss:$3 sm:$0xff] }
 0x21c   : > { %3414 = vrot.lane.b32.xlu0 %v6054_v44, %s6920_s26 }
 0x21d   : > { %v8192_v8 = vpop.permute.xlu1 %2475 }
 0x21e   : > { %v8194_v16 = vpop.permute.xlu0 %2381 }
 0x21f   : > { %3816 = vrot.lane.b32.xlu1 %v6723_v54, %s6925_s21  ;;  %v6055_v54 = vld [vmem:[%s7041_s25 + $0xc3] ss:$3 sm:$0xff] }
 0x220   : > { %3746 = vrot.lane.b32.xlu0 %v6173_v50, %s6924_s17 }
 0x221   : > { %v8204_v11 = vpop.permute.xlu1 %3572 }
 0x222   : > { %v8206_v10 = vpop.permute.xlu0 %3502 }
 0x223   : > { %2389 = vrot.lane.b32.xlu1 %v6728_v52, %s6923_s29 }
 0x224   : > { %2151 = vrot.lane.b32.xlu0 %v8214_v2, %s6920_s26 }
 0x225   : > { %v1502_v3 = vpop.permute.xlu1 %1501 }
 0x226   : > { %v1408_v58 = vpop.permute.xlu0 %1407  ;;  %v1727_v59 = vsel %vm1704_vm8, %v1702_v41, %v1502_v3 }
 0x227   : > { %2721 = vrot.lane.b32.xlu1 %v6100_v23, %s6927_s23  ;;  %6419 = vmatprep.mubr.msk.f32.mxu0 %vm1733_vm9, %v1727_v59 }
 0x228   : > { %2483 = vrot.lane.b32.xlu0 %v6077_v19, %s6924_s17 }
 0x229   : > { %v8227_v12 = vpop.permute.xlu1 %2239 }
 0x22a   : > { %v8229_v63 = vpop.permute.xlu0 %2145 }
 0x22b   : > { %3580 = vrot.lane.b32.xlu1 %v6725_v17, %s6922_s28  ;;  %v10657_v17 = vld [vmem:[#allocation63_spill] sm:$0xff] }
 0x22c   : > { %3510 = vrot.lane.b32.xlu0 %v6151_v47, %s6921_s27  ;;  %v1628_v26 = vsel %vm1604_vm4, %v1603_v9, %v10657_v17  ;;  %v6734_v47 = vld [vmem:[%s7041_s25 + $0xc2] ss:$3 sm:$0xff]  ;;  %v6736_v17 = vld [vmem:[%s7041_s25 + $0x21] ss:$3 sm:$0xff] }
 0x22d   : > { %v2548_v44 = vpop.permute.xlu1 %2547 }
 0x22e   : > { %v8234_v0 = vpop.permute.xlu0 %2477 }
 0x22f   : > { %3888 = vrot.lane.b32.xlu1 %v6099_v61, %s6926_s22  ;;  %v1653_v61 = vsel %vm1629_vm5, %v1628_v26, %v8159_v21  ;;  %v6731_v21 = vld [vmem:[%s7041_s25 + $0xc1] ss:$3 sm:$0xff]  ;;  %v6737_v26 = vld [vmem:[%s7041_s25 + $0xe2] ss:$3 sm:$0xff] }
 0x230   : > { %3818 = vrot.lane.b32.xlu0 %v6727_v37, %s6925_s21  ;;  %v8255_v37 = vld [vmem:[%s7041_s25 + $0xe2] ss:$3 sm:$0xff]  ;;  %v1678_v35 = vsel %vm1654_vm6, %v1653_v61, %v1312_v15  ;;  %v6738_v61 = vld [vmem:[%s7041_s25 + $0x101] ss:$3 sm:$0xff] }
 0x231   : > { %v8245_v33 = vpop.permute.xlu1 %3644  ;;  %v1703_v1 = vsel %vm1679_vm7, %v1678_v35, %v1408_v58 }
 0x232   : > { %v8247_v57 = vpop.permute.xlu0 %3574 }
 0x233   : > { %2247 = vrot.lane.b32.xlu1 %v6055_v54, %s6921_s27 }
 0x234   : > { %2153 = vrot.lane.b32.xlu0 %v8255_v37, %s6920_s26 }
 0x235   : > { %v8262_v50 = vpop.permute.xlu1 %2241 }
 0x236   : > { %v1504_v60 = vpop.permute.xlu0 %1503 }
 0x237   : > { %v1728_v53 = vsel %vm1704_vm8, %v1703_v1, %v1504_v60  ;;  %2555 = vrot.lane.b32.xlu1 %v6731_v21, %s6925_s21 }
 0x238   : > { %2485 = vrot.lane.b32.xlu0 %v6078_v46, %s6924_s17  ;;  %6420 = vmatmul.mubr.msk.f32.gmra.mxu0 %vm1733_vm9, %v1728_v53 }
 0x239   : > { %v2550_v49 = vpop.permute.xlu1 %2549 }
 0x23a   : > { %v8269_v15 = vpop.permute.xlu0 %2311 }
 0x23b   : > { %3652 = vrot.lane.b32.xlu1 %v6077_v19, %s6923_s29  ;;  %v2787_v19 = vsel %vm1529_vm1, %v6732_v13, %v8110_v34 }
 0x23c   : > { %3582 = vrot.lane.b32.xlu0 %v6728_v52, %s6922_s28  ;;  %v6733_v52 = vld [vmem:[%s7041_s25 + $0xe1] ss:$3 sm:$0xff]  ;;  %v2811_v41 = vsel %vm1554_vm2, %v2787_v19, %v8133_v62 }
 0x23d   : > { %v8274_v29 = vpop.permute.xlu1 %3408 }
 0x23e   : > { %v2620_v4 = vpop.permute.xlu0 %2619 }
 0x23f   : > { %3984 = vrot.lane.b32.xlu1 %v6196_v39, %s6927_s23  ;;  %v6739_v39 = vld [vmem:[%s7041_s25 + $0xe2] ss:$3 sm:$0xff] }
 0x240   : > { %3890 = vrot.lane.b32.xlu0 %v6100_v23, %s6926_s22  ;;  %v2835_v23 = vsel %vm1579_vm3, %v2811_v41, %v8151_v43 }
 0x241   : > { %v8279_v14 = vpop.permute.xlu1 %3740  ;;  %v2859_v34 = vsel %vm1604_vm4, %v2835_v23, %v8173_v27  ;;  %v6197_v27 = vld [vmem:[%s7041_s25 + $0xa4] ss:$3 sm:$0xff] }
 0x242   : > { %v8281_v6 = vpop.permute.xlu0 %3646  ;;  %v2883_v59 = vsel %vm1629_vm5, %v2859_v34, %v8192_v8  ;;  %v6174_v8 = vld [vmem:[%s7041_s25 + $0xa4] ss:$3 sm:$0xff]  ;;  %v6740_v34 = vld [vmem:[%s7041_s25 + $0x102] ss:$3 sm:$0xff] }
 0x243   : > { %2319 = vrot.lane.b32.xlu1 %v6733_v52, %s6922_s28  ;;  %v2907_v62 = vsel %vm1654_vm6, %v2883_v59, %v2548_v44  ;;  %v8363_v59 = vld [vmem:[%s7041_s25 + $0x102] ss:$3 sm:$0xff] }
 0x244   : > { %2249 = vrot.lane.b32.xlu0 %v6056_v30, %s6921_s27  ;;  %v2931_v43 = vsel %vm1679_vm7, %v2907_v62, %v2620_v4 }
 0x245   : > { %v8293_v3 = vpop.permute.xlu1 %2383 }
 0x246   : > { %v8295_v58 = vpop.permute.xlu0 %2313 }
 0x247   : > { %2627 = vrot.lane.b32.xlu1 %v6734_v47, %s6926_s22 }
 0x248   : > { %2557 = vrot.lane.b32.xlu0 %v6735_v48, %s6925_s21  ;;  %v6079_v48 = vld [vmem:[%s7041_s25 + $0xe3] ss:$3 sm:$0xff] }
 0x249   : > { %v2716_v22 = vpop.permute.xlu1 %2715 }
 0x24a   : > { %v2622_v31 = vpop.permute.xlu0 %2621  ;;  %v2955_v18 = vsel %vm1704_vm8, %v2931_v43, %v2716_v22 }
 0x24b   : > { %3654 = vrot.lane.b32.xlu1 %v6078_v46, %s6923_s29  ;;  %6430 = vmatprep.mubr.msk.f32.mxu1 %vm1733_vm9, %v2955_v18  ;;  %v6101_v46 = vld [vmem:[%s7041_s25 + $0xc3] ss:$3 sm:$0xff]  ;;  %v4052_v18 = vsel %vm1529_vm1, %v7764_v38, %v8161_v24 }
 0x24c   : > { %3416 = vrot.lane.b32.xlu0 %v6055_v54, %s6920_s26  ;;  %v2788_v54 = vsel %vm1529_vm1, %v6736_v17, %v8135_v32 }
 0x24d   : > { %v8313_v42 = vpop.permute.xlu1 %3504  ;;  %v2812_v35 = vsel %vm1554_vm2, %v2788_v54, %v8153_v20 }
 0x24e   : > { %v8315_v44 = vpop.permute.xlu0 %3410  ;;  %v2836_v1 = vsel %vm1579_vm3, %v2812_v35, %v8167_v45  ;;  %v6152_v45 = vld [vmem:[%s7041_s25 + $0xc4] ss:$3 sm:$0xff] }
 0x24f   : > { %3986 = vrot.lane.b32.xlu1 %v6197_v27, %s6927_s23  ;;  %v2860_v32 = vsel %vm1604_vm4, %v2836_v1, %v8194_v16  ;;  %v4076_v27 = vsel %vm1554_vm2, %v4052_v18, %v8180_v7  ;;  %v6057_v7 = vld [vmem:[%s7041_s25 + $0x103] ss:$3 sm:$0xff]  ;;  %v6745_v18 = vld [vmem:[%s7041_s25 + $0x121] ss:$3 sm:$0xff] }
 0x250   : > { %3748 = vrot.lane.b32.xlu0 %v6174_v8, %s6924_s17  ;;  %v2884_v21 = vsel %vm1629_vm5, %v2860_v32, %v8234_v0  ;;  %v6175_v0 = vld [vmem:[%s7041_s25 + $0xc4] ss:$3 sm:$0xff]  ;;  %v4100_v8 = vsel %vm1579_vm3, %v4076_v27, %v8204_v11 }
 0x251   : > { %v3813_v40 = vpop.permute.xlu1 %3812  ;;  %v2908_v20 = vsel %vm1654_vm6, %v2884_v21, %v2550_v49  ;;  %v6743_v32 = vld [vmem:[%s7041_s25 + $0x101] ss:$3 sm:$0xff] }
 0x252   : > { %v8319_v9 = vpop.permute.xlu0 %3742  ;;  %v2932_v4 = vsel %vm1679_vm7, %v2908_v20, %v2622_v31  ;;  %v4053_v20 = vsel %vm1529_vm1, %v7796_v56, %v8171_v55 }
 0x253   : > { %2391 = vrot.lane.b32.xlu1 %v6737_v26, %s6923_s29 }
 0x254   : > { %2321 = vrot.lane.b32.xlu0 %v6738_v61, %s6922_s28  ;;  %v4124_v61 = vsel %vm1604_vm4, %v4100_v8, %v8245_v33  ;;  %v8405_v33 = vld [vmem:[%s7041_s25 + $0x122] ss:$3 sm:$0xff] }
 0x255   : > { %v8333_v60 = vpop.permute.xlu1 %2385  ;;  %v4148_v38 = vsel %vm1629_vm5, %v4124_v61, %v8279_v14  ;;  %v6080_v14 = vld [vmem:[%s7041_s25 + $0x103] ss:$3 sm:$0xff] }
 0x256   : > { %v8335_v53 = vpop.permute.xlu0 %2147  ;;  %v4172_v24 = vsel %vm1654_vm6, %v4148_v38, %v3813_v40  ;;  %v6746_v38 = vld [vmem:[%s7041_s25 + $0x102] ss:$3 sm:$0xff] }
 0x257   : > { %2723 = vrot.lane.b32.xlu1 %v6101_v46, %s6927_s23 }
 0x258   : > { %2629 = vrot.lane.b32.xlu0 %v6739_v39, %s6926_s22 }
 0x259   : > { %v2718_v13 = vpop.permute.xlu1 %2717 }
 0x25a   : > { %v8347_v19 = vpop.permute.xlu0 %2479  ;;  %v2956_v16 = vsel %vm1704_vm8, %v2932_v4, %v2718_v13  ;;  %v6198_v4 = vld [vmem:[%s7041_s25 + $0xc4] ss:$3 sm:$0xff] }
 0x25b   : > { %3512 = vrot.lane.b32.xlu1 %v6152_v45, %s6921_s27  ;;  %6431 = vmatmul.mubr.msk.f32.vlgmr.msra.gmra.mxu1 %vm1733_vm9, %v2956_v16  ;;  %v4077_v45 = vsel %vm1554_vm2, %v4053_v20, %v8206_v10  ;;  %v6749_v20 = vld [vmem:[%s7041_s25 + $0x122] ss:$3 sm:$0xff] }
 0x25c   : > { %3418 = vrot.lane.b32.xlu0 %v6056_v30, %s6920_s26  ;;  %v6102_v30 = vld [vmem:[%s7041_s25 + $0xe3] ss:$3 sm:$0xff]  ;;  %v4101_v13 = vsel %vm1579_vm3, %v4077_v45, %v8247_v57  ;;  %v6750_v45 = vld [vmem:[%s7041_s25 + $0x141] ss:$3 sm:$0xff] }
 0x25d   : > { %v8354_v49 = vpop.permute.xlu1 %3576  ;;  %v4125_v56 = vsel %vm1604_vm4, %v4101_v13, %v8281_v6  ;;  %v6744_v6 = vld [vmem:[%s7041_s25 + $0x41] ss:$3 sm:$0xff]  ;;  %v6103_v13 = vld [vmem:[%s7041_s25 + $0x103] ss:$3 sm:$0xff] }
 0x25e   : > { %v8356_v52 = vpop.permute.xlu0 %3506  ;;  %v4149_v55 = vsel %vm1629_vm5, %v4125_v56, %v8319_v9  ;;  %v2789_v9 = vsel %vm1529_vm1, %v6744_v6, %v8186_v25 }
 0x25f   : > { %3820 = vrot.lane.b32.xlu1 %v6734_v47, %s6925_s21  ;;  %v6153_v47 = vld [vmem:[%s7041_s25 + $0xe4] ss:$3 sm:$0xff] }
 0x260   : > { %3750 = vrot.lane.b32.xlu0 %v6175_v0, %s6924_s17 }
 0x261   : > { %v3885_v41 = vpop.permute.xlu1 %3884 }
 0x262   : > { %v3815_v23 = vpop.permute.xlu0 %3814  ;;  %v4196_v11 = vsel %vm1679_vm7, %v4172_v24, %v3885_v41  ;;  %v6058_v41 = vld [vmem:[%s7041_s25 + $0x123] ss:$3 sm:$0xff] }
 0x263   : > { %2393 = vrot.lane.b32.xlu1 %v6740_v34, %s6923_s29  ;;  %v4173_v10 = vsel %vm1654_vm6, %v4149_v55, %v3815_v23  ;;  %v2813_v23 = vsel %vm1554_vm2, %v2789_v9, %v8227_v12  ;;  %v6747_v12 = vld [vmem:[%s7041_s25 + $0x121] ss:$3 sm:$0xff] }
 0x264   : > { %2155 = vrot.lane.b32.xlu0 %v8363_v59, %s6920_s26 }
 0x265   : > { %v8369_v62 = vpop.permute.xlu1 %2243 }
 0x266   : > { %v8371_v43 = vpop.permute.xlu0 %2149 }
 0x267   : > { %2725 = vrot.lane.b32.xlu1 %v6102_v30, %s6927_s23 }
 0x268   : > { %2487 = vrot.lane.b32.xlu0 %v6079_v48, %s6924_s17 }
 0x269   : > { %v8376_v22 = vpop.permute.xlu1 %2551 }
 0x26a   : > { %v8378_v31 = vpop.permute.xlu0 %2481 }
 0x26b   : > { %3584 = vrot.lane.b32.xlu1 %v6737_v26, %s6922_s28 }
 0x26c   : > { %3514 = vrot.lane.b32.xlu0 %v6153_v47, %s6921_s27 }
 0x26d   : > { %v8389_v17 = vpop.permute.xlu1 %3648 }
 0x26e   : > { %v8391_v54 = vpop.permute.xlu0 %3578 }
 0x26f   : > { %3892 = vrot.lane.b32.xlu1 %v6101_v46, %s6926_s22 }
 0x270   : > { %3822 = vrot.lane.b32.xlu0 %v6739_v39, %s6925_s21 }
 0x271   : > { %v3981_v26 = vpop.permute.xlu1 %3980 }
 0x272   : > { %v3887_v35 = vpop.permute.xlu0 %3886  ;;  %v4220_v1 = vsel %vm1704_vm8, %v4196_v11, %v3981_v26 }
 0x273   : > { %2251 = vrot.lane.b32.xlu1 %v6057_v7, %s6921_s27  ;;  %6474 = vmatprep.mubr.msk.f32.mxu0 %vm1733_vm9, %v4220_v1 }
 0x274   : > { %2157 = vrot.lane.b32.xlu0 %v8405_v33, %s6920_s26 }
 0x275   : > { %v8411_v46 = vpop.permute.xlu1 %2315 }
 0x276   : > { %v8413_v40 = vpop.permute.xlu0 %2245 }
 0x277   : > { %2559 = vrot.lane.b32.xlu1 %v6743_v32, %s6925_s21 }
 0x278   : > { %2489 = vrot.lane.b32.xlu0 %v6080_v14, %s6924_s17 }
 0x279   : > { %v2624_v21 = vpop.permute.xlu1 %2623 }
 0x27a   : > { %v8418_v39 = vpop.permute.xlu0 %2553 }
 0x27b   : > { %3656 = vrot.lane.b32.xlu1 %v6079_v48, %s6923_s29 }
 0x27c   : > { %3586 = vrot.lane.b32.xlu0 %v6740_v34, %s6922_s28  ;;  %v4197_v34 = vsel %vm1679_vm7, %v4173_v10, %v3887_v35  ;;  %v6176_v35 = vld [vmem:[%s7041_s25 + $0xe4] ss:$3 sm:$0xff] }
 0x27d   : > { %v8430_v16 = vpop.permute.xlu1 %3650 }
 0x27e   : > { %v8432_v0 = vpop.permute.xlu0 %3412 }
 0x27f   : > { %3988 = vrot.lane.b32.xlu1 %v6198_v4, %s6927_s23 }
 0x280   : > { %3894 = vrot.lane.b32.xlu0 %v6102_v30, %s6926_s22  ;;  %v2837_v30 = vsel %vm1579_vm3, %v2813_v23, %v8269_v15 }
 0x281   : > { %v3983_v57 = vpop.permute.xlu1 %3982  ;;  %v2861_v25 = vsel %vm1604_vm4, %v2837_v30, %v8293_v3 }
 0x282   : > { %v8443_v48 = vpop.permute.xlu0 %3744  ;;  %v4221_v47 = vsel %vm1704_vm8, %v4197_v34, %v3983_v57  ;;  %v2885_v61 = vsel %vm1629_vm5, %v2861_v25, %v8347_v19  ;;  %v6199_v19 = vld [vmem:[%s7041_s25 + $0xe4] ss:$3 sm:$0xff]  ;;  %v6751_v57 = vld [vmem:[%s7041_s25 + $0x122] ss:$3 sm:$0xff] }
 0x283   : > { %2323 = vrot.lane.b32.xlu1 %v6745_v18, %s6922_s28  ;;  %6475 = vmatmul.mubr.msk.f32.vlgmr.msra.gmra.mxu0 %vm1733_vm9, %v4221_v47  ;;  %v2909_v15 = vsel %vm1654_vm6, %v2885_v61, %v8376_v22  ;;  %v6752_v25 = vld [vmem:[%s7041_s25 + $0x142] ss:$3 sm:$0xff] }
 0x284   : > { %2253 = vrot.lane.b32.xlu0 %v6058_v41, %s6921_s27  ;;  %v2933_v24 = vsel %vm1679_vm7, %v2909_v15, %v2624_v21  ;;  %v6753_v61 = vld [vmem:[%s7041_s25 + $0x142] ss:$3 sm:$0xff] }
 0x285   : > { %v8457_v27 = vpop.permute.xlu1 %2387 }
 0x286   : > { %v8459_v8 = vpop.permute.xlu0 %2317 }
 0x287   : > { %2631 = vrot.lane.b32.xlu1 %v6746_v38, %s6926_s22 }
 0x288   : > { %2561 = vrot.lane.b32.xlu0 %v6747_v12, %s6925_s21  ;;  %v6081_v12 = vld [vmem:[%s7041_s25 + $0x123] ss:$3 sm:$0xff] }
 0x289   : > { %v2720_v11 = vpop.permute.xlu1 %2719 }
 0x28a   : > { %v2626_v26 = vpop.permute.xlu0 %2625  ;;  %v2957_v3 = vsel %vm1704_vm8, %v2933_v24, %v2720_v11 }
 0x28b   : > { %3658 = vrot.lane.b32.xlu1 %v6080_v14, %s6923_s29  ;;  %6433 = vmatprep.mubr.msk.f32.mxu1 %vm1733_vm9, %v2957_v3  ;;  %v6748_v14 = vld [vmem:[%s7041_s25 + $0x61] ss:$3 sm:$0xff]  ;;  %v4054_v3 = vsel %vm1529_vm1, %v7870_v51, %v8274_v29 }
 0x28c   : > { %3420 = vrot.lane.b32.xlu0 %v6057_v7, %s6920_s26  ;;  %v2790_v7 = vsel %vm1529_vm1, %v6748_v14, %v8229_v63 }
 0x28d   : > { %v8478_v1 = vpop.permute.xlu1 %3508  ;;  %v2814_v4 = vsel %vm1554_vm2, %v2790_v7, %v8262_v50 }
 0x28e   : > { %v8480_v22 = vpop.permute.xlu0 %3414  ;;  %v2838_v56 = vsel %vm1579_vm3, %v2814_v4, %v8295_v58  ;;  %v6154_v58 = vld [vmem:[%s7041_s25 + $0x104] ss:$3 sm:$0xff] }
 0x28f   : > { %3990 = vrot.lane.b32.xlu1 %v6199_v19, %s6927_s23  ;;  %v2862_v63 = vsel %vm1604_vm4, %v2838_v56, %v8333_v60  ;;  %v4078_v19 = vsel %vm1554_vm2, %v4054_v3, %v8313_v42  ;;  %v6059_v42 = vld [vmem:[%s7041_s25 + $0x143] ss:$3 sm:$0xff] }
 0x290   : > { %3752 = vrot.lane.b32.xlu0 %v6176_v35, %s6924_s17  ;;  %v2886_v34 = vsel %vm1629_vm5, %v2862_v63, %v8378_v31  ;;  %v6177_v31 = vld [vmem:[%s7041_s25 + $0x104] ss:$3 sm:$0xff]  ;;  %v4102_v35 = vsel %vm1579_vm3, %v4078_v19, %v8354_v49 }
 0x291   : > { %v3817_v32 = vpop.permute.xlu1 %3816  ;;  %v2910_v50 = vsel %vm1654_vm6, %v2886_v34, %v8418_v39 }
 0x292   : > { %v8484_v21 = vpop.permute.xlu0 %3746  ;;  %v2934_v47 = vsel %vm1679_vm7, %v2910_v50, %v2626_v26  ;;  %v4055_v50 = vsel %vm1529_vm1, %v7918_v28, %v8315_v44 }
 0x293   : > { %2395 = vrot.lane.b32.xlu1 %v6749_v20, %s6923_s29 }
 0x294   : > { %2325 = vrot.lane.b32.xlu0 %v6750_v45, %s6922_s28  ;;  %v4126_v45 = vsel %vm1604_vm4, %v4102_v35, %v8389_v17  ;;  %v6754_v17 = vld [vmem:[%s7041_s25 + $0x162] ss:$3 sm:$0xff] }
 0x295   : > { %v8498_v55 = vpop.permute.xlu1 %2389  ;;  %v4150_v51 = vsel %vm1629_vm5, %v4126_v45, %v8443_v48  ;;  %v6082_v48 = vld [vmem:[%s7041_s25 + $0x143] ss:$3 sm:$0xff]  ;;  %v6758_v45 = vld [vmem:[%s7041_s25 + $0x142] ss:$3 sm:$0xff] }
 0x296   : > { %v8500_v10 = vpop.permute.xlu0 %2151  ;;  %v4174_v29 = vsel %vm1654_vm6, %v4150_v51, %v3817_v32  ;;  %v6755_v32 = vld [vmem:[%s7041_s25 + $0x141] ss:$3 sm:$0xff] }
 0x297   : > { %2727 = vrot.lane.b32.xlu1 %v6103_v13, %s6927_s23 }
 0x298   : > { %2633 = vrot.lane.b32.xlu0 %v6751_v57, %s6926_s22 }
 0x299   : > { %v2722_v6 = vpop.permute.xlu1 %2721 }
 0x29a   : > { %v8513_v9 = vpop.permute.xlu0 %2483  ;;  %v2958_v60 = vsel %vm1704_vm8, %v2934_v47, %v2722_v6  ;;  %v6200_v47 = vld [vmem:[%s7041_s25 + $0x104] ss:$3 sm:$0xff] }
 0x29b   : > { %3516 = vrot.lane.b32.xlu1 %v6154_v58, %s6921_s27  ;;  %6434 = vmatmul.mubr.msk.f32.gmra.mxu1 %vm1733_vm9, %v2958_v60  ;;  %v4079_v58 = vsel %vm1554_vm2, %v4055_v50, %v8356_v52 }
 0x29c   : > { %3422 = vrot.lane.b32.xlu0 %v6058_v41, %s6920_s26  ;;  %v6104_v41 = vld [vmem:[%s7041_s25 + $0x123] ss:$3 sm:$0xff]  ;;  %v4103_v6 = vsel %vm1579_vm3, %v4079_v58, %v8391_v54 }
 0x29d   : > { %v8520_v39 = vpop.permute.xlu1 %3580  ;;  %v4127_v28 = vsel %vm1604_vm4, %v4103_v6, %v8430_v16  ;;  %v6756_v16 = vld [vmem:[%s7041_s25 + $0x81] ss:$3 sm:$0xff]  ;;  %v6105_v58 = vld [vmem:[%s7041_s25 + $0x143] ss:$3 sm:$0xff] }
 0x29e   : > { %v8522_v18 = vpop.permute.xlu0 %3510  ;;  %v4151_v44 = vsel %vm1629_vm5, %v4127_v28, %v8484_v21  ;;  %v2791_v21 = vsel %vm1529_vm1, %v6756_v16, %v8335_v53 }
 0x29f   : > { %3824 = vrot.lane.b32.xlu1 %v6746_v38, %s6925_s21  ;;  %v6155_v38 = vld [vmem:[%s7041_s25 + $0x124] ss:$3 sm:$0xff] }
 0x2a0   : > { %3754 = vrot.lane.b32.xlu0 %v6177_v31, %s6924_s17 }
 0x2a1   : > { %v3889_v23 = vpop.permute.xlu1 %3888 }
 0x2a2   : > { %v3819_v30 = vpop.permute.xlu0 %3818  ;;  %v4198_v49 = vsel %vm1679_vm7, %v4174_v29, %v3889_v23  ;;  %v6060_v23 = vld [vmem:[%s7041_s25 + $0x163] ss:$3 sm:$0xff] }
 0x2a3   : > { %2397 = vrot.lane.b32.xlu1 %v6752_v25, %s6923_s29  ;;  %v4175_v52 = vsel %vm1654_vm6, %v4151_v44, %v3819_v30  ;;  %v2815_v30 = vsel %vm1554_vm2, %v2791_v21, %v8369_v62  ;;  %v6759_v62 = vld [vmem:[%s7041_s25 + $0x161] ss:$3 sm:$0xff] }
 0x2a4   : > { %2159 = vrot.lane.b32.xlu0 %v6753_v61, %s6920_s26 }
 0x2a5   : > { %v8532_v15 = vpop.permute.xlu1 %2247 }
 0x2a6   : > { %v8534_v24 = vpop.permute.xlu0 %2153 }
 0x2a7   : > { %2729 = vrot.lane.b32.xlu1 %v6104_v41, %s6927_s23 }
 0x2a8   : > { %2491 = vrot.lane.b32.xlu0 %v6081_v12, %s6924_s17 }
 0x2a9   : > { %v8539_v11 = vpop.permute.xlu1 %2555 }
 0x2aa   : > { %v8541_v26 = vpop.permute.xlu0 %2485 }
 0x2ab   : > { %3588 = vrot.lane.b32.xlu1 %v6749_v20, %s6922_s28 }
 0x2ac   : > { %3518 = vrot.lane.b32.xlu0 %v6155_v38, %s6921_s27  ;;  %v6757_v38 = vld [vmem:[%s7041_s25 + $0x161] ss:$3 sm:$0xff] }
 0x2ad   : > { %v8552_v14 = vpop.permute.xlu1 %3652 }
 0x2ae   : > { %v8554_v7 = vpop.permute.xlu0 %3582 }
 0x2af   : > { %3896 = vrot.lane.b32.xlu1 %v6103_v13, %s6926_s22 }
 0x2b0   : > { %3826 = vrot.lane.b32.xlu0 %v6751_v57, %s6925_s21 }
 0x2b1   : > { %v3985_v20 = vpop.permute.xlu1 %3984 }
 0x2b2   : > { %v3891_v4 = vpop.permute.xlu0 %3890  ;;  %v4222_v56 = vsel %vm1704_vm8, %v4198_v49, %v3985_v20  ;;  %v6178_v20 = vld [vmem:[%s7041_s25 + $0x124] ss:$3 sm:$0xff] }
 0x2b3   : > { %2255 = vrot.lane.b32.xlu1 %v6059_v42, %s6921_s27  ;;  %6477 = vmatprep.mubr.msk.f32.mxu0 %vm1733_vm9, %v4222_v56 }
 0x2b4   : > { %2161 = vrot.lane.b32.xlu0 %v6754_v17, %s6920_s26 }
 0x2b5   : > { %v8571_v13 = vpop.permute.xlu1 %2319 }
 0x2b6   : > { %v8573_v63 = vpop.permute.xlu0 %2249 }
 0x2b7   : > { %2563 = vrot.lane.b32.xlu1 %v6755_v32, %s6925_s21  ;;  %v6761_v32 = vld [vmem:[%s7041_s25 + $0x162] ss:$3 sm:$0xff] }
 0x2b8   : > { %2493 = vrot.lane.b32.xlu0 %v6082_v48, %s6924_s17 }
 0x2b9   : > { %v2628_v34 = vpop.permute.xlu1 %2627 }
 0x2ba   : > { %v8578_v57 = vpop.permute.xlu0 %2557 }
 0x2bb   : > { %3660 = vrot.lane.b32.xlu1 %v6081_v12, %s6923_s29 }
 0x2bc   : > { %3590 = vrot.lane.b32.xlu0 %v6752_v25, %s6922_s28  ;;  %v4199_v25 = vsel %vm1679_vm7, %v4175_v52, %v3891_v4  ;;  %v6763_v52 = vld [vmem:[%s7041_s25 + $0x162] ss:$3 sm:$0xff] }
 0x2bd   : > { %v8590_v60 = vpop.permute.xlu1 %3654 }
 0x2be   : > { %v8592_v31 = vpop.permute.xlu0 %3416 }
 0x2bf   : > { %3992 = vrot.lane.b32.xlu1 %v6200_v47, %s6927_s23 }
 0x2c0   : > { %3898 = vrot.lane.b32.xlu0 %v6104_v41, %s6926_s22  ;;  %v2839_v41 = vsel %vm1579_vm3, %v2815_v30, %v8411_v46  ;;  %v6764_v30 = vld [vmem:[%s7041_s25 + $0x182] ss:$3 sm:$0xff] }
 0x2c1   : > { %v3987_v54 = vpop.permute.xlu1 %3986  ;;  %v2863_v53 = vsel %vm1604_vm4, %v2839_v41, %v8457_v27  ;;  %v6765_v41 = vld [vmem:[%s7041_s25 + $0x182] ss:$3 sm:$0xff] }
 0x2c2   : > { %v8603_v61 = vpop.permute.xlu0 %3748  ;;  %v4223_v12 = vsel %vm1704_vm8, %v4199_v25, %v3987_v54  ;;  %v2887_v35 = vsel %vm1629_vm5, %v2863_v53, %v8513_v9  ;;  %v6201_v9 = vld [vmem:[%s7041_s25 + $0x124] ss:$3 sm:$0xff]  ;;  %v6083_v53 = vld [vmem:[%s7041_s25 + $0x163] ss:$3 sm:$0xff] }
 0x2c3   : > { %2327 = vrot.lane.b32.xlu1 %v6757_v38, %s6922_s28  ;;  %6478 = vmatmul.mubr.msk.f32.gmra.mxu0 %vm1733_vm9, %v4223_v12  ;;  %v2911_v46 = vsel %vm1654_vm6, %v2887_v35, %v8539_v11 }
 0x2c4   : > { %2257 = vrot.lane.b32.xlu0 %v6060_v23, %s6921_s27  ;;  %v2935_v51 = vsel %vm1679_vm7, %v2911_v46, %v2628_v34  ;;  %v6762_v34 = vld [vmem:[%s7041_s25 + $0x181] ss:$3 sm:$0xff] }
 0x2c5   : > { %v8617_v3 = vpop.permute.xlu1 %2391 }
 0x2c6   : > { %v8619_v19 = vpop.permute.xlu0 %2321 }
 0x2c7   : > { %2635 = vrot.lane.b32.xlu1 %v6758_v45, %s6926_s22 }
 0x2c8   : > { %2565 = vrot.lane.b32.xlu0 %v6759_v62, %s6925_s21 }
 0x2c9   : > { %v2724_v29 = vpop.permute.xlu1 %2723 }
 0x2ca   : > { %v2630_v49 = vpop.permute.xlu0 %2629  ;;  %v2959_v27 = vsel %vm1704_vm8, %v2935_v51, %v2724_v29  ;;  %v4056_v29 = vsel %vm1529_vm1, %v8051_v36, %v8432_v0 }
 0x2cb   : > { %3662 = vrot.lane.b32.xlu1 %v6082_v48, %s6923_s29  ;;  %6436 = vmatprep.mubr.msk.f32.mxu1 %vm1733_vm9, %v2959_v27  ;;  %v6760_v48 = vld [vmem:[%s7041_s25 + $0xa1] ss:$3 sm:$0xff] }
 0x2cc   : > { %3424 = vrot.lane.b32.xlu0 %v6059_v42, %s6920_s26  ;;  %v2792_v42 = vsel %vm1529_vm1, %v6760_v48, %v8371_v43 }
 0x2cd   : > { %v8638_v4 = vpop.permute.xlu1 %3512  ;;  %v2816_v50 = vsel %vm1554_vm2, %v2792_v42, %v8413_v40 }
 0x2ce   : > { %v8640_v11 = vpop.permute.xlu0 %3418  ;;  %v2840_v47 = vsel %vm1579_vm3, %v2816_v50, %v8459_v8  ;;  %v6156_v8 = vld [vmem:[%s7041_s25 + $0x144] ss:$3 sm:$0xff] }
 0x2cf   : > { %3994 = vrot.lane.b32.xlu1 %v6201_v9, %s6927_s23  ;;  %v2864_v43 = vsel %vm1604_vm4, %v2840_v47, %v8498_v55 }
 0x2d0   : > { %3756 = vrot.lane.b32.xlu0 %v6178_v20, %s6924_s17  ;;  %v2888_v44 = vsel %vm1629_vm5, %v2864_v43, %v8541_v26  ;;  %v6179_v26 = vld [vmem:[%s7041_s25 + $0x144] ss:$3 sm:$0xff] }
 0x2d1   : > { %v3821_v56 = vpop.permute.xlu1 %3820  ;;  %v2912_v40 = vsel %vm1654_vm6, %v2888_v44, %v8578_v57  ;;  %v4057_v44 = vsel %vm1529_vm1, %v8101_v5, %v8480_v22 }
 0x2d2   : > { %v8644_v17 = vpop.permute.xlu0 %3750  ;;  %v2936_v25 = vsel %vm1679_vm7, %v2912_v40, %v2630_v49  ;;  %v4080_v49 = vsel %vm1554_vm2, %v4056_v29, %v8478_v1  ;;  %v6061_v1 = vld [vmem:[%s7041_s25 + $0x183] ss:$3 sm:$0xff]  ;;  %v6202_v40 = vld [vmem:[%s7041_s25 + $0x144] ss:$3 sm:$0xff] }
 0x2d3   : > { %2399 = vrot.lane.b32.xlu1 %v6761_v32, %s6923_s29  ;;  %v4104_v27 = vsel %vm1579_vm3, %v4080_v49, %v8520_v39  ;;  %v6770_v49 = vld [vmem:[%s7041_s25 + $0x182] ss:$3 sm:$0xff] }
 0x2d4   : > { %2329 = vrot.lane.b32.xlu0 %v6762_v34, %s6922_s28  ;;  %v4128_v48 = vsel %vm1604_vm4, %v4104_v27, %v8552_v14  ;;  %v6766_v14 = vld [vmem:[%s7041_s25 + $0x1a2] ss:$3 sm:$0xff] }
 0x2d5   : > { %v8658_v6 = vpop.permute.xlu1 %2393  ;;  %v4152_v36 = vsel %vm1629_vm5, %v4128_v48, %v8603_v61  ;;  %v6084_v61 = vld [vmem:[%s7041_s25 + $0x183] ss:$3 sm:$0xff] }
 0x2d6   : > { %v8660_v28 = vpop.permute.xlu0 %2155  ;;  %v4176_v0 = vsel %vm1654_vm6, %v4152_v36, %v3821_v56  ;;  %v6767_v56 = vld [vmem:[%s7041_s25 + $0x181] ss:$3 sm:$0xff] }
 0x2d7   : > { %2731 = vrot.lane.b32.xlu1 %v6105_v58, %s6927_s23 }
 0x2d8   : > { %2637 = vrot.lane.b32.xlu0 %v6763_v52, %s6926_s22 }
 0x2d9   : > { %v2726_v54 = vpop.permute.xlu1 %2725 }
 0x2da   : > { %v8673_v12 = vpop.permute.xlu0 %2487  ;;  %v2960_v55 = vsel %vm1704_vm8, %v2936_v25, %v2726_v54 }
 0x2db   : > { %3520 = vrot.lane.b32.xlu1 %v6156_v8, %s6921_s27  ;;  %6437 = vmatmul.mubr.msk.f32.gmra.mxu1 %vm1733_vm9, %v2960_v55  ;;  %v8762_v55 = vld [vmem:[%s7041_s25 + $0x1a3] ss:$3 sm:$0xff] }
 0x2dc   : > { %3426 = vrot.lane.b32.xlu0 %v6060_v23, %s6920_s26  ;;  %v6106_v23 = vld [vmem:[%s7041_s25 + $0x163] ss:$3 sm:$0xff] }
 0x2dd   : > { %v8680_v57 = vpop.permute.xlu1 %3584 }
 0x2de   : > { %v8682_v16 = vpop.permute.xlu0 %3514 }
 0x2df   : > { %3828 = vrot.lane.b32.xlu1 %v6758_v45, %s6925_s21  ;;  %v6157_v45 = vld [vmem:[%s7041_s25 + $0x164] ss:$3 sm:$0xff] }
 0x2e0   : > { %3758 = vrot.lane.b32.xlu0 %v6179_v26, %s6924_s17 }
 0x2e1   : > { %v3893_v21 = vpop.permute.xlu1 %3892 }
 0x2e2   : > { %v3823_v38 = vpop.permute.xlu0 %3822  ;;  %v4200_v39 = vsel %vm1679_vm7, %v4176_v0, %v3893_v21 }
 0x2e3   : > { %2401 = vrot.lane.b32.xlu1 %v6764_v30, %s6923_s29 }
 0x2e4   : > { %2163 = vrot.lane.b32.xlu0 %v6765_v41, %s6920_s26  ;;  %v6769_v41 = vld [vmem:[%s7041_s25 + $0x1a1] ss:$3 sm:$0xff] }
 0x2e5   : > { %v8692_v35 = vpop.permute.xlu1 %2251 }
 0x2e6   : > { %v8694_v62 = vpop.permute.xlu0 %2157 }
 0x2e7   : > { %2733 = vrot.lane.b32.xlu1 %v6106_v23, %s6927_s23 }
 0x2e8   : > { %2495 = vrot.lane.b32.xlu0 %v6083_v53, %s6924_s17 }
 0x2e9   : > { %v8699_v46 = vpop.permute.xlu1 %2559 }
 0x2ea   : > { %v8701_v51 = vpop.permute.xlu0 %2489 }
 0x2eb   : > { %3592 = vrot.lane.b32.xlu1 %v6761_v32, %s6922_s28 }
 0x2ec   : > { %3522 = vrot.lane.b32.xlu0 %v6157_v45, %s6921_s27 }
 0x2ed   : > { %v8712_v9 = vpop.permute.xlu1 %3656 }
 0x2ee   : > { %v8714_v20 = vpop.permute.xlu0 %3586 }
 0x2ef   : > { %3900 = vrot.lane.b32.xlu1 %v6105_v58, %s6926_s22 }
 0x2f0   : > { %3830 = vrot.lane.b32.xlu0 %v6763_v52, %s6925_s21  ;;  %v4081_v52 = vsel %vm1554_vm2, %v4057_v44, %v8522_v18  ;;  %v6107_v44 = vld [vmem:[%s7041_s25 + $0x183] ss:$3 sm:$0xff] }
 0x2f1   : > { %v3989_v42 = vpop.permute.xlu1 %3988  ;;  %v4105_v8 = vsel %vm1579_vm3, %v4081_v52, %v8554_v7 }
 0x2f2   : > { %v3895_v32 = vpop.permute.xlu0 %3894  ;;  %v4224_v34 = vsel %vm1704_vm8, %v4200_v39, %v3989_v42  ;;  %v4129_v5 = vsel %vm1604_vm4, %v4105_v8, %v8590_v60 }
 0x2f3   : > { %2259 = vrot.lane.b32.xlu1 %v6061_v1, %s6921_s27  ;;  %6480 = vmatprep.mubr.msk.f32.mxu0 %vm1733_vm9, %v4224_v34  ;;  %v4153_v22 = vsel %vm1629_vm5, %v4129_v5, %v8644_v17  ;;  %v6772_v34 = vld [vmem:[%s7041_s25 + $0xe1] ss:$3 sm:$0xff] }
 0x2f4   : > { %2165 = vrot.lane.b32.xlu0 %v6766_v14, %s6920_s26  ;;  %v4177_v18 = vsel %vm1654_vm6, %v4153_v22, %v3823_v38  ;;  %v2794_v14 = vsel %vm1529_vm1, %v6772_v34, %v8534_v24  ;;  %v6775_v22 = vld [vmem:[%s7041_s25 + $0x1a2] ss:$3 sm:$0xff] }
 0x2f5   : > { %v8731_v50 = vpop.permute.xlu1 %2323  ;;  %v4201_v7 = vsel %vm1679_vm7, %v4177_v18, %v3895_v32 }
 0x2f6   : > { %v8733_v58 = vpop.permute.xlu0 %2253 }
 0x2f7   : > { %2567 = vrot.lane.b32.xlu1 %v6767_v56, %s6925_s21  ;;  %v6774_v56 = vld [vmem:[%s7041_s25 + $0x1c1] ss:$3 sm:$0xff] }
 0x2f8   : > { %2497 = vrot.lane.b32.xlu0 %v6084_v61, %s6924_s17 }
 0x2f9   : > { %v2632_v47 = vpop.permute.xlu1 %2631 }
 0x2fa   : > { %v8738_v43 = vpop.permute.xlu0 %2561 }
 0x2fb   : > { %3664 = vrot.lane.b32.xlu1 %v6083_v53, %s6923_s29 }
 0x2fc   : > { %3594 = vrot.lane.b32.xlu0 %v6764_v30, %s6922_s28  ;;  %v6768_v30 = vld [vmem:[%s7041_s25 + $0xc1] ss:$3 sm:$0xff] }
 0x2fd   : > { %v8750_v25 = vpop.permute.xlu1 %3658  ;;  %v2793_v17 = vsel %vm1529_vm1, %v6768_v30, %v8500_v10 }
 0x2fe   : > { %v8752_v54 = vpop.permute.xlu0 %3420  ;;  %v2817_v38 = vsel %vm1554_vm2, %v2793_v17, %v8532_v15  ;;  %v6771_v15 = vld [vmem:[%s7041_s25 + $0x1a1] ss:$3 sm:$0xff] }
 0x2ff   : > { %3996 = vrot.lane.b32.xlu1 %v6202_v40, %s6927_s23 }
 0x300   : > { %3902 = vrot.lane.b32.xlu0 %v6106_v23, %s6926_s22  ;;  %v2841_v23 = vsel %vm1579_vm3, %v2817_v38, %v8571_v13  ;;  %v6777_v38 = vld [vmem:[%s7041_s25 + $0x1c2] ss:$3 sm:$0xff] }
 0x301   : > { %v3991_v26 = vpop.permute.xlu1 %3990  ;;  %v2865_v10 = vsel %vm1604_vm4, %v2841_v23, %v8617_v3  ;;  %v6203_v3 = vld [vmem:[%s7041_s25 + $0x164] ss:$3 sm:$0xff]  ;;  %v6085_v23 = vld [vmem:[%s7041_s25 + $0x1a3] ss:$3 sm:$0xff] }
 0x302   : > { %v8765_v21 = vpop.permute.xlu0 %3752  ;;  %v4225_v60 = vsel %vm1704_vm8, %v4201_v7, %v3991_v26  ;;  %v2889_v29 = vsel %vm1629_vm5, %v2865_v10, %v8673_v12  ;;  %v6180_v12 = vld [vmem:[%s7041_s25 + $0x164] ss:$3 sm:$0xff] }
 0x303   : > { %2331 = vrot.lane.b32.xlu1 %v6769_v41, %s6922_s28  ;;  %6481 = vmatmul.mubr.msk.f32.gmra.mxu0 %vm1733_vm9, %v4225_v60  ;;  %v2913_v13 = vsel %vm1654_vm6, %v2889_v29, %v8699_v46  ;;  %v10536_v46 = vmov 0.0   ;;  %v6776_v41 = vld [vmem:[%s7041_s25 + $0x1c2] ss:$3 sm:$0xff] }
 0x304   : > { %2261 = vrot.lane.b32.xlu0 %v8762_v55, %s6921_s27  ;;  %v2937_v27 = vsel %vm1679_vm7, %v2913_v13, %v2632_v47  ;;  %4573 = vst.msk [vmem:[#allocation2 + $0x8] sm:$0xff] %vm4564_vm10, %v10536_v46  ;;  %4574 = vst.msk [vmem:[#allocation2 + $0x18] sm:$0xff] %vm4564_vm10, %v10536_v46  ;;  %4896 = vmatprep.subr.mxu1 %v10536_v46  ;;  %v2818_v47 = vsel %vm1554_vm2, %v2794_v14, %v8573_v63 }
 0x305   : > { %v8780_v53 = vpop.permute.xlu1 %2395  ;;  %4575 = vst.msk [vmem:[#allocation2 + $0x28] sm:$0xff] %vm4564_vm10, %v10536_v46  ;;  %4576 = vst.msk [vmem:[#allocation2 + $0x38] sm:$0xff] %vm4564_vm10, %v10536_v46  ;;  %6543 = vmatprep.subr.mxu0 %v10536_v46  ;;  %v2842_v52 = vsel %vm1579_vm3, %v2818_v47, %v8619_v19  ;;  %v6158_v19 = vld [vmem:[%s7041_s25 + $0x184] ss:$3 sm:$0xff] }
 0x306   : > { %v8782_v45 = vpop.permute.xlu0 %2325  ;;  %4577 = vst.msk [vmem:[#allocation2 + $0x48] sm:$0xff] %vm4564_vm10, %v10536_v46  ;;  %4578 = vst.msk [vmem:[#allocation2 + $0x58] sm:$0xff] %vm4564_vm10, %v10536_v46  ;;  %v2866_v24 = vsel %vm1604_vm4, %v2842_v52, %v8658_v6 }
 0x307   : > { %2639 = vrot.lane.b32.xlu1 %v6770_v49, %s6926_s22  ;;  %4579 = vst.msk [vmem:[#allocation2 + $0x68] sm:$0xff] %vm4564_vm10, %v10536_v46  ;;  %4580 = vst.msk [vmem:[#allocation2 + $0x78] sm:$0xff] %vm4564_vm10, %v10536_v46  ;;  %v2890_v5 = vsel %vm1629_vm5, %v2866_v24, %v8701_v51  ;;  %v6181_v51 = vld [vmem:[%s7041_s25 + $0x184] ss:$3 sm:$0xff] }
 0x308   : > { %2569 = vrot.lane.b32.xlu0 %v6771_v15, %s6925_s21  ;;  %v2914_v63 = vsel %vm1654_vm6, %v2890_v5, %v8738_v43 }
 0x309   : > { %v2728_v48 = vpop.permute.xlu1 %2727 }
 0x30a   : > { %v2634_v36 = vpop.permute.xlu0 %2633  ;;  %v2961_v0 = vsel %vm1704_vm8, %v2937_v27, %v2728_v48  ;;  %v4058_v27 = vsel %vm1529_vm1, %v8214_v2, %v8592_v31 }
 0x30b   : > { %3666 = vrot.lane.b32.xlu1 %v6084_v61, %s6923_s29  ;;  %6439 = vmatprep.mubr.msk.f32.mxu1 %vm1733_vm9, %v2961_v0  ;;  %v6773_v61 = vld [vmem:[%s7041_s25 + $0x1a2] ss:$3 sm:$0xff]  ;;  %v2938_v18 = vsel %vm1679_vm7, %v2914_v63, %v2634_v36  ;;  %v4082_v48 = vsel %vm1554_vm2, %v4058_v27, %v8638_v4  ;;  %v8906_v4 = vld [vmem:[%s7041_s25 + $0x1c3] ss:$3 sm:$0xff]  ;;  %v4059_v63 = vsel %vm1529_vm1, %v8255_v37, %v8640_v11  ;;  %v6780_v27 = vld [vmem:[%s7041_s25 + $0x101] ss:$3 sm:$0xff] }
 0x30c   : > { %3428 = vrot.lane.b32.xlu0 %v6061_v1, %s6920_s26  ;;  %v4106_v36 = vsel %vm1579_vm3, %v4082_v48, %v8680_v57 }
 0x30d   : > { %v8801_v39 = vpop.permute.xlu1 %3516 }
 0x30e   : > { %v8803_v42 = vpop.permute.xlu0 %3422 }
 0x30f   : > { %3998 = vrot.lane.b32.xlu1 %v6203_v3, %s6927_s23 }
 0x310   : > { %3760 = vrot.lane.b32.xlu0 %v6180_v12, %s6924_s17  ;;  %v4130_v12 = vsel %vm1604_vm4, %v4106_v36, %v8712_v9  ;;  %v6778_v9 = vld [vmem:[%s7041_s25 + $0x1e2] ss:$3 sm:$0xff] }
 0x311   : > { %v3825_v1 = vpop.permute.xlu1 %3824  ;;  %v4154_v2 = vsel %vm1629_vm5, %v4130_v12, %v8765_v21  ;;  %v8914_v21 = vpop.f32.mrf.mxu0 }
 0x312   : > { %v8825_v32 = vpop.permute.xlu0 %3754  ;;  %v4178_v31 = vsel %vm1654_vm6, %v4154_v2, %v3825_v1  ;;  %v6086_v1 = vld [vmem:[%s7041_s25 + $0x1c3] ss:$3 sm:$0xff] }
 0x313   : > { %2403 = vrot.lane.b32.xlu1 %v6773_v61, %s6923_s29  ;;  %v8925_v52 = vpop.f32.mrf.mxu0 }
 0x314   : > { %2333 = vrot.lane.b32.xlu0 %v6774_v56, %s6922_s28 }
 0x315   : > { %v8839_v40 = vpop.permute.xlu1 %2397 }
 0x316   : > { %v8841_v8 = vpop.permute.xlu0 %2159 }
 0x317   : > { %2735 = vrot.lane.b32.xlu1 %v6107_v44, %s6927_s23 }
 0x318   : > { %2641 = vrot.lane.b32.xlu0 %v6775_v22, %s6926_s22 }
 0x319   : > { %v2730_v7 = vpop.permute.xlu1 %2729 }
 0x31a   : > { %v8854_v26 = vpop.permute.xlu0 %2491  ;;  %v2962_v6 = vsel %vm1704_vm8, %v2938_v18, %v2730_v7  ;;  %v6204_v18 = vld [vmem:[%s7041_s25 + $0x184] ss:$3 sm:$0xff] }
 0x31b   : > { %3524 = vrot.lane.b32.xlu1 %v6158_v19, %s6921_s27  ;;  %6440 = vmatmul.mubr.msk.f32.gmra.mxu1 %vm1733_vm9, %v2962_v6  ;;  %v4083_v19 = vsel %vm1554_vm2, %v4059_v63, %v8682_v16 }
 0x31c   : > { %3430 = vrot.lane.b32.xlu0 %v8762_v55, %s6920_s26  ;;  %v6108_v55 = vld [vmem:[%s7041_s25 + $0x1a3] ss:$3 sm:$0xff]  ;;  %v4107_v7 = vsel %vm1579_vm3, %v4083_v19, %v8714_v20 }
 0x31d   : > { %v8862_v43 = vpop.permute.xlu1 %3588  ;;  %v4131_v37 = vsel %vm1604_vm4, %v4107_v7, %v8750_v25 }
 0x31e   : > { %v8864_v60 = vpop.permute.xlu0 %3518  ;;  %v4155_v11 = vsel %vm1629_vm5, %v4131_v37, %v8825_v32  ;;  %v2795_v32 = vsel %vm1529_vm1, %v6780_v27, %v8660_v28  ;;  %v6784_v37 = vld [vmem:[%s7041_s25 + $0x121] ss:$3 sm:$0xff] }
 0x31f   : > { %3832 = vrot.lane.b32.xlu1 %v6770_v49, %s6925_s21  ;;  %v6159_v49 = vld [vmem:[%s7041_s25 + $0x1a4] ss:$3 sm:$0xff]  ;;  %v2819_v48 = vsel %vm1554_vm2, %v2795_v32, %v8692_v35  ;;  %v6782_v35 = vld [vmem:[%s7041_s25 + $0x1c2] ss:$3 sm:$0xff] }
 0x320   : > { %3762 = vrot.lane.b32.xlu0 %v6181_v51, %s6924_s17  ;;  %v2843_v36 = vsel %vm1579_vm3, %v2819_v48, %v8731_v50 }
 0x321   : > { %v3897_v30 = vpop.permute.xlu1 %3896 }
 0x322   : > { %v3827_v17 = vpop.permute.xlu0 %3826  ;;  %v4202_v57 = vsel %vm1679_vm7, %v4178_v31, %v3897_v30  ;;  %v2867_v31 = vsel %vm1604_vm4, %v2843_v36, %v8780_v53 }
 0x323   : > { %2405 = vrot.lane.b32.xlu1 %v6776_v41, %s6923_s29  ;;  %v4179_v20 = vsel %vm1654_vm6, %v4155_v11, %v3827_v17  ;;  %v2796_v11 = vsel %vm1529_vm1, %v6784_v37, %v8694_v62  ;;  %v6788_v37 = vld [vmem:[%s7041_s25 + $0x202] ss:$3 sm:$0xff] }
 0x324   : > { %2167 = vrot.lane.b32.xlu0 %v6777_v38, %s6920_s26 }
 0x325   : > { %v8874_v10 = vpop.permute.xlu1 %2255 }
 0x326   : > { %v8876_v29 = vpop.permute.xlu0 %2161 }
 0x327   : > { %2737 = vrot.lane.b32.xlu1 %v6108_v55, %s6927_s23 }
 0x328   : > { %2499 = vrot.lane.b32.xlu0 %v6085_v23, %s6924_s17 }
 0x329   : > { %v8881_v15 = vpop.permute.xlu1 %2563 }
 0x32a   : > { %v8883_v13 = vpop.permute.xlu0 %2493 }
 0x32b   : > { %3596 = vrot.lane.b32.xlu1 %v6773_v61, %s6922_s28 }
 0x32c   : > { %3526 = vrot.lane.b32.xlu0 %v6159_v49, %s6921_s27 }
 0x32d   : > { %v8894_v0 = vpop.permute.xlu1 %3660 }
 0x32e   : > { %v8896_v3 = vpop.permute.xlu0 %3590 }
 0x32f   : > { %3904 = vrot.lane.b32.xlu1 %v6107_v44, %s6926_s22  ;;  %v6779_v44 = vld [vmem:[%s7041_s25 + $0x1c1] ss:$3 sm:$0xff] }
 0x330   : > { %3834 = vrot.lane.b32.xlu0 %v6775_v22, %s6925_s21  ;;  %v8929_v22 = vpop.f32.mrf.mxu0 }
 0x331   : > { %v3993_v34 = vpop.permute.xlu1 %3992 }
 0x332   : > { %v3899_v14 = vpop.permute.xlu0 %3898  ;;  %v4226_v61 = vsel %vm1704_vm8, %v4202_v57, %v3993_v34  ;;  %v8945_v30 = vpop.f32.mrf.mxu0  ;;  %v2891_v57 = vsel %vm1629_vm5, %v2867_v31, %v8854_v26  ;;  %v6783_v34 = vld [vmem:[%s7041_s25 + $0x1e1] ss:$3 sm:$0xff] }
 0x333   : > { %2263 = vrot.lane.b32.xlu1 %v8906_v4, %s6921_s27  ;;  %6483 = vmatprep.mubr.msk.f32.mxu0 %vm1733_vm9, %v4226_v61  ;;  %v4203_v38 = vsel %vm1679_vm7, %v4179_v20, %v3899_v14  ;;  %v2915_v50 = vsel %vm1654_vm6, %v2891_v57, %v8881_v15  ;;  %v6205_v15 = vld [vmem:[%s7041_s25 + $0x1a4] ss:$3 sm:$0xff]  ;;  %v6785_v20 = vld [vmem:[%s7041_s25 + $0x1e2] ss:$3 sm:$0xff] }
 0x334   : > { %2169 = vrot.lane.b32.xlu0 %v6778_v9, %s6920_s26  ;;  %v8953_v16 = vpop.f32.mrf.mxu0  ;;  %v6160_v57 = vld [vmem:[%s7041_s25 + $0x1c4] ss:$3 sm:$0xff] }
 0x335   : > { %v8918_v56 = vpop.permute.xlu1 %2327 }
 0x336   : > { %v8920_v47 = vpop.permute.xlu0 %2257  ;;  %v8970_v17 = vpop.f32.mrf.mxu0 }
 0x337   : > { %2571 = vrot.lane.b32.xlu1 %v6779_v44, %s6925_s21 }
 0x338   : > { %2501 = vrot.lane.b32.xlu0 %v6086_v1, %s6924_s17  ;;  %v8981_v28 = vpop.f32.mrf.mxu0 }
 0x339   : > { %v2636_v24 = vpop.permute.xlu1 %2635 }
 0x33a   : > { %v8927_v5 = vpop.permute.xlu0 %2565  ;;  %v2939_v14 = vsel %vm1679_vm7, %v2915_v50, %v2636_v24  ;;  %v8994_v44 = vpop.f32.mrf.mxu0  ;;  %v6182_v24 = vld [vmem:[%s7041_s25 + $0x1a4] ss:$3 sm:$0xff] }
 0x33b   : > { %3668 = vrot.lane.b32.xlu1 %v6085_v23, %s6923_s29 }
 0x33c   : > { %3598 = vrot.lane.b32.xlu0 %v6776_v41, %s6922_s28  ;;  %v8957_v41 = vld [vmem:[%s7041_s25 + $0x1e3] ss:$3 sm:$0xff]  ;;  %v9000_v26 = vpop.f32.mrf.mxu0 }
 0x33d   : > { %v8941_v6 = vpop.permute.xlu1 %3662 }
 0x33e   : > { %v8943_v51 = vpop.permute.xlu0 %3424 }
 0x33f   : > { %4000 = vrot.lane.b32.xlu1 %v6204_v18, %s6927_s23 }
 0x340   : > { %3906 = vrot.lane.b32.xlu0 %v6108_v55, %s6926_s22  ;;  %v6781_v55 = vld [vmem:[%s7041_s25 + $0x1e1] ss:$3 sm:$0xff] }
 0x341   : > { %v3995_v23 = vpop.permute.xlu1 %3994 }
 0x342   : > { %v8960_v49 = vpop.permute.xlu0 %3756  ;;  %v4227_v25 = vsel %vm1704_vm8, %v4203_v38, %v3995_v23  ;;  %v6786_v38 = vld [vmem:[%s7041_s25 + $0x201] ss:$3 sm:$0xff]  ;;  %v2820_v23 = vsel %vm1554_vm2, %v2796_v11, %v8733_v58  ;;  %v6787_v58 = vld [vmem:[%s7041_s25 + $0x1e2] ss:$3 sm:$0xff] }
 0x343   : > { %2335 = vrot.lane.b32.xlu1 %v6781_v55, %s6922_s28  ;;  %6484 = vmatmul.mubr.msk.f32.gmra.mxu0 %vm1733_vm9, %v4227_v25  ;;  %v6109_v25 = vld [vmem:[%s7041_s25 + $0x1c3] ss:$3 sm:$0xff]  ;;  %v2844_v27 = vsel %vm1579_vm3, %v2820_v23, %v8782_v45  ;;  %v6789_v11 = vld [vmem:[%s7041_s25 + $0x202] ss:$3 sm:$0xff] }
 0x344   : > { %2265 = vrot.lane.b32.xlu0 %v8957_v41, %s6921_s27  ;;  %v2868_v62 = vsel %vm1604_vm4, %v2844_v27, %v8839_v40  ;;  %v6110_v23 = vld [vmem:[%s7041_s25 + $0x1e3] ss:$3 sm:$0xff] }
 0x345   : > { %v8977_v12 = vpop.permute.xlu1 %2399  ;;  %v2892_v36 = vsel %vm1629_vm5, %v2868_v62, %v8883_v13  ;;  %v6087_v27 = vld [vmem:[%s7041_s25 + $0x1e3] ss:$3 sm:$0xff] }
 0x346   : > { %v8979_v2 = vpop.permute.xlu0 %2329  ;;  %v2916_v45 = vsel %vm1654_vm6, %v2892_v36, %v8927_v5  ;;  %v6183_v5 = vld [vmem:[%s7041_s25 + $0x1c4] ss:$3 sm:$0xff] }
 0x347   : > { %2643 = vrot.lane.b32.xlu1 %v6782_v35, %s6926_s22 }
 0x348   : > { %2573 = vrot.lane.b32.xlu0 %v6783_v34, %s6925_s21 }
 0x349   : > { %v2732_v61 = vpop.permute.xlu1 %2731 }
 0x34a   : > { %v2638_v9 = vpop.permute.xlu0 %2637  ;;  %v2963_v53 = vsel %vm1704_vm8, %v2939_v14, %v2732_v61 }
 0x34b   : > { %3670 = vrot.lane.b32.xlu1 %v6086_v1, %s6923_s29  ;;  %6442 = vmatprep.mubr.msk.f32.mxu1 %vm1733_vm9, %v2963_v53  ;;  %v9011_v1 = vpop.f32.mrf.mxu0  ;;  %v2940_v34 = vsel %vm1679_vm7, %v2916_v45, %v2638_v9  ;;  %v6161_v45 = vld [vmem:[%s7041_s25 + $0x1e4] ss:$3 sm:$0xff] }
 0x34c   : > { %3432 = vrot.lane.b32.xlu0 %v8906_v4, %s6920_s26 }
 0x34d   : > { %v9005_v63 = vpop.permute.xlu1 %3520  ;;  %v9017_v7 = vpop.f32.mrf.mxu0 }
 0x34e   : > { %v9007_v19 = vpop.permute.xlu0 %3426 }
 0x34f   : > { %4002 = vrot.lane.b32.xlu1 %v6205_v15, %s6927_s23  ;;  %v9035_v48 = vpop.f32.mrf.mxu0 }
 0x350   : > { %3764 = vrot.lane.b32.xlu0 %v6182_v24, %s6924_s17 }
 0x351   : > { %v9013_v18 = vpop.permute.xlu1 %3828  ;;  %v9044_v31 = vpop.f32.mrf.mxu0 }
 0x352   : > { %v9015_v4 = vpop.permute.xlu0 %3758 }
 0x353   : > { %2407 = vrot.lane.b32.xlu1 %v6785_v20, %s6923_s29  ;;  %v9056_v13 = vpop.f32.mrf.mxu0 }
 0x354   : > { %2337 = vrot.lane.b32.xlu0 %v6786_v38, %s6922_s28 }
 0x355   : > { %v9031_v32 = vpop.permute.xlu1 %2401  ;;  %v9064_v53 = vpop.f32.mrf.mxu0 }
 0x356   : > { %v9033_v55 = vpop.permute.xlu0 %2163 }
 0x357   : > { %2739 = vrot.lane.b32.xlu1 %v6109_v25, %s6927_s23  ;;  %v9070_v24 = vpop.f32.mrf.mxu0 }
 0x358   : > { %2645 = vrot.lane.b32.xlu0 %v6787_v58, %s6926_s22  ;;  %10658 = vst [vmem:[#allocation20_spill] sm:$0xff] %v9070_v24 }
 0x359   : > { %v2734_v50 = vpop.permute.xlu1 %2733  ;;  %v9076_v38 = vpop.f32.mrf.mxu0 }
 0x35a   : > { %v9050_v40 = vpop.permute.xlu0 %2495  ;;  %v2964_v14 = vsel %vm1704_vm8, %v2940_v34, %v2734_v50  ;;  %10659 = vst [vmem:[#allocation38_spill] sm:$0xff] %v9076_v38 }
 0x35b   : > { %3528 = vrot.lane.b32.xlu1 %v6160_v57, %s6921_s27  ;;  %6443 = vmatmul.mubr.msk.f32.gmra.mxu1 %vm1733_vm9, %v2964_v14  ;;  %v9086_v36 = vpop.f32.mrf.mxu0  ;;  %v4060_v14 = vsel %vm1529_vm1, %v8363_v59, %v8752_v54 }
 0x35c   : > { %3434 = vrot.lane.b32.xlu0 %v8957_v41, %s6920_s26  ;;  %10660 = vst [vmem:[#allocation52_spill] sm:$0xff] %v9086_v36  ;;  %v6792_v36 = vld [vmem:[%s7041_s25 + $0x141] ss:$3 sm:$0xff] }
 0x35d   : > { %v9060_v61 = vpop.permute.xlu1 %3592  ;;  %v9093_v50 = vpop.f32.mrf.mxu0 }
 0x35e   : > { %v9062_v9 = vpop.permute.xlu0 %3522  ;;  %10661 = vst [vmem:[#allocation6_spill] sm:$0xff] %v9093_v50 }
 0x35f   : > { %3836 = vrot.lane.b32.xlu1 %v6782_v35, %s6925_s21  ;;  %v9108_v50 = vpop.f32.mrf.mxu0 }
 0x360   : > { %3766 = vrot.lane.b32.xlu0 %v6183_v5, %s6924_s17  ;;  %v4084_v5 = vsel %vm1554_vm2, %v4060_v14, %v8801_v39  ;;  %10662 = vst [vmem:[#allocation19_spill] sm:$0xff] %v9108_v50 }
 0x361   : > { %v3901_v15 = vpop.permute.xlu1 %3900  ;;  %v9116_v39 = vpop.f32.mrf.mxu0 }
 0x362   : > { %v9068_v41 = vpop.permute.xlu0 %3830  ;;  %10663 = vst [vmem:[#allocation37_spill] sm:$0xff] %v9116_v39  ;;  %v6206_v39 = vld [vmem:[%s7041_s25 + $0x1c4] ss:$3 sm:$0xff] }
 0x363   : > { %2409 = vrot.lane.b32.xlu1 %v6788_v37, %s6923_s29 }
 0x364   : > { %2171 = vrot.lane.b32.xlu0 %v6789_v11, %s6920_s26  ;;  %v4108_v11 = vsel %vm1579_vm3, %v4084_v5, %v8862_v43 }
 0x365   : > { %v9080_v62 = vpop.permute.xlu1 %2259  ;;  %v4132_v59 = vsel %vm1604_vm4, %v4108_v11, %v8894_v0 }
 0x366   : > { %v9082_v35 = vpop.permute.xlu0 %2165  ;;  %v4156_v54 = vsel %vm1629_vm5, %v4132_v59, %v8960_v49  ;;  %v6790_v49 = vld [vmem:[%s7041_s25 + $0x222] ss:$3 sm:$0xff]  ;;  %v6791_v59 = vld [vmem:[%s7041_s25 + $0x201] ss:$3 sm:$0xff] }
 0x367   : > { %2741 = vrot.lane.b32.xlu1 %v6110_v23, %s6927_s23  ;;  %v4180_v43 = vsel %vm1654_vm6, %v4156_v54, %v9013_v18  ;;  %v6432_v54 = vpop.f32.mrf.mxu1 }
 0x368   : > { %2503 = vrot.lane.b32.xlu0 %v6087_v27, %s6924_s17 }
 0x369   : > { %v9089_v57 = vpop.permute.xlu1 %2567 }
 0x36a   : > { %v9091_v34 = vpop.permute.xlu0 %2497 }
 0x36b   : > { %3600 = vrot.lane.b32.xlu1 %v6785_v20, %s6922_s28  ;;  %v9121_v20 = vld [vmem:[%s7041_s25 + $0x203] ss:$3 sm:$0xff] }
 0x36c   : > { %3530 = vrot.lane.b32.xlu0 %v6161_v45, %s6921_s27  ;;  %v4204_v45 = vsel %vm1679_vm7, %v4180_v43, %v3901_v15 }
 0x36d   : > { %v9104_v46 = vpop.permute.xlu1 %3664 }
 0x36e   : > { %v9106_v38 = vpop.permute.xlu0 %3594 }
 0x36f   : > { %3908 = vrot.lane.b32.xlu1 %v6109_v25, %s6926_s22  ;;  %v9129_v25 = vpop.f32.mrf.mxu0 }
 0x370   : > { %3838 = vrot.lane.b32.xlu0 %v6787_v58, %s6925_s21  ;;  %10664 = vst [vmem:[#allocation51_spill] sm:$0xff] %v9129_v25  ;;  %v9133_v58 = vld [vmem:[%s7041_s25 + $0x203] ss:$3 sm:$0xff] }
 0x371   : > { %v3997_v14 = vpop.permute.xlu1 %3996  ;;  %v9139_v11 = vpop.f32.mrf.mxu0 }
 0x372   : > { %v3903_v0 = vpop.permute.xlu0 %3902  ;;  %v4228_v5 = vsel %vm1704_vm8, %v4204_v45, %v3997_v14  ;;  %10665 = vst [vmem:[#allocation23_spill] sm:$0xff] %v9139_v11 }
 0x373   : > { %2267 = vrot.lane.b32.xlu1 %v9121_v20, %s6921_s27  ;;  %6486 = vmatprep.mubr.msk.f32.mxu0 %vm1733_vm9, %v4228_v5  ;;  %v9147_v14 = vpop.f32.mrf.mxu0  ;;  %v4061_v5 = vsel %vm1529_vm1, %v8405_v33, %v8803_v42 }
 0x374   : > { %2173 = vrot.lane.b32.xlu0 %v6790_v49, %s6920_s26  ;;  %10666 = vst [vmem:[#allocation8_spill] sm:$0xff] %v9147_v14  ;;  %v4085_v49 = vsel %vm1554_vm2, %v4061_v5, %v8864_v60 }
 0x375   : > { %v9135_v18 = vpop.permute.xlu1 %2331  ;;  %v6476_v11 = vpop.f32.mrf.mxu0  ;;  %v4109_v25 = vsel %vm1579_vm3, %v4085_v49, %v8896_v3 }
 0x376   : > { %v9137_v15 = vpop.permute.xlu0 %2261  ;;  %v4133_v33 = vsel %vm1604_vm4, %v4109_v25, %v8941_v6 }
 0x377   : > { %2575 = vrot.lane.b32.xlu1 %v6791_v59, %s6925_s21  ;;  %v3117_v59 = vpop.f32.mrf.mxu1  ;;  %v4382_v60 = vpop.f32.mrf.mxu0 }
 0x378   : > { %2505 = vrot.lane.b32.xlu0 %v9133_v58, %s6924_s17  ;;  %v3236_v5 = vmax.f32 %v8925_v52, %v3117_v59 }
 0x379   : > { %v2640_v43 = vpop.permute.xlu1 %2639  ;;  %v6435_v42 = vpop.f32.mrf.mxu1 }
 0x37a   : > { %v9145_v45 = vpop.permute.xlu0 %2569  ;;  %v4501_v24 = vmax.f32 %v3236_v5, %v4382_v60 }
 0x37b   : > { %3672 = vrot.lane.b32.xlu1 %v6087_v27, %s6923_s29  ;;  %v9172_v27 = vld [vmem:[%s7041_s25 + $0x223] ss:$3 sm:$0xff] }
 0x37c   : > { %3602 = vrot.lane.b32.xlu0 %v6788_v37, %s6922_s28  ;;  %v4157_v37 = vsel %vm1629_vm5, %v4133_v33, %v9015_v4  ;;  %v2797_v4 = vsel %vm1529_vm1, %v6792_v36, %v8841_v8  ;;  %v3237_v33 = vmax.f32 %v8914_v21, %v6432_v54 }
 0x37d   : > { %v9159_v14 = vpop.permute.xlu1 %3666  ;;  %v4181_v3 = vsel %vm1654_vm6, %v4157_v37, %v9068_v41  ;;  %v3239_v41 = vmax.f32 %v8929_v22, %v6435_v42  ;;  %v6793_v37 = vld [vmem:[%s7041_s25 + $0x221] ss:$3 sm:$0xff]  ;;  %v2821_v52 = vsel %vm1554_vm2, %v2797_v4, %v8874_v10 }
 0x37e   : > { %v9161_v50 = vpop.permute.xlu0 %3428  ;;  %v4205_v49 = vsel %vm1679_vm7, %v4181_v3, %v3903_v0  ;;  %v2845_v21 = vsel %vm1579_vm3, %v2821_v52, %v8918_v56  ;;  %v4502_v36 = vmax.f32 %v3237_v33, %v6476_v11  ;;  %v6794_v56 = vld [vmem:[%s7041_s25 + $0x202] ss:$3 sm:$0xff] }
 0x37f   : > { %4004 = vrot.lane.b32.xlu1 %v6206_v39, %s6927_s23  ;;  %v3127_v39 = vpop.f32.mrf.mxu1  ;;  %v2869_v42 = vsel %vm1604_vm4, %v2845_v21, %v8977_v12  ;;  %v9213_v12 = vld [vmem:[%s10524_s2] ss:$0 sm:$0xff]  ;;  %v6798_v21 = vld [vmem:[%s7041_s25 + $0x241] ss:$3 sm:$0xff] }
 0x380   : > { %3910 = vrot.lane.b32.xlu0 %v6110_v23, %s6926_s22  ;;  %v3238_v22 = vmax.f32 %v8945_v30, %v3127_v39  ;;  %v4525_v60 = vmax.f32 %v4501_v24, %v4502_v36  ;;  %v2893_v3 = vsel %vm1629_vm5, %v2869_v42, %v9050_v40  ;;  %v6795_v30 = vld [vmem:[%s7041_s25 + $0x221] ss:$3 sm:$0xff] }
 0x381   : > { %v3999_v6 = vpop.permute.xlu1 %3998  ;;  %v2917_v11 = vsel %vm1654_vm6, %v2893_v3, %v9089_v57  ;;  %v6207_v57 = vld [vmem:[%s7041_s25 + $0x1e4] ss:$3 sm:$0xff] }
 0x382   : > { %v9176_v25 = vpop.permute.xlu0 %3760  ;;  %v4229_v23 = vsel %vm1704_vm8, %v4205_v49, %v3999_v6  ;;  %v2941_v24 = vsel %vm1679_vm7, %v2917_v11, %v2640_v43  ;;  %v6184_v43 = vld [vmem:[%s7041_s25 + $0x1e4] ss:$3 sm:$0xff] }
 0x383   : > { %2339 = vrot.lane.b32.xlu1 %v6793_v37, %s6922_s28  ;;  %v6479_v8 = vpop.f32.mrf.mxu0  ;;  %6487 = vmatmul.mubr.msk.f32.gmra.mxu0 %vm1733_vm9, %v4229_v23  ;;  %v6796_v37 = vld [vmem:[%s7041_s25 + $0x161] ss:$3 sm:$0xff] }
 0x384   : > { %2269 = vrot.lane.b32.xlu0 %v9172_v27, %s6921_s27  ;;  %v9194_v0 = vmax.f32 %v3239_v41, %v6479_v8  ;;  %v2798_v52 = vsel %vm1529_vm1, %v6796_v37, %v8876_v29  ;;  %v6797_v8 = vld [vmem:[%s7041_s25 + $0x222] ss:$3 sm:$0xff] }
 0x385   : > { %v9196_v54 = vpop.permute.xlu1 %2403  ;;  %v4392_v10 = vpop.f32.mrf.mxu0  ;;  %v2822_v36 = vsel %vm1554_vm2, %v2798_v52, %v8920_v47 }
 0x386   : > { %v9198_v59 = vpop.permute.xlu0 %2333  ;;  %v4503_v5 = vmax.f32 %v3238_v22, %v4392_v10  ;;  %v6111_v22 = vld [vmem:[%s7041_s25 + $0x203] ss:$3 sm:$0xff]  ;;  %v2846_v42 = vsel %vm1579_vm3, %v2822_v36, %v8979_v2  ;;  %v6162_v2 = vld [vmem:[%s7041_s25 + $0x204] ss:$3 sm:$0xff] }
 0x387   : > { %2647 = vrot.lane.b32.xlu1 %v6794_v56, %s6926_s22  ;;  %v2870_v29 = vsel %vm1604_vm4, %v2846_v42, %v9031_v32 }
 0x388   : > { %2577 = vrot.lane.b32.xlu0 %v6795_v30, %s6925_s21  ;;  %v4533_v40 = vmax.f32 %v4525_v60, %v4503_v5  ;;  %v2894_v3 = vsel %vm1629_vm5, %v2870_v29, %v9091_v34  ;;  %v6799_v5 = vld [vmem:[%s7041_s25 + $0x222] ss:$3 sm:$0xff]  ;;  %v6185_v34 = vld [vmem:[%s7041_s25 + $0x204] ss:$3 sm:$0xff] }
 0x389   : > { %v2736_v49 = vpop.permute.xlu1 %2735  ;;  %v2918_v47 = vsel %vm1654_vm6, %v2894_v3, %v9145_v45 }
 0x38a   : > { %v2642_v6 = vpop.permute.xlu0 %2641  ;;  %v2965_v4 = vsel %vm1704_vm8, %v2941_v24, %v2736_v49  ;;  %v4548_v39 = vadd.f32 %v9213_v12, %v4533_v40 }
 0x38b   : > { %3674 = vrot.lane.b32.xlu1 %v9133_v58, %s6923_s29  ;;  %6445 = vmatprep.mubr.msk.f32.mxu1 %vm1733_vm9, %v2965_v4  ;;  %v2942_v30 = vsel %vm1679_vm7, %v2918_v47, %v2642_v6  ;;  %v6800_v4 = vld [vmem:[%s7041_s25 + $0x242] ss:$3 sm:$0xff] }
 0x38c   : > { %3436 = vrot.lane.b32.xlu0 %v9121_v20, %s6920_s26  ;;  %v4556_v23 = vmax.f32 %v4548_v39, 0.0  ;;  %v6801_v39 = vld [vmem:[%s7041_s25 + $0x242] ss:$3 sm:$0xff] }
 0x38d   : > { %v9225_v33 = vpop.permute.xlu1 %3524 }
 0x38e   : > { %v9227_v41 = vpop.permute.xlu0 %3430  ;;  %4565 = vst.msk [vmem:[#allocation2] sm:$0xff] %vm4564_vm10, %v4556_v23 }
 0x38f   : > { %4006 = vrot.lane.b32.xlu1 %v6207_v57, %s6927_s23  ;;  %v6089_v57 = vld [vmem:[%s7041_s25 + $0x223] ss:$3 sm:$0xff] }
 0x390   : > { %3768 = vrot.lane.b32.xlu0 %v6184_v43, %s6924_s17 }
 0x391   : > { %v3833_v58 = vpop.permute.xlu1 %3832 }
 0x392   : > { %v9232_v20 = vpop.permute.xlu0 %3762 }
 0x393   : > { %2411 = vrot.lane.b32.xlu1 %v6797_v8, %s6923_s29 }
 0x394   : > { %2341 = vrot.lane.b32.xlu0 %v6798_v21, %s6922_s28  ;;  %v6802_v21 = vld [vmem:[%s7041_s25 + $0x142] ss:$3 sm:$0xff] }
 0x395   : > { %v9246_v10 = vpop.permute.xlu1 %2405  ;;  %v4062_v36 = vsel %vm1529_vm1, %v6802_v21, %v8943_v51 }
 0x396   : > { %v9248_v60 = vpop.permute.xlu0 %2167  ;;  %v4086_v42 = vsel %vm1554_vm2, %v4062_v36, %v9005_v63  ;;  %v6208_v36 = vld [vmem:[%s7041_s25 + $0x204] ss:$3 sm:$0xff] }
 0x397   : > { %2743 = vrot.lane.b32.xlu1 %v6111_v22, %s6927_s23  ;;  %v4110_v29 = vsel %vm1579_vm3, %v4086_v42, %v9060_v61 }
 0x398   : > { %2649 = vrot.lane.b32.xlu0 %v6799_v5, %s6926_s22 }
 0x399   : > { %v2738_v11 = vpop.permute.xlu1 %2737 }
 0x39a   : > { %v9261_v24 = vpop.permute.xlu0 %2499  ;;  %v2966_v32 = vsel %vm1704_vm8, %v2942_v30, %v2738_v11 }
 0x39b   : > { %3532 = vrot.lane.b32.xlu1 %v6162_v2, %s6921_s27  ;;  %6446 = vmatmul.mubr.msk.f32.gmra.mxu1 %vm1733_vm9, %v2966_v32  ;;  %v4134_v2 = vsel %vm1604_vm4, %v4110_v29, %v9104_v46  ;;  %v6803_v46 = vld [vmem:[%s7041_s25 + $0x262] ss:$3 sm:$0xff] }
 0x39c   : > { %3438 = vrot.lane.b32.xlu0 %v9172_v27, %s6920_s26  ;;  %v6112_v27 = vld [vmem:[%s7041_s25 + $0x223] ss:$3 sm:$0xff]  ;;  %v4158_v51 = vsel %vm1629_vm5, %v4134_v2, %v9176_v25 }
 0x39d   : > { %v9269_v45 = vpop.permute.xlu1 %3596  ;;  %v4182_v63 = vsel %vm1654_vm6, %v4158_v51, %v3833_v58  ;;  %v6090_v25 = vld [vmem:[%s7041_s25 + $0x243] ss:$3 sm:$0xff]  ;;  %v6438_v51 = vpop.f32.mrf.mxu1 }
 0x39e   : > { %v9271_v40 = vpop.permute.xlu0 %3526 }
 0x39f   : > { %3840 = vrot.lane.b32.xlu1 %v6794_v56, %s6925_s21  ;;  %v6163_v56 = vld [vmem:[%s7041_s25 + $0x224] ss:$3 sm:$0xff] }
 0x3a0   : > { %3770 = vrot.lane.b32.xlu0 %v6185_v34, %s6924_s17 }
 0x3a1   : > { %v3905_v49 = vpop.permute.xlu1 %3904 }
 0x3a2   : > { %v3835_v6 = vpop.permute.xlu0 %3834  ;;  %v4206_v61 = vsel %vm1679_vm7, %v4182_v63, %v3905_v49 }
 0x3a3   : > { %2413 = vrot.lane.b32.xlu1 %v6800_v4, %s6923_s29 }
 0x3a4   : > { %2175 = vrot.lane.b32.xlu0 %v6801_v39, %s6920_s26  ;;  %v6805_v39 = vld [vmem:[%s7041_s25 + $0x162] ss:$3 sm:$0xff] }
 0x3a5   : > { %v9281_v43 = vpop.permute.xlu1 %2263 }
 0x3a6   : > { %v9283_v23 = vpop.permute.xlu0 %2169 }
 0x3a7   : > { %2745 = vrot.lane.b32.xlu1 %v6112_v27, %s6927_s23 }
 0x3a8   : > { %2507 = vrot.lane.b32.xlu0 %v6089_v57, %s6924_s17 }
 0x3a9   : > { %v9288_v37 = vpop.permute.xlu1 %2571 }
 0x3aa   : > { %v9290_v52 = vpop.permute.xlu0 %2501 }
 0x3ab   : > { %3604 = vrot.lane.b32.xlu1 %v6797_v8, %s6922_s28  ;;  %v9313_v8 = vld [vmem:[%s7041_s25 + $0x243] ss:$3 sm:$0xff] }
 0x3ac   : > { %3534 = vrot.lane.b32.xlu0 %v6163_v56, %s6921_s27  ;;  %v4063_v56 = vsel %vm1529_vm1, %v6805_v39, %v9007_v19 }
 0x3ad   : > { %v9301_v3 = vpop.permute.xlu1 %3668  ;;  %v4087_v21 = vsel %vm1554_vm2, %v4063_v56, %v9062_v9 }
 0x3ae   : > { %v9303_v47 = vpop.permute.xlu0 %3598  ;;  %v4111_v42 = vsel %vm1579_vm3, %v4087_v21, %v9106_v38 }
 0x3af   : > { %3912 = vrot.lane.b32.xlu1 %v6111_v22, %s6926_s22  ;;  %v4135_v19 = vsel %vm1604_vm4, %v4111_v42, %v9159_v14 }
 0x3b0   : > { %3842 = vrot.lane.b32.xlu0 %v6799_v5, %s6925_s21  ;;  %v6804_v5 = vld [vmem:[%s7041_s25 + $0x241] ss:$3 sm:$0xff] }
 0x3b1   : > { %v4001_v30 = vpop.permute.xlu1 %4000 }
 0x3b2   : > { %v3907_v11 = vpop.permute.xlu0 %3906  ;;  %v4230_v32 = vsel %vm1704_vm8, %v4206_v61, %v4001_v30  ;;  %v3137_v30 = vpop.f32.mrf.mxu1 }
 0x3b3   : > { %2271 = vrot.lane.b32.xlu1 %v9313_v8, %s6921_s27  ;;  %6489 = vmatprep.mubr.msk.f32.mxu0 %vm1733_vm9, %v4230_v32  ;;  %v6806_v32 = vld [vmem:[%s7041_s25 + $0x181] ss:$3 sm:$0xff] }
 0x3b4   : > { %2177 = vrot.lane.b32.xlu0 %v6803_v46, %s6920_s26  ;;  %v6807_v46 = vld [vmem:[%s7041_s25 + $0x261] ss:$3 sm:$0xff] }
 0x3b5   : > { %v9323_v58 = vpop.permute.xlu1 %2335 }
 0x3b6   : > { %v9325_v22 = vpop.permute.xlu0 %2265 }
 0x3b7   : > { %2579 = vrot.lane.b32.xlu1 %v6804_v5, %s6925_s21  ;;  %v3240_v5 = vmax.f32 %v8970_v17, %v3137_v30  ;;  %v6809_v17 = vld [vmem:[%s7041_s25 + $0x261] ss:$3 sm:$0xff] }
 0x3b8   : > { %2509 = vrot.lane.b32.xlu0 %v6090_v25, %s6924_s17 }
 0x3b9   : > { %v2644_v34 = vpop.permute.xlu1 %2643 }
 0x3ba   : > { %v9330_v49 = vpop.permute.xlu0 %2573 }
 0x3bb   : > { %3676 = vrot.lane.b32.xlu1 %v6089_v57, %s6923_s29  ;;  %v9354_v57 = vld [vmem:[%s7041_s25 + $0x263] ss:$3 sm:$0xff] }
 0x3bc   : > { %3606 = vrot.lane.b32.xlu0 %v6800_v4, %s6922_s28  ;;  %v4159_v4 = vsel %vm1629_vm5, %v4135_v19, %v9232_v20  ;;  %v2799_v20 = vsel %vm1529_vm1, %v6806_v32, %v9033_v55  ;;  %v6808_v19 = vld [vmem:[%s7041_s25 + $0x242] ss:$3 sm:$0xff]  ;;  %v6810_v32 = vld [vmem:[%s7041_s25 + $0x1a1] ss:$3 sm:$0xff] }
 0x3bd   : > { %v9342_v29 = vpop.permute.xlu1 %3670  ;;  %v4183_v9 = vsel %vm1654_vm6, %v4159_v4, %v3835_v6  ;;  %v2823_v6 = vsel %vm1554_vm2, %v2799_v20, %v9080_v62  ;;  %v3241_v62 = vmax.f32 %v8953_v16, %v6438_v51  ;;  %v2800_v20 = vsel %vm1529_vm1, %v6810_v32, %v9082_v35 }
 0x3be   : > { %v9344_v2 = vpop.permute.xlu0 %3432  ;;  %v4207_v38 = vsel %vm1679_vm7, %v4183_v9, %v3907_v11  ;;  %v2847_v11 = vsel %vm1579_vm3, %v2823_v6, %v9135_v18  ;;  %v6812_v6 = vld [vmem:[%s7041_s25 + $0x281] ss:$3 sm:$0xff] }
 0x3bf   : > { %4008 = vrot.lane.b32.xlu1 %v6208_v36, %s6927_s23  ;;  %v2871_v56 = vsel %vm1604_vm4, %v2847_v11, %v9196_v54  ;;  %v6113_v11 = vld [vmem:[%s7041_s25 + $0x243] ss:$3 sm:$0xff] }
 0x3c0   : > { %3914 = vrot.lane.b32.xlu0 %v6112_v27, %s6926_s22  ;;  %v2895_v36 = vsel %vm1629_vm5, %v2871_v56, %v9261_v24 }
 0x3c1   : > { %v4003_v63 = vpop.permute.xlu1 %4002  ;;  %v2919_v18 = vsel %vm1654_vm6, %v2895_v36, %v9288_v37  ;;  %v6209_v37 = vld [vmem:[%s7041_s25 + $0x224] ss:$3 sm:$0xff] }
 0x3c2   : > { %v9357_v61 = vpop.permute.xlu0 %3764  ;;  %v4231_v14 = vsel %vm1704_vm8, %v4207_v38, %v4003_v63  ;;  %v2943_v54 = vsel %vm1679_vm7, %v2919_v18, %v2644_v34  ;;  %v6186_v34 = vld [vmem:[%s7041_s25 + $0x224] ss:$3 sm:$0xff] }
 0x3c3   : > { %2343 = vrot.lane.b32.xlu1 %v6807_v46, %s6922_s28  ;;  %v6482_v27 = vpop.f32.mrf.mxu0  ;;  %6490 = vmatmul.mubr.msk.f32.gmra.mxu0 %vm1733_vm9, %v4231_v14  ;;  %v6811_v46 = vld [vmem:[%s7041_s25 + $0x262] ss:$3 sm:$0xff] }
 0x3c4   : > { %2273 = vrot.lane.b32.xlu0 %v9354_v57, %s6921_s27  ;;  %v4506_v4 = vmax.f32 %v3241_v62, %v6482_v27  ;;  %v2824_v27 = vsel %vm1554_vm2, %v2800_v20, %v9137_v15  ;;  %v6813_v62 = vld [vmem:[%s7041_s25 + $0x262] ss:$3 sm:$0xff] }
 0x3c5   : > { %v9373_v55 = vpop.permute.xlu1 %2407  ;;  %v4402_v21 = vpop.f32.mrf.mxu0 }
 0x3c6   : > { %v9375_v39 = vpop.permute.xlu0 %2337  ;;  %v4505_v42 = vmax.f32 %v3240_v5, %v4402_v21  ;;  %v2848_v5 = vsel %vm1579_vm3, %v2824_v27, %v9198_v59  ;;  %v6164_v59 = vld [vmem:[%s7041_s25 + $0x244] ss:$3 sm:$0xff] }
 0x3c7   : > { %2651 = vrot.lane.b32.xlu1 %v6808_v19, %s6926_s22  ;;  %v2872_v35 = vsel %vm1604_vm4, %v2848_v5, %v9246_v10 }
 0x3c8   : > { %2581 = vrot.lane.b32.xlu0 %v6809_v17, %s6925_s21  ;;  %v4526_v9 = vmax.f32 %v9194_v0, %v4505_v42  ;;  %v2896_v36 = vsel %vm1629_vm5, %v2872_v35, %v9290_v52  ;;  %v6187_v52 = vld [vmem:[%s7041_s25 + $0x244] ss:$3 sm:$0xff] }
 0x3c9   : > { %v2740_v24 = vpop.permute.xlu1 %2739  ;;  %v2920_v15 = vsel %vm1654_vm6, %v2896_v36, %v9330_v49 }
 0x3ca   : > { %v2646_v38 = vpop.permute.xlu0 %2645  ;;  %v2967_v16 = vsel %vm1704_vm8, %v2943_v54, %v2740_v24  ;;  %v4534_v51 = vmax.f32 %v4526_v9, %v4506_v4  ;;  %v6814_v24 = vld [vmem:[%s7041_s25 + $0x282] ss:$3 sm:$0xff] }
 0x3cb   : > { %3678 = vrot.lane.b32.xlu1 %v6090_v25, %s6923_s29  ;;  %6448 = vmatprep.mubr.msk.f32.mxu1 %vm1733_vm9, %v2967_v16  ;;  %v2944_v42 = vsel %vm1679_vm7, %v2920_v15, %v2646_v38  ;;  %v9451_v38 = vld [vmem:[%s7041_s25 + $0x282] ss:$3 sm:$0xff]  ;;  %v6091_v16 = vld [vmem:[%s7041_s25 + $0x263] ss:$3 sm:$0xff] }
 0x3cc   : > { %3440 = vrot.lane.b32.xlu0 %v9313_v8, %s6920_s26  ;;  %v4549_v63 = vadd.f32 %v9213_v12, %v4534_v51 }
 0x3cd   : > { %v9398_v0 = vpop.permute.xlu1 %3528 }
 0x3ce   : > { %v9400_v30 = vpop.permute.xlu0 %3434  ;;  %v4557_v14 = vmax.f32 %v4549_v63, 0.0 }
 0x3cf   : > { %4010 = vrot.lane.b32.xlu1 %v6209_v37, %s6927_s23 }
 0x3d0   : > { %3772 = vrot.lane.b32.xlu0 %v6186_v34, %s6924_s17  ;;  %4566 = vst.msk [vmem:[#allocation2 + $0x10] sm:$0xff] %vm4564_vm10, %v4557_v14  ;;  %v6816_v14 = vld [vmem:[%s7041_s25 + $0x182] ss:$3 sm:$0xff] }
 0x3d1   : > { %v3837_v8 = vpop.permute.xlu1 %3836  ;;  %v4064_v32 = vsel %vm1529_vm1, %v6816_v14, %v9161_v50 }
 0x3d2   : > { %v9405_v25 = vpop.permute.xlu0 %3766  ;;  %v4088_v20 = vsel %vm1554_vm2, %v4064_v32, %v9225_v33 }
 0x3d3   : > { %2415 = vrot.lane.b32.xlu1 %v6811_v46, %s6923_s29 }
 0x3d4   : > { %2345 = vrot.lane.b32.xlu0 %v6812_v6, %s6922_s28  ;;  %v4112_v6 = vsel %vm1579_vm3, %v4088_v20, %v9269_v45 }
 0x3d5   : > { %v9419_v56 = vpop.permute.xlu1 %2409  ;;  %v4136_v35 = vsel %vm1604_vm4, %v4112_v6, %v9301_v3  ;;  %v9493_v3 = vld [vmem:[%s7041_s25 + $0x2a2] ss:$3 sm:$0xff] }
 0x3d6   : > { %v9421_v21 = vpop.permute.xlu0 %2171  ;;  %v4160_v50 = vsel %vm1629_vm5, %v4136_v35, %v9357_v61  ;;  %v6092_v61 = vld [vmem:[%s7041_s25 + $0x283] ss:$3 sm:$0xff] }
 0x3d7   : > { %2747 = vrot.lane.b32.xlu1 %v6113_v11, %s6927_s23  ;;  %v4184_v33 = vsel %vm1654_vm6, %v4160_v50, %v3837_v8 }
 0x3d8   : > { %2653 = vrot.lane.b32.xlu0 %v6813_v62, %s6926_s22 }
 0x3d9   : > { %v2742_v17 = vpop.permute.xlu1 %2741 }
 0x3da   : > { %v9434_v18 = vpop.permute.xlu0 %2503  ;;  %v2968_v10 = vsel %vm1704_vm8, %v2944_v42, %v2742_v17 }
 0x3db   : > { %3536 = vrot.lane.b32.xlu1 %v6164_v59, %s6921_s27  ;;  %6449 = vmatmul.mubr.msk.f32.gmra.mxu1 %vm1733_vm9, %v2968_v10  ;;  %v6819_v10 = vld [vmem:[%s7041_s25 + $0x1a2] ss:$3 sm:$0xff] }
 0x3dc   : > { %3442 = vrot.lane.b32.xlu0 %v9354_v57, %s6920_s26  ;;  %v6114_v57 = vld [vmem:[%s7041_s25 + $0x263] ss:$3 sm:$0xff] }
 0x3dd   : > { %v9442_v49 = vpop.permute.xlu1 %3600 }
 0x3de   : > { %v9444_v54 = vpop.permute.xlu0 %3530 }
 0x3df   : > { %3844 = vrot.lane.b32.xlu1 %v6808_v19, %s6925_s21  ;;  %v6165_v19 = vld [vmem:[%s7041_s25 + $0x264] ss:$3 sm:$0xff] }
 0x3e0   : > { %3774 = vrot.lane.b32.xlu0 %v6187_v52, %s6924_s17  ;;  %v4065_v52 = vsel %vm1529_vm1, %v6819_v10, %v9227_v41 }
 0x3e1   : > { %v3909_v4 = vpop.permute.xlu1 %3908 }
 0x3e2   : > { %v3839_v9 = vpop.permute.xlu0 %3838  ;;  %v4208_v45 = vsel %vm1679_vm7, %v4184_v33, %v3909_v4  ;;  %v4089_v4 = vsel %vm1554_vm2, %v4065_v52, %v9271_v40  ;;  %v6821_v33 = vld [vmem:[%s7041_s25 + $0x2a1] ss:$3 sm:$0xff] }
 0x3e3   : > { %2417 = vrot.lane.b32.xlu1 %v6814_v24, %s6923_s29  ;;  %v4113_v14 = vsel %vm1579_vm3, %v4089_v4, %v9303_v47  ;;  %v6188_v4 = vld [vmem:[%s7041_s25 + $0x264] ss:$3 sm:$0xff] }
 0x3e4   : > { %2179 = vrot.lane.b32.xlu0 %v9451_v38, %s6920_s26  ;;  %v4137_v41 = vsel %vm1604_vm4, %v4113_v14, %v9342_v29  ;;  %v6820_v29 = vld [vmem:[%s7041_s25 + $0x1c1] ss:$3 sm:$0xff] }
 0x3e5   : > { %v9457_v51 = vpop.permute.xlu1 %2267 }
 0x3e6   : > { %v9459_v37 = vpop.permute.xlu0 %2173 }
 0x3e7   : > { %2749 = vrot.lane.b32.xlu1 %v6114_v57, %s6927_s23 }
 0x3e8   : > { %2511 = vrot.lane.b32.xlu0 %v6091_v16, %s6924_s17 }
 0x3e9   : > { %v9464_v34 = vpop.permute.xlu1 %2575 }
 0x3ea   : > { %v9466_v63 = vpop.permute.xlu0 %2505 }
 0x3eb   : > { %3608 = vrot.lane.b32.xlu1 %v6811_v46, %s6922_s28  ;;  %v6069_v46 = vld [vmem:[%s7041_s25 + $0x283] ss:$3 sm:$0xff] }
 0x3ec   : > { %3538 = vrot.lane.b32.xlu0 %v6165_v19, %s6921_s27  ;;  %v6210_v19 = vld [vmem:[%s7041_s25 + $0x244] ss:$3 sm:$0xff] }
 0x3ed   : > { %v9477_v27 = vpop.permute.xlu1 %3672 }
 0x3ee   : > { %v9479_v5 = vpop.permute.xlu0 %3602 }
 0x3ef   : > { %3916 = vrot.lane.b32.xlu1 %v6113_v11, %s6926_s22 }
 0x3f0   : > { %3846 = vrot.lane.b32.xlu0 %v6813_v62, %s6925_s21  ;;  %v6818_v62 = vld [vmem:[%s7041_s25 + $0x281] ss:$3 sm:$0xff] }
 0x3f1   : > { %v4005_v36 = vpop.permute.xlu1 %4004 }
 0x3f2   : > { %v3911_v15 = vpop.permute.xlu0 %3910  ;;  %v4232_v59 = vsel %vm1704_vm8, %v4208_v45, %v4005_v36 }
 0x3f3   : > { %2275 = vrot.lane.b32.xlu1 %v6069_v46, %s6921_s27  ;;  %6492 = vmatprep.mubr.msk.f32.mxu0 %vm1733_vm9, %v4232_v59  ;;  %v6822_v59 = vld [vmem:[%s7041_s25 + $0x282] ss:$3 sm:$0xff] }
 0x3f4   : > { %2181 = vrot.lane.b32.xlu0 %v9493_v3, %s6920_s26 }
 0x3f5   : > { %v9499_v8 = vpop.permute.xlu1 %2339 }
 0x3f6   : > { %v9501_v11 = vpop.permute.xlu0 %2269 }
 0x3f7   : > { %2583 = vrot.lane.b32.xlu1 %v6818_v62, %s6925_s21 }
 0x3f8   : > { %2513 = vrot.lane.b32.xlu0 %v6092_v61, %s6924_s17 }
 0x3f9   : > { %v2648_v42 = vpop.permute.xlu1 %2647 }
 0x3fa   : > { %v9506_v17 = vpop.permute.xlu0 %2577 }
 0x3fb   : > { %3680 = vrot.lane.b32.xlu1 %v6091_v16, %s6923_s29  ;;  %v4161_v16 = vsel %vm1629_vm5, %v4137_v41, %v9405_v25  ;;  %v2801_v25 = vsel %vm1529_vm1, %v6820_v29, %v9248_v60  ;;  %v6825_v41 = vld [vmem:[%s7041_s25 + $0x2a2] ss:$3 sm:$0xff] }
 0x3fc   : > { %3610 = vrot.lane.b32.xlu0 %v6814_v24, %s6922_s28  ;;  %v4185_v40 = vsel %vm1654_vm6, %v4161_v16, %v3839_v9  ;;  %v6070_v24 = vld [vmem:[%s7041_s25 + $0x2a3] ss:$3 sm:$0xff]  ;;  %v2825_v9 = vsel %vm1554_vm2, %v2801_v25, %v9281_v43  ;;  %v6823_v43 = vld [vmem:[%s7041_s25 + $0x2a1] ss:$3 sm:$0xff] }
 0x3fd   : > { %v9518_v32 = vpop.permute.xlu1 %3674  ;;  %v4209_v6 = vsel %vm1679_vm7, %v4185_v40, %v3911_v15  ;;  %v6826_v16 = vld [vmem:[%s7041_s25 + $0x2c1] ss:$3 sm:$0xff] }
 0x3fe   : > { %v9520_v20 = vpop.permute.xlu0 %3436 }
 0x3ff   : > { %4012 = vrot.lane.b32.xlu1 %v6210_v19, %s6927_s23 }
 0x400   : > { %3918 = vrot.lane.b32.xlu0 %v6114_v57, %s6926_s22  ;;  %v2849_v57 = vsel %vm1579_vm3, %v2825_v9, %v9323_v58 }
 0x401   : > { %v4007_v47 = vpop.permute.xlu1 %4006  ;;  %v2873_v60 = vsel %vm1604_vm4, %v2849_v57, %v9373_v55 }
 0x402   : > { %v9531_v35 = vpop.permute.xlu0 %3768  ;;  %v4233_v50 = vsel %vm1704_vm8, %v4209_v6, %v4007_v47  ;;  %v2897_v15 = vsel %vm1629_vm5, %v2873_v60, %v9434_v18  ;;  %v6211_v18 = vld [vmem:[%s7041_s25 + $0x264] ss:$3 sm:$0xff]  ;;  %v6115_v6 = vld [vmem:[%s7041_s25 + $0x283] ss:$3 sm:$0xff] }
 0x403   : > { %2347 = vrot.lane.b32.xlu1 %v6821_v33, %s6922_s28  ;;  %6493 = vmatmul.mubr.msk.f32.gmra.mxu0 %vm1733_vm9, %v4233_v50  ;;  %v2921_v58 = vsel %vm1654_vm6, %v2897_v15, %v9464_v34  ;;  %v6827_v33 = vld [vmem:[%s7041_s25 + $0x2a2] ss:$3 sm:$0xff] }
 0x404   : > { %2277 = vrot.lane.b32.xlu0 %v6070_v24, %s6921_s27  ;;  %v2945_v62 = vsel %vm1679_vm7, %v2921_v58, %v2648_v42 }
 0x405   : > { %v9545_v45 = vpop.permute.xlu1 %2411 }
 0x406   : > { %v9547_v36 = vpop.permute.xlu0 %2341 }
 0x407   : > { %2655 = vrot.lane.b32.xlu1 %v6822_v59, %s6926_s22 }
 0x408   : > { %2585 = vrot.lane.b32.xlu0 %v6823_v43, %s6925_s21 }
 0x409   : > { %v2744_v10 = vpop.permute.xlu1 %2743 }
 0x40a   : > { %v2650_v52 = vpop.permute.xlu0 %2649  ;;  %v2969_v55 = vsel %vm1704_vm8, %v2945_v62, %v2744_v10  ;;  %v6828_v62 = vld [vmem:[%s7041_s25 + $0x2c2] ss:$3 sm:$0xff]  ;;  %v6116_v10 = vld [vmem:[%s7041_s25 + $0x2a3] ss:$3 sm:$0xff] }
 0x40b   : > { %3682 = vrot.lane.b32.xlu1 %v6092_v61, %s6923_s29  ;;  %6451 = vmatprep.mubr.msk.f32.mxu1 %vm1733_vm9, %v2969_v55  ;;  %v6824_v61 = vld [vmem:[%s7041_s25 + $0x1e1] ss:$3 sm:$0xff] }
 0x40c   : > { %3444 = vrot.lane.b32.xlu0 %v6069_v46, %s6920_s26  ;;  %v2802_v46 = vsel %vm1529_vm1, %v6824_v61, %v9283_v23 }
 0x40d   : > { %v9566_v19 = vpop.permute.xlu1 %3532  ;;  %v2826_v40 = vsel %vm1554_vm2, %v2802_v46, %v9325_v22  ;;  %v6830_v46 = vld [vmem:[%s7041_s25 + $0x1c2] ss:$3 sm:$0xff] }
 0x40e   : > { %v9568_v34 = vpop.permute.xlu0 %3438  ;;  %v2850_v47 = vsel %vm1579_vm3, %v2826_v40, %v9375_v39  ;;  %v6166_v39 = vld [vmem:[%s7041_s25 + $0x284] ss:$3 sm:$0xff] }
 0x40f   : > { %4014 = vrot.lane.b32.xlu1 %v6211_v18, %s6927_s23  ;;  %v2874_v23 = vsel %vm1604_vm4, %v2850_v47, %v9419_v56 }
 0x410   : > { %3776 = vrot.lane.b32.xlu0 %v6188_v4, %s6924_s17  ;;  %v2898_v25 = vsel %vm1629_vm5, %v2874_v23, %v9466_v63  ;;  %v6189_v63 = vld [vmem:[%s7041_s25 + $0x284] ss:$3 sm:$0xff] }
 0x411   : > { %v3841_v42 = vpop.permute.xlu1 %3840  ;;  %v2922_v22 = vsel %vm1654_vm6, %v2898_v25, %v9506_v17 }
 0x412   : > { %v9572_v14 = vpop.permute.xlu0 %3770  ;;  %v2946_v9 = vsel %vm1679_vm7, %v2922_v22, %v2650_v52  ;;  %v6093_v52 = vld [vmem:[%s7041_s25 + $0x2a3] ss:$3 sm:$0xff] }
 0x413   : > { %2419 = vrot.lane.b32.xlu1 %v6825_v41, %s6923_s29 }
 0x414   : > { %2349 = vrot.lane.b32.xlu0 %v6826_v16, %s6922_s28  ;;  %v4066_v16 = vsel %vm1529_vm1, %v6830_v46, %v9344_v2 }
 0x415   : > { %v9586_v50 = vpop.permute.xlu1 %2413  ;;  %v4090_v40 = vsel %vm1554_vm2, %v4066_v16, %v9398_v0 }
 0x416   : > { %v9588_v29 = vpop.permute.xlu0 %2175  ;;  %v4114_v47 = vsel %vm1579_vm3, %v4090_v40, %v9442_v49 }
 0x417   : > { %2751 = vrot.lane.b32.xlu1 %v6115_v6, %s6927_s23  ;;  %v4138_v22 = vsel %vm1604_vm4, %v4114_v47, %v9477_v27  ;;  %v9664_v27 = vld [vmem:[%s7041_s25 + $0x2e2] ss:$3 sm:$0xff]  ;;  %v6485_v47 = vpop.f32.mrf.mxu0 }
 0x418   : > { %2657 = vrot.lane.b32.xlu0 %v6827_v33, %s6926_s22  ;;  %v4162_v2 = vsel %vm1629_vm5, %v4138_v22, %v9531_v35  ;;  %v9670_v35 = vld [vmem:[%s7041_s25 + $0x2c3] ss:$3 sm:$0xff]  ;;  %v6212_v22 = vld [vmem:[%s7041_s25 + $0x284] ss:$3 sm:$0xff] }
 0x419   : > { %v2746_v57 = vpop.permute.xlu1 %2745  ;;  %v4186_v0 = vsel %vm1654_vm6, %v4162_v2, %v3841_v42 }
 0x41a   : > { %v9601_v60 = vpop.permute.xlu0 %2507  ;;  %v2970_v56 = vsel %vm1704_vm8, %v2946_v9, %v2746_v57 }
 0x41b   : > { %3540 = vrot.lane.b32.xlu1 %v6166_v39, %s6921_s27  ;;  %6452 = vmatmul.mubr.msk.f32.gmra.mxu1 %vm1733_vm9, %v2970_v56  ;;  %v6441_v56 = vpop.f32.mrf.mxu1 }
 0x41c   : > { %3446 = vrot.lane.b32.xlu0 %v6070_v24, %s6920_s26  ;;  %v9619_v24 = vld [vmem:[%s7041_s25 + $0x2c2] ss:$3 sm:$0xff] }
 0x41d   : > { %v9608_v17 = vpop.permute.xlu1 %3604  ;;  %v3147_v40 = vpop.f32.mrf.mxu1 }
 0x41e   : > { %v9610_v15 = vpop.permute.xlu0 %3534 }
 0x41f   : > { %3848 = vrot.lane.b32.xlu1 %v6822_v59, %s6925_s21  ;;  %v6167_v59 = vld [vmem:[%s7041_s25 + $0x2a4] ss:$3 sm:$0xff] }
 0x420   : > { %3778 = vrot.lane.b32.xlu0 %v6189_v63, %s6924_s17 }
 0x421   : > { %v3913_v43 = vpop.permute.xlu1 %3912 }
 0x422   : > { %v9614_v58 = vpop.permute.xlu0 %3842  ;;  %v4210_v49 = vsel %vm1679_vm7, %v4186_v0, %v3913_v43 }
 0x423   : > { %2421 = vrot.lane.b32.xlu1 %v6828_v62, %s6923_s29 }
 0x424   : > { %2183 = vrot.lane.b32.xlu0 %v9619_v24, %s6920_s26 }
 0x425   : > { %v9625_v55 = vpop.permute.xlu1 %2271 }
 0x426   : > { %v9627_v18 = vpop.permute.xlu0 %2177 }
 0x427   : > { %2753 = vrot.lane.b32.xlu1 %v6116_v10, %s6927_s23 }
 0x428   : > { %2515 = vrot.lane.b32.xlu0 %v6093_v52, %s6924_s17 }
 0x429   : > { %v9632_v4 = vpop.permute.xlu1 %2579 }
 0x42a   : > { %v9634_v61 = vpop.permute.xlu0 %2509 }
 0x42b   : > { %3612 = vrot.lane.b32.xlu1 %v6825_v41, %s6922_s28  ;;  %v9657_v41 = vld [vmem:[%s7041_s25 + $0x2c3] ss:$3 sm:$0xff] }
 0x42c   : > { %3542 = vrot.lane.b32.xlu0 %v6167_v59, %s6921_s27  ;;  %v6833_v59 = vld [vmem:[%s7041_s25 + $0x1e2] ss:$3 sm:$0xff] }
 0x42d   : > { %v9645_v23 = vpop.permute.xlu1 %3676  ;;  %v4067_v46 = vsel %vm1529_vm1, %v6833_v59, %v9400_v30 }
 0x42e   : > { %v9647_v25 = vpop.permute.xlu0 %3606  ;;  %v4091_v16 = vsel %vm1554_vm2, %v4067_v46, %v9444_v54  ;;  %v4412_v54 = vpop.f32.mrf.mxu0  ;;  %v6834_v46 = vld [vmem:[%s7041_s25 + $0x201] ss:$3 sm:$0xff] }
 0x42f   : > { %3920 = vrot.lane.b32.xlu1 %v6115_v6, %s6926_s22  ;;  %v4115_v2 = vsel %vm1579_vm3, %v4091_v16, %v9479_v5 }
 0x430   : > { %3850 = vrot.lane.b32.xlu0 %v6827_v33, %s6925_s21  ;;  %v6832_v33 = vld [vmem:[%s7041_s25 + $0x2c1] ss:$3 sm:$0xff]  ;;  %v4139_v30 = vsel %vm1604_vm4, %v4115_v2, %v9518_v32 }
 0x431   : > { %v4009_v39 = vpop.permute.xlu1 %4008 }
 0x432   : > { %v3915_v9 = vpop.permute.xlu0 %3914  ;;  %v4234_v57 = vsel %vm1704_vm8, %v4210_v49, %v4009_v39  ;;  %v9705_v39 = vld [vmem:[%s7041_s25 + $0x2e3] ss:$3 sm:$0xff] }
 0x433   : > { %2279 = vrot.lane.b32.xlu1 %v9657_v41, %s6921_s27  ;;  %6495 = vmatprep.mubr.msk.f32.mxu0 %vm1733_vm9, %v4234_v57  ;;  %v3242_v57 = vmax.f32 %v8994_v44, %v3147_v40 }
 0x434   : > { %2185 = vrot.lane.b32.xlu0 %v9664_v27, %s6920_s26 }
 0x435   : > { %v9672_v42 = vpop.permute.xlu1 %2343  ;;  %v4507_v2 = vmax.f32 %v3242_v57, %v4412_v54 }
 0x436   : > { %v9674_v6 = vpop.permute.xlu0 %2273 }
 0x437   : > { %2587 = vrot.lane.b32.xlu1 %v6832_v33, %s6925_s21 }
 0x438   : > { %2517 = vrot.lane.b32.xlu0 %v9670_v35, %s6924_s17 }
 0x439   : > { %v2652_v63 = vpop.permute.xlu1 %2651 }
 0x43a   : > { %v9680_v43 = vpop.permute.xlu0 %2581 }
 0x43b   : > { %3684 = vrot.lane.b32.xlu1 %v6093_v52, %s6923_s29  ;;  %v6444_v52 = vpop.f32.mrf.mxu1 }
 0x43c   : > { %3614 = vrot.lane.b32.xlu0 %v6828_v62, %s6922_s28  ;;  %v4163_v62 = vsel %vm1629_vm5, %v4139_v30, %v9572_v14  ;;  %v2803_v14 = vsel %vm1529_vm1, %v6834_v46, %v9421_v21  ;;  %v6835_v30 = vld [vmem:[%s7041_s25 + $0x2e1] ss:$3 sm:$0xff] }
 0x43d   : > { %v9692_v0 = vpop.permute.xlu1 %3678  ;;  %v4187_v5 = vsel %vm1654_vm6, %v4163_v62, %v9614_v58  ;;  %v3157_v16 = vpop.f32.mrf.mxu1  ;;  %v3245_v58 = vmax.f32 %v9000_v26, %v6444_v52  ;;  %v2827_v44 = vsel %vm1554_vm2, %v2803_v14, %v9457_v51 }
 0x43e   : > { %v9694_v49 = vpop.permute.xlu0 %3440  ;;  %v4211_v33 = vsel %vm1679_vm7, %v4187_v5, %v3915_v9  ;;  %v3244_v26 = vmax.f32 %v9011_v1, %v3157_v16  ;;  %v6837_v1 = vld [vmem:[%s7041_s25 + $0x2e1] ss:$3 sm:$0xff] }
 0x43f   : > { %4016 = vrot.lane.b32.xlu1 %v6212_v22, %s6927_s23  ;;  %v3243_v22 = vmax.f32 %v8981_v28, %v6441_v56  ;;  %v2851_v28 = vsel %vm1579_vm3, %v2827_v44, %v9499_v8  ;;  %v6836_v8 = vld [vmem:[%s7041_s25 + $0x2c2] ss:$3 sm:$0xff] }
 0x440   : > { %3922 = vrot.lane.b32.xlu0 %v6116_v10, %s6926_s22  ;;  %v2875_v62 = vsel %vm1604_vm4, %v2851_v28, %v9545_v45 }
 0x441   : > { %v4011_v32 = vpop.permute.xlu1 %4010  ;;  %v4508_v9 = vmax.f32 %v3243_v22, %v6485_v47  ;;  %v2899_v5 = vsel %vm1629_vm5, %v2875_v62, %v9601_v60 }
 0x442   : > { %v9709_v59 = vpop.permute.xlu0 %3772  ;;  %v4235_v10 = vsel %vm1704_vm8, %v4211_v33, %v4011_v32  ;;  %v2923_v47 = vsel %vm1654_vm6, %v2899_v5, %v9632_v4  ;;  %v6213_v4 = vld [vmem:[%s7041_s25 + $0x2a4] ss:$3 sm:$0xff] }
 0x443   : > { %2351 = vrot.lane.b32.xlu1 %v6835_v30, %s6922_s28  ;;  %v6488_v21 = vpop.f32.mrf.mxu0  ;;  %6496 = vmatmul.mubr.msk.f32.gmra.mxu0 %vm1733_vm9, %v4235_v10  ;;  %v4527_v54 = vmax.f32 %v4507_v2, %v4508_v9  ;;  %v2947_v33 = vsel %vm1679_vm7, %v2923_v47, %v2652_v63  ;;  %v6190_v63 = vld [vmem:[%s7041_s25 + $0x2a4] ss:$3 sm:$0xff]  ;;  %v6095_v47 = vld [vmem:[%s7041_s25 + $0x2e3] ss:$3 sm:$0xff] }
 0x444   : > { %2281 = vrot.lane.b32.xlu0 %v9705_v39, %s6921_s27  ;;  %v9727_v56 = vmax.f32 %v3245_v58, %v6488_v21  ;;  %v6839_v58 = vld [vmem:[%s7041_s25 + $0x2e2] ss:$3 sm:$0xff]  ;;  %v6840_v30 = vld [vmem:[%s7041_s25 + $0x301] ss:$3 sm:$0xff]  ;;  %v6117_v21 = vld [vmem:[%s7041_s25 + $0x2c3] ss:$3 sm:$0xff] }
 0x445   : > { %v9729_v40 = vpop.permute.xlu1 %2415  ;;  %v4422_v51 = vpop.f32.mrf.mxu0 }
 0x446   : > { %v9731_v52 = vpop.permute.xlu0 %2345  ;;  %v4509_v57 = vmax.f32 %v3244_v26, %v4422_v51  ;;  %v6841_v51 = vld [vmem:[%s7041_s25 + $0x2e2] ss:$3 sm:$0xff] }
 0x447   : > { %2659 = vrot.lane.b32.xlu1 %v6836_v8, %s6926_s22 }
 0x448   : > { %2589 = vrot.lane.b32.xlu0 %v6837_v1, %s6925_s21  ;;  %v4535_v45 = vmax.f32 %v4527_v54, %v4509_v57 }
 0x449   : > { %v2748_v32 = vpop.permute.xlu1 %2747 }
 0x44a   : > { %v2654_v46 = vpop.permute.xlu0 %2653  ;;  %v2971_v60 = vsel %vm1704_vm8, %v2947_v33, %v2748_v32  ;;  %v4550_v14 = vadd.f32 %v9213_v12, %v4535_v45  ;;  %v6169_v32 = vld [vmem:[%s7041_s25 + $0x2e4] ss:$3 sm:$0xff] }
 0x44b   : > { %3686 = vrot.lane.b32.xlu1 %v9670_v35, %s6923_s29  ;;  %6454 = vmatprep.mubr.msk.f32.mxu1 %vm1733_vm9, %v2971_v60  ;;  %v6838_v35 = vld [vmem:[%s7041_s25 + $0x221] ss:$3 sm:$0xff] }
 0x44c   : > { %3448 = vrot.lane.b32.xlu0 %v9657_v41, %s6920_s26  ;;  %v4558_v16 = vmax.f32 %v4550_v14, 0.0  ;;  %v2804_v2 = vsel %vm1529_vm1, %v6838_v35, %v9459_v37 }
 0x44d   : > { %v9753_v10 = vpop.permute.xlu1 %3536  ;;  %v2828_v44 = vsel %vm1554_vm2, %v2804_v2, %v9501_v11  ;;  %v6096_v2 = vld [vmem:[%s7041_s25 + $0x303] ss:$3 sm:$0xff] }
 0x44e   : > { %v9755_v22 = vpop.permute.xlu0 %3442  ;;  %4567 = vst.msk [vmem:[#allocation2 + $0x20] sm:$0xff] %vm4564_vm10, %v4558_v16  ;;  %v2852_v28 = vsel %vm1579_vm3, %v2828_v44, %v9547_v36  ;;  %v6168_v36 = vld [vmem:[%s7041_s25 + $0x2c4] ss:$3 sm:$0xff] }
 0x44f   : > { %4018 = vrot.lane.b32.xlu1 %v6213_v4, %s6927_s23  ;;  %v2876_v37 = vsel %vm1604_vm4, %v2852_v28, %v9586_v50 }
 0x450   : > { %3780 = vrot.lane.b32.xlu0 %v6190_v63, %s6924_s17  ;;  %v2900_v62 = vsel %vm1629_vm5, %v2876_v37, %v9634_v61  ;;  %v6191_v61 = vld [vmem:[%s7041_s25 + $0x2c4] ss:$3 sm:$0xff]  ;;  %v6843_v63 = vld [vmem:[%s7041_s25 + $0x202] ss:$3 sm:$0xff] }
 0x451   : > { %v3845_v12 = vpop.permute.xlu1 %3844  ;;  %v2924_v11 = vsel %vm1654_vm6, %v2900_v62, %v9680_v43  ;;  %v4068_v16 = vsel %vm1529_vm1, %v6843_v63, %v9520_v20 }
 0x452   : > { %v9760_v41 = vpop.permute.xlu0 %3774  ;;  %v2948_v54 = vsel %vm1679_vm7, %v2924_v11, %v2654_v46  ;;  %v6118_v46 = vld [vmem:[%s7041_s25 + $0x2e3] ss:$3 sm:$0xff]  ;;  %v4092_v35 = vsel %vm1554_vm2, %v4068_v16, %v9566_v19 }
 0x453   : > { %2423 = vrot.lane.b32.xlu1 %v6839_v58, %s6923_s29 }
 0x454   : > { %2353 = vrot.lane.b32.xlu0 %v6840_v30, %s6922_s28  ;;  %v4116_v30 = vsel %vm1579_vm3, %v4092_v35, %v9608_v17 }
 0x455   : > { %v9774_v9 = vpop.permute.xlu1 %2417  ;;  %v4140_v37 = vsel %vm1604_vm4, %v4116_v30, %v9645_v23  ;;  %v6844_v23 = vld [vmem:[%s7041_s25 + $0x301] ss:$3 sm:$0xff] }
 0x456   : > { %v9776_v26 = vpop.permute.xlu0 %2179  ;;  %v4164_v20 = vsel %vm1629_vm5, %v4140_v37, %v9709_v59  ;;  %v6215_v37 = vld [vmem:[%s7041_s25 + $0x2e4] ss:$3 sm:$0xff] }
 0x457   : > { %2755 = vrot.lane.b32.xlu1 %v6117_v21, %s6927_s23  ;;  %v4188_v19 = vsel %vm1654_vm6, %v4164_v20, %v3845_v12  ;;  %v6214_v12 = vld [vmem:[%s7041_s25 + $0x2c4] ss:$3 sm:$0xff] }
 0x458   : > { %2661 = vrot.lane.b32.xlu0 %v6841_v51, %s6926_s22 }
 0x459   : > { %v2750_v5 = vpop.permute.xlu1 %2749 }
 0x45a   : > { %v9789_v57 = vpop.permute.xlu0 %2511  ;;  %v2972_v50 = vsel %vm1704_vm8, %v2948_v54, %v2750_v5  ;;  %v4868_v54 = vld [vmem:[%s10525_s3 + $0x78] sm:$0xff]  ;;  %v6845_v5 = vld [vmem:[%s7041_s25 + $0x222] ss:$3 sm:$0xff] }
 0x45b   : > { %3544 = vrot.lane.b32.xlu1 %v6168_v36, %s6921_s27  ;;  %6455 = vmatmul.mubr.msk.f32.gmra.mxu1 %vm1733_vm9, %v2972_v50  ;;  %v4069_v50 = vsel %vm1529_vm1, %v6845_v5, %v9568_v34  ;;  %v6447_v16 = vpop.f32.mrf.mxu1 }
 0x45c   : > { %3450 = vrot.lane.b32.xlu0 %v9705_v39, %s6920_s26  ;;  %v6842_v39 = vld [vmem:[%s7041_s25 + $0x302] ss:$3 sm:$0xff]  ;;  %4897 = vmatpush1.msra.mxu1 %v4868_v54  ;;  %v6119_v54 = vld [vmem:[%s7041_s25 + $0x303] ss:$3 sm:$0xff] }
 0x45d   : > { %v9797_v43 = vpop.permute.xlu1 %3608 }
 0x45e   : > { %v9799_v1 = vpop.permute.xlu0 %3538 }
 0x45f   : > { %3852 = vrot.lane.b32.xlu1 %v6836_v8, %s6925_s21 }
 0x460   : > { %3782 = vrot.lane.b32.xlu0 %v6191_v61, %s6924_s17  ;;  %v6846_v61 = vld [vmem:[%s7041_s25 + $0x321] ss:$3 sm:$0xff] }
 0x461   : > { %v3917_v33 = vpop.permute.xlu1 %3916 }
 0x462   : > { %v9804_v45 = vpop.permute.xlu0 %3846 }
 0x463   : > { %2519 = vrot.lane.b32.xlu1 %v6095_v47, %s6924_s17 }
 0x464   : > { %2425 = vrot.lane.b32.xlu0 %v6842_v39, %s6923_s29 }
 0x465   : > { %v9811_v60 = vpop.permute.xlu1 %2275 }
 0x466   : > { %v9813_v14 = vpop.permute.xlu0 %2181 }
 0x467   : > { %3546 = vrot.lane.b32.xlu1 %v6169_v32, %s6921_s27  ;;  %s6931_s27 = smov 64  }
 0x468   : > { %2757 = vrot.lane.b32.xlu0 %v6118_v46, %s6927_s23 }
 0x469   : > { %v9817_v8 = vpop.permute.xlu1 %2583 }
 0x46a   : > { %v9819_v4 = vpop.permute.xlu0 %2513 }
 0x46b   : > { %3854 = vrot.lane.b32.xlu1 %v6841_v51, %s6925_s21 }
 0x46c   : > { %3616 = vrot.lane.b32.xlu0 %v6839_v58, %s6922_s28  ;;  %v4212_v58 = vsel %vm1679_vm7, %v4188_v19, %v3917_v33  ;;  %v4093_v33 = vsel %vm1554_vm2, %v4069_v50, %v9610_v15  ;;  %v4866_v15 = vld [vmem:[%s10525_s3 + $0x68] sm:$0xff] }
 0x46d   : > { %v9831_v44 = vpop.permute.xlu1 %3680 }
 0x46e   : > { %v9833_v28 = vpop.permute.xlu0 %3610 }
 0x46f   : > { %2521 = vrot.lane.b32.xlu1 %v6096_v2, %s6924_s17 }
 0x470   : > { %3924 = vrot.lane.b32.xlu0 %v6117_v21, %s6926_s22 }
 0x471   : > { %v4013_v17 = vpop.permute.xlu1 %4012 }
 0x472   : > { %v3919_v62 = vpop.permute.xlu0 %3918  ;;  %v4236_v51 = vsel %vm1704_vm8, %v4212_v58, %v4013_v17 }
 0x473   : > { %3618 = vrot.lane.b32.xlu1 %v6842_v39, %s6922_s28  ;;  %6498 = vmatprep.mubr.msk.f32.mxu0 %vm1733_vm9, %v4236_v51  ;;  %v4117_v39 = vsel %vm1579_vm3, %v4093_v33, %v9647_v25  ;;  %v6847_v25 = vld [vmem:[%s7041_s25 + $0x302] ss:$3 sm:$0xff]  ;;  %s6932_s28 = smov 48  }
 0x474   : > { %2591 = vrot.lane.b32.xlu0 %v6844_v23, %s6925_s21  ;;  %v4141_v63 = vsel %vm1604_vm4, %v4117_v39, %v9692_v0  ;;  %v6192_v0 = vld [vmem:[%s7041_s25 + $0x2e4] ss:$3 sm:$0xff] }
 0x475   : > { %v9848_v59 = vpop.permute.xlu1 %2347  ;;  %v4165_v35 = vsel %vm1629_vm5, %v4141_v63, %v9760_v41  ;;  %v4865_v41 = vld [vmem:[%s10525_s3 + $0x60] sm:$0xff]  ;;  %v4863_v33 = vld [vmem:[%s10525_s3 + $0x50] sm:$0xff] }
 0x476   : > { %v9850_v21 = vpop.permute.xlu0 %2277  ;;  %v4189_v30 = vsel %vm1654_vm6, %v4165_v35, %v9804_v45  ;;  %v6848_v45 = vld [vmem:[%s7041_s25 + $0x241] ss:$3 sm:$0xff]  ;;  %v6849_v63 = vld [vmem:[%s7041_s25 + $0x322] ss:$3 sm:$0xff] }
 0x477   : > { %3926 = vrot.lane.b32.xlu1 %v6118_v46, %s6926_s22  ;;  %v10667_v46 = vmov 0.0   ;;  %v4213_v20 = vsel %vm1679_vm7, %v4189_v30, %v3919_v62  ;;  %v2805_v51 = vsel %vm1529_vm1, %v6848_v45, %v9588_v29  ;;  %v4864_v62 = vld [vmem:[%s10525_s3 + $0x58] sm:$0xff] }
 0x478   : > { %3688 = vrot.lane.b32.xlu0 %v6095_v47, %s6923_s29  ;;  %v4867_v47 = vld [vmem:[%s10525_s3 + $0x70] sm:$0xff]  ;;  %4898 = vmatprep.subr.mxu1 %v10667_v46  ;;  %v2829_v23 = vsel %vm1554_vm2, %v2805_v51, %v9625_v55 }
 0x479   : > { %v9855_v11 = vpop.permute.xlu1 %2655  ;;  %4899 = vmatpush1.msra.mxu1 %v4867_v47  ;;  %v2853_v29 = vsel %vm1579_vm3, %v2829_v23, %v9672_v42  ;;  %v6851_v23 = vld [vmem:[%s7041_s25 + $0x261] ss:$3 sm:$0xff] }
 0x47a   : > { %v9857_v36 = vpop.permute.xlu0 %2585  ;;  %4900 = vmatprep.subr.mxu1 %v10667_v46  ;;  %v2877_v55 = vsel %vm1604_vm4, %v2853_v29, %v9729_v40  ;;  %v6852_v29 = vld [vmem:[%s7041_s25 + $0x2a1] ss:$3 sm:$0xff] }
 0x47b   : > { %2593 = vrot.lane.b32.xlu1 %v6846_v61, %s6925_s21  ;;  %4901 = vmatpush1.msra.mxu1 %v4866_v15  ;;  %v2901_v42 = vsel %vm1629_vm5, %v2877_v55, %v9789_v57  ;;  %v6193_v15 = vld [vmem:[%s7041_s25 + $0x304] ss:$3 sm:$0xff] }
 0x47c   : > { %4020 = vrot.lane.b32.xlu0 %v6214_v12, %s6927_s23  ;;  %4902 = vmatprep.subr.mxu1 %v10667_v46  ;;  %v2925_v40 = vsel %vm1654_vm6, %v2901_v42, %v9817_v8  ;;  %v4858_v55 = vld [vmem:[%s10525_s3 + $0x28] sm:$0xff] }
 0x47d   : > { %v9875_v34 = vpop.permute.xlu1 %3682  ;;  %4903 = vmatpush1.msra.mxu1 %v4865_v41  ;;  %v2949_v35 = vsel %vm1679_vm7, %v2925_v40, %v9855_v11  ;;  %v6120_v11 = vld [vmem:[%s7041_s25 + $0x323] ss:$3 sm:$0xff]  ;;  %v6217_v42 = vld [vmem:[%s7041_s25 + $0x324] ss:$3 sm:$0xff] }
 0x47e   : > { %v9877_v32 = vpop.permute.xlu0 %3444  ;;  %4904 = vmatprep.subr.mxu1 %v10667_v46  ;;  %v4588_v40 = vld [vmem:[#allocation2 + $0x11] sm:$0xff] }
 0x47f   : > { %3690 = vrot.lane.b32.xlu1 %v6096_v2, %s6923_s29  ;;  %v3167_v2 = vpop.f32.mrf.mxu1  ;;  %4905 = vmatpush1.msra.mxu1 %v4864_v62  ;;  %v4859_v62 = vld [vmem:[%s10525_s3 + $0x30] sm:$0xff]  ;;  %s6935_s29 = smov 112  }
 0x480   : > { %2663 = vrot.lane.b32.xlu0 %v6847_v25, %s6926_s22  ;;  %v3246_v5 = vmax.f32 %v9035_v48, %v3167_v2  ;;  %v3247_v48 = vmax.f32 %v9017_v7, %v6447_v16  ;;  %4906 = vmatprep.subr.mxu1 %v10667_v46 }
 0x481   : > { %v4015_v19 = vpop.permute.xlu1 %4014  ;;  %4907 = vmatpush1.msra.mxu1 %v4863_v33 }
 0x482   : > { %v9896_v58 = vpop.permute.xlu0 %3776  ;;  %v4237_v17 = vsel %vm1704_vm8, %v4213_v20, %v4015_v19  ;;  %4908 = vmatprep.subr.mxu1 %v10667_v46  ;;  %v4072_v20 = vsel %vm1529_vm1, %v9451_v38, %v9877_v32  ;;  %v9959_v19 = vld [vmem:[%s10524_s2] ss:$0 sm:$0xff]  ;;  %v4860_v38 = vld [vmem:[%s10525_s3 + $0x38] sm:$0xff] }
 0x483   : > { %4022 = vrot.lane.b32.xlu1 %v6215_v37, %s6927_s23  ;;  %v6491_v12 = vpop.f32.mrf.mxu0  ;;  %6499 = vmatmul.mubr.msk.f32.gmra.mxu0 %vm1733_vm9, %v4237_v17  ;;  %v4862_v37 = vld [vmem:[%s10525_s3 + $0x48] sm:$0xff] }
 0x484   : > { %3784 = vrot.lane.b32.xlu0 %v6192_v0, %s6924_s17  ;;  %v4512_v30 = vmax.f32 %v3247_v48, %v6491_v12  ;;  %4909 = vmatpush1.msra.mxu1 %v4862_v37  ;;  %v2806_v12 = vsel %vm1529_vm1, %v6851_v23, %v9627_v18  ;;  %v6216_v18 = vld [vmem:[%s7041_s25 + $0x304] ss:$3 sm:$0xff] }
 0x485   : > { %v9918_v50 = vpop.permute.xlu1 %2419  ;;  %v4432_v47 = vpop.f32.mrf.mxu0  ;;  %4910 = vmatprep.subr.mxu1 %v10667_v46  ;;  %v4587_v37 = vld [vmem:[#allocation2 + $0x1] sm:$0xff] }
 0x486   : > { %v9920_v61 = vpop.permute.xlu0 %2349  ;;  %v4511_v39 = vmax.f32 %v3246_v5, %v4432_v47  ;;  %v2808_v5 = vsel %vm1529_vm1, %v6852_v29, %v9813_v14  ;;  %v2830_v47 = vsel %vm1554_vm2, %v2806_v12, %v9674_v6  ;;  %v10057_v12 = vld [vmem:[#allocation2 + $0x22] sm:$0xff] }
 0x487   : > { %2759 = vrot.lane.b32.xlu1 %v6119_v54, %s6927_s23  ;;  %v2832_v33 = vsel %vm1554_vm2, %v2808_v5, %v9850_v21  ;;  %v2854_v14 = vsel %vm1579_vm3, %v2830_v47, %v9731_v52  ;;  %v4594_v21 = vld [vmem:[#allocation2 + $0x12] sm:$0xff]  ;;  %v4857_v52 = vld [vmem:[%s10525_s3 + $0x20] sm:$0xff]  ;;  %v4870_v47 = vld [vmem:[%s10525_s3 + $0x88] sm:$0xff] }
 0x488   : > { %2665 = vrot.lane.b32.xlu0 %v6849_v63, %s6926_s22  ;;  %v4528_v57 = vmax.f32 %v9727_v56, %v4511_v39  ;;  %v4861_v56 = vld [vmem:[%s10525_s3 + $0x40] sm:$0xff]  ;;  %v2856_v48 = vsel %vm1579_vm3, %v2832_v33, %v9920_v61  ;;  %v2878_v6 = vsel %vm1604_vm4, %v2854_v14, %v9774_v9  ;;  %v6638_v33 = vpack.i.bf16 %v10057_v12, %v4594_v21 }
 0x489   : > { %v2752_v7 = vpop.permute.xlu1 %2751  ;;  %4911 = vmatpush1.msra.mxu1 %v4861_v56  ;;  %v2902_v61 = vsel %vm1629_vm5, %v2878_v6, %v9819_v4  ;;  %v4856_v4 = vld [vmem:[%s10525_s3 + $0x18] sm:$0xff]  ;;  %v4607_v56 = vld [vmem:[#allocation2 + $0x21] sm:$0xff] }
 0x48a   : > { %v2658_v16 = vpop.permute.xlu0 %2657  ;;  %v2973_v0 = vsel %vm1704_vm8, %v2949_v35, %v2752_v7  ;;  %v4536_v8 = vmax.f32 %v4528_v57, %v4512_v30  ;;  %4912 = vmatprep.subr.mxu1 %v10667_v46  ;;  %v2926_v9 = vsel %vm1654_vm6, %v2902_v61, %v9857_v36  ;;  %v10032_v36 = vld [vmem:[#allocation2 + $0x20] sm:$0xff] }
 0x48b   : > { %3856 = vrot.lane.b32.xlu1 %v6847_v25, %s6925_s21  ;;  %6457 = vmatprep.mubr.msk.f32.mxu1 %vm1733_vm9, %v2973_v0  ;;  %v2950_v35 = vsel %vm1679_vm7, %v2926_v9, %v2658_v16  ;;  %v4855_v16 = vld [vmem:[%s10525_s3 + $0x10] sm:$0xff] }
 0x48c   : > { %3786 = vrot.lane.b32.xlu0 %v6193_v15, %s6924_s17  ;;  %v4551_v25 = vadd.f32 %v9959_v19, %v4536_v8  ;;  %4913 = vmatpush1.msra.mxu1 %v4860_v38  ;;  %v4593_v15 = vld [vmem:[#allocation2 + $0x2] sm:$0xff]  ;;  %v6618_v8 = vpack.i.bf16 %v4588_v40, %v4587_v37  ;;  %v10041_v38 = vld [vmem:[#allocation2 + $0x10] sm:$0xff] }
 0x48d   : > { %v3541_v41 = vpop.permute.xlu1 %3540  ;;  %4914 = vmatprep.subr.mxu1 %v10667_v46  ;;  %v6623_v7 = vpack.i.bf16 %v4594_v21, %v4593_v15  ;;  %v6853_v14 = vld [vmem:[%s7041_s25 + $0x2c1] ss:$3 sm:$0xff]  ;;  %v6854_v15 = vld [vmem:[%s7041_s25 + $0x242] ss:$3 sm:$0xff] }
 0x48e   : > { %v9962_v2 = vpop.permute.xlu0 %3446  ;;  %v9966_v17 = vsel %vm1554_vm2, %v4072_v20, %v3541_v41  ;;  %v4559_v32 = vmax.f32 %v4551_v25, 0.0  ;;  %4915 = vmatpush1.msra.mxu1 %v4859_v62  ;;  %v6633_v41 = vpack.i.bf16 %v4607_v56, %v4588_v40 }
 0x48f   : > { %3858 = vrot.lane.b32.xlu1 %v6849_v63, %s6925_s21  ;;  %4916 = vmatprep.subr.mxu1 %v10667_v46 }
 0x490   : > { %2761 = vrot.lane.b32.xlu0 %v6120_v11, %s6927_s23  ;;  %4568 = vst.msk [vmem:[#allocation2 + $0x30] sm:$0xff] %vm4564_vm10, %v4559_v32  ;;  %4917 = vmatpush1.msra.mxu1 %v4858_v55  ;;  %v4854_v32 = vld [vmem:[%s10525_s3 + $0x8] sm:$0xff] }
 0x491   : > { %v9975_v45 = vpop.permute.xlu1 %3848  ;;  %4918 = vmatprep.subr.mxu1 %v10667_v46 }
 0x492   : > { %v9977_v51 = vpop.permute.xlu0 %3778  ;;  %4919 = vmatpush1.msra.mxu1 %v4857_v52 }
 0x493   : > { %3930 = vrot.lane.b32.xlu1 %v6120_v11, %s6926_s22  ;;  %4920 = vmatprep.subr.mxu1 %v10667_v46  ;;  %v4073_v11 = vsel %vm1529_vm1, %v9493_v3, %v9962_v2  ;;  %v6628_v3 = vpack.i.bf16 %v10032_v36, %v10041_v38 }
 0x494   : > { %3928 = vrot.lane.b32.xlu0 %v6119_v54, %s6926_s22  ;;  %4921 = vmatpush1.msra.mxu1 %v4856_v4  ;;  %s6934_s22 = smov 80  }
 0x495   : > { %v2422_v54 = vpop.permute.xlu1 %2421  ;;  %4922 = vmatprep.subr.mxu1 %v10667_v46 }
 0x496   : > { %v10004_v39 = vpop.permute.xlu0 %2183  ;;  %v10010_v63 = vsel %vm1604_vm4, %v2856_v48, %v2422_v54  ;;  %4923 = vmatpush1.msra.mxu1 %v4855_v16 }
 0x497   : > { %4026 = vrot.lane.b32.xlu1 %v6217_v42, %s6927_s23  ;;  %v10054_v2 = vld [vmem:[#allocation2 + $0x30] sm:$0xff]  ;;  %4924 = vmatprep.subr.mxu1 %v10667_v46  ;;  %v2809_v48 = vsel %vm1529_vm1, %v6853_v14, %v10004_v39 }
 0x498   : > { %4024 = vrot.lane.b32.xlu0 %v6216_v18, %s6927_s23  ;;  %s6929_s23 = smov 32   ;;  %4925 = vmatpush1.msra.mxu1 %v4854_v32  ;;  %v6643_v55 = vpack.i.bf16 %v10054_v2, %v10032_v36  ;;  %v10071_v42 = vld [vmem:[#allocation2 + $0x31] sm:$0xff]  ;;  %v4869_v18 = vld [vmem:[%s10525_s3 + $0x80] sm:$0xff] }
 0x499   : > { %v2754_v30 = vpop.permute.xlu1 %2753  ;;  %4926 = vmatprep.subr.mxu1 %v10667_v46  ;;  %v6648_v21 = vpack.i.bf16 %v10071_v42, %v4607_v56  ;;  %v10088_v61 = vld [vmem:[#allocation2 + $0x32] sm:$0xff] }
 0x49a   : > { %v10023_v57 = vpop.permute.xlu0 %2515  ;;  %v2974_v0 = vsel %vm1704_vm8, %v2950_v35, %v2754_v30  ;;  %v6658_v9 = vpack.i.bf16 %v10088_v61, %v10057_v12  ;;  %v4070_v35 = vsel %vm1529_vm1, %v6854_v15, %v9694_v49 }
 0x49b   : > { %6458 = vmatmul.mubr.msk.f32.gmra.mxu1 %vm1733_vm9, %v2974_v0  ;;  %6624 = vrot.lane.b32.xlu1 %v6623_v7, %s6929_s23  ;;  %v4094_v30 = vsel %vm1554_vm2, %v4070_v35, %v9753_v10 }
 0x49c   : > { %6619 = vrot.lane.b32.xlu0 %v6618_v8, %s6930_s14  ;;  %v4118_v7 = vsel %vm1579_vm3, %v4094_v30, %v9797_v43 }
 0x49d   : > { %v3613_v20 = vpop.permute.xlu1 %3612  ;;  %v4142_v0 = vsel %vm1604_vm4, %v4118_v7, %v9831_v44 }
 0x49e   : > { %v3543_v25 = vpop.permute.xlu0 %3542  ;;  %v10049_v62 = vsel %vm1579_vm3, %v9966_v17, %v3613_v20  ;;  %v4853_v17 = vld [vmem:[%s10525_s3] sm:$0xff]  ;;  %v4166_v49 = vsel %vm1629_vm5, %v4142_v0, %v9896_v58 }
 0x49f   : > { %v4097_v23 = vsel %vm1554_vm2, %v4073_v11, %v3543_v25  ;;  %6634 = vrot.lane.b32.xlu1 %v6633_v41, %s6931_s27  ;;  %4927 = vmatpush1.msra.mxu1 %v4853_v17  ;;  %v4190_v10 = vsel %vm1654_vm6, %v4166_v49, %v9975_v45  ;;  %v6855_v20 = vld [vmem:[%s7041_s25 + $0x2e1] ss:$3 sm:$0xff] }
 0x4a0   : > { %6629 = vrot.lane.b32.xlu0 %v6628_v3, %s6932_s28  ;;  %4956 = vmatprep.subr.mxu1 %v10667_v46 }
 0x4a1   : > { %v3921_v29 = vpop.permute.xlu1 %3920  ;;  %4957 = vmatpush2.msra.mxu1 %v4870_v47 }
 0x4a2   : > { %v3851_v5 = vpop.permute.xlu0 %3850  ;;  %4958 = vmatprep.subr.mxu1 %v10667_v46  ;;  %v4214_v56 = vsel %vm1679_vm7, %v4190_v10, %v3921_v29 }
 0x4a3   : > { %6644 = vrot.lane.b32.xlu1 %v6643_v55, %s6933_s24  ;;  %4959 = vmatpush2.msra.mxu1 %v4869_v18 }
 0x4a4   : > { %6639 = vrot.lane.b32.xlu0 %v6638_v33, %s6934_s22  ;;  %6510 = vmatprep.subr.mxu1 %v10667_v46 }
 0x4a5   : > { %v2280_v54 = vpop.permute.xlu1 %2279 }
 0x4a6   : > { %v2186_v6 = vpop.permute.xlu0 %2185  ;;  %v10085_v52 = vsel %vm1554_vm2, %v2809_v48, %v2280_v54 }
 0x4a7   : > { %6654 = vrot.lane.b32.xlu1 %v6648_v21, %s6930_s14  ;;  %v2810_v44 = vsel %vm1529_vm1, %v6855_v20, %v2186_v6  ;;  %v6857_v6 = vld [vmem:[%s7041_s25 + $0x281] ss:$3 sm:$0xff] }
 0x4a8   : > { %6649 = vrot.lane.b32.xlu0 %v6648_v21, %s6935_s29 }
 0x4a9   : > { %v2588_v39 = vpop.permute.xlu1 %2587 }
 0x4aa   : > { %v2518_v40 = vpop.permute.xlu0 %2517 }
 0x4ac   : > { %6659 = vrot.lane.b32.xlu0 %v6658_v9, %s6929_s23 }
 0x4ad   : > { %v10102_v37 = vpop.permute.xlu1 %3684 }
 0x4ae   : > { %v3615_v4 = vpop.permute.xlu0 %3614 }
 0x4af   : > { %v10107_v8 = vsel %vm1579_vm3, %v4097_v23, %v3615_v4  ;;  %v6856_v23 = vld [vmem:[%s7041_s25 + $0x262] ss:$3 sm:$0xff] }
 0x4b0   : > { %v4071_v3 = vsel %vm1529_vm1, %v6856_v23, %v9755_v22 }
 0x4b1   : > { %v4017_v16 = vpop.permute.xlu1 %4016  ;;  %v4095_v17 = vsel %vm1554_vm2, %v4071_v3, %v9799_v1 }
 0x4b2   : > { %v3923_v43 = vpop.permute.xlu0 %3922  ;;  %v4238_v11 = vsel %vm1704_vm8, %v4214_v56, %v4017_v16  ;;  %v4119_v29 = vsel %vm1579_vm3, %v4095_v17, %v9833_v28  ;;  %v2807_v28 = vsel %vm1529_vm1, %v6857_v6, %v9776_v26 }
 0x4b3   : > { %6501 = vmatprep.mubr.msk.f32.mxu0 %vm1733_vm9, %v4238_v11  ;;  %v4143_v33 = vsel %vm1604_vm4, %v4119_v29, %v9875_v34  ;;  %v2831_v34 = vsel %vm1554_vm2, %v2807_v28, %v9811_v60 }
 0x4b4   : > { %v4167_v18 = vsel %vm1629_vm5, %v4143_v33, %v9977_v51  ;;  %v2855_v51 = vsel %vm1579_vm3, %v2831_v34, %v9848_v59 }
 0x4b5   : > { %v10118_v25 = vpop.permute.xlu1 %2351  ;;  %v4191_v14 = vsel %vm1654_vm6, %v4167_v18, %v3851_v5  ;;  %v2879_v9 = vsel %vm1604_vm4, %v2855_v51, %v9918_v50 }
 0x4b6   : > { %v2282_v41 = vpop.permute.xlu0 %2281  ;;  %v4215_v48 = vsel %vm1679_vm7, %v4191_v14, %v3923_v43  ;;  %v2903_v15 = vsel %vm1629_vm5, %v2879_v9, %v10023_v57  ;;  %v2904_v57 = vsel %vm1629_vm5, %v10010_v63, %v2518_v40  ;;  %v4144_v40 = vsel %vm1604_vm4, %v10049_v62, %v10102_v37 }
 0x4b7   : > { %v10121_v32 = vsel %vm1554_vm2, %v2810_v44, %v2282_v41  ;;  %v2927_v35 = vsel %vm1654_vm6, %v2903_v15, %v2588_v39  ;;  %v2857_v37 = vsel %vm1579_vm3, %v10085_v52, %v10118_v25 }
 0x4b9   : > { %v2660_v58 = vpop.permute.xlu1 %2659 }
 0x4ba   : > { %v2590_v45 = vpop.permute.xlu0 %2589  ;;  %v2951_v26 = vsel %vm1679_vm7, %v2927_v35, %v2660_v58 }
 0x4bb   : > { %v2928_v39 = vsel %vm1654_vm6, %v2904_v57, %v2590_v45 }
 0x4bd   : > { %v3687_v55 = vpop.permute.xlu1 %3686 }
 0x4be   : > { %v10130_v47 = vpop.permute.xlu0 %3448  ;;  %v4145_v6 = vsel %vm1604_vm4, %v10107_v8, %v3687_v55  ;;  %v6450_v8 = vpop.f32.mrf.mxu1 }
 0x4c0   : > { %v3177_v25 = vpop.f32.mrf.mxu1 }
 0x4c1   : > { %v4019_v22 = vpop.permute.xlu1 %4018 }
 0x4c2   : > { %v3781_v54 = vpop.permute.xlu0 %3780  ;;  %v4239_v1 = vsel %vm1704_vm8, %v4215_v48, %v4019_v22 }
 0x4c3   : > { %6502 = vmatmul.mubr.msk.f32.gmra.mxu0 %vm1733_vm9, %v4239_v1  ;;  %v4168_v45 = vsel %vm1629_vm5, %v4144_v40, %v3781_v54 }
 0x4c5   : > { %v2424_v21 = vpop.permute.xlu1 %2423 }
 0x4c6   : > { %v2354_v5 = vpop.permute.xlu0 %2353  ;;  %v2881_v9 = vsel %vm1604_vm4, %v2857_v37, %v2424_v21 }
 0x4c7   : > { %v2858_v21 = vsel %vm1579_vm3, %v10121_v32, %v2354_v5  ;;  %v4074_v5 = vsel %vm1529_vm1, %v9619_v24, %v10130_v47  ;;  %v10668_v47 = vld [vmem:[#allocation20_spill] sm:$0xff] }
 0x4c9   : > { %v2756_v30 = vpop.permute.xlu1 %2755 }
 0x4ca   : > { %v2662_v7 = vpop.permute.xlu0 %2661  ;;  %v2975_v4 = vsel %vm1704_vm8, %v2951_v26, %v2756_v30 }
 0x4cb   : > { %6460 = vmatprep.mubr.msk.f32.mxu1 %vm1733_vm9, %v2975_v4  ;;  %v2952_v56 = vsel %vm1679_vm7, %v2928_v39, %v2662_v7  ;;  %v6494_v4 = vpop.f32.mrf.mxu0 }
 0x4cd   : > { %v10155_v60 = vpop.permute.xlu1 %3544 }
 0x4ce   : > { %v10157_v59 = vpop.permute.xlu0 %3450 }
 0x4d1   : > { %v3853_v0 = vpop.permute.xlu1 %3852 }
 0x4d2   : > { %v3783_v49 = vpop.permute.xlu0 %3782  ;;  %v4192_v29 = vsel %vm1654_vm6, %v4168_v45, %v3853_v0 }
 0x4d3   : > { %v4169_v28 = vsel %vm1629_vm5, %v4145_v6, %v3783_v49 }
 0x4d5   : > { %v2520_v50 = vpop.permute.xlu1 %2519 }
 0x4d6   : > { %v2426_v10 = vpop.permute.xlu0 %2425  ;;  %v2905_v35 = vsel %vm1629_vm5, %v2881_v9, %v2520_v50 }
 0x4d7   : > { %v2882_v50 = vsel %vm1604_vm4, %v2858_v21, %v2426_v10 }
 0x4d9   : > { %v10163_v16 = vpop.permute.xlu1 %3546 }
 0x4da   : > { %v2758_v43 = vpop.permute.xlu0 %2757 }
 0x4db   : > { %v2976_v11 = vsel %vm1704_vm8, %v2952_v56, %v2758_v43  ;;  %v6453_v57 = vpop.f32.mrf.mxu1  ;;  %v4442_v56 = vpop.f32.mrf.mxu0 }
 0x4dc   : > { %6461 = vmatmul.mubr.msk.f32.gmra.mxu1 %vm1733_vm9, %v2976_v11  ;;  %v3248_v11 = vmax.f32 %v9056_v13, %v3177_v25  ;;  %v3251_v13 = vmax.f32 %v9064_v53, %v6453_v57 }
 0x4dd   : > { %v3855_v20 = vpop.permute.xlu1 %3854  ;;  %v3187_v40 = vpop.f32.mrf.mxu1 }
 0x4de   : > { %v10167_v44 = vpop.permute.xlu0 %3616  ;;  %v4193_v62 = vsel %vm1654_vm6, %v4169_v28, %v3855_v20  ;;  %v4513_v10 = vmax.f32 %v3248_v11, %v4442_v56 }
 0x4e1   : > { %v2522_v41 = vpop.permute.xlu1 %2521 }
 0x4e2   : > { %v3925_v58 = vpop.permute.xlu0 %3924  ;;  %v2906_v39 = vsel %vm1629_vm5, %v2882_v50, %v2522_v41  ;;  %v4075_v41 = vsel %vm1529_vm1, %v9664_v27, %v10157_v59  ;;  %v3250_v27 = vmax.f32 %v10668_v47, %v3187_v40  ;;  %vm4998_vm1 = vcmask 256000  }
 0x4e3   : > { %v4216_v33 = vsel %vm1679_vm7, %v4192_v29, %v3925_v58  ;;  %v4099_v29 = vsel %vm1554_vm2, %v4075_v41, %v10163_v16 }
 0x4e5   : > { %v3619_v23 = vpop.permute.xlu1 %3618 }
 0x4e6   : > { %v2592_v3 = vpop.permute.xlu0 %2591  ;;  %v4123_v53 = vsel %vm1579_vm3, %v4099_v29, %v3619_v23 }
 0x4e7   : > { %v2929_v55 = vsel %vm1654_vm6, %v2905_v35, %v2592_v3 }
 0x4e9   : > { %v3927_v17 = vpop.permute.xlu1 %3926 }
 0x4ea   : > { %v10169_v63 = vpop.permute.xlu0 %3688  ;;  %v4217_v54 = vsel %vm1679_vm7, %v4193_v62, %v3927_v17  ;;  %v3249_v17 = vmax.f32 %v9044_v31, %v6450_v8  ;;  %v4098_v31 = vsel %vm1554_vm2, %v4074_v5, %v10155_v60  ;;  %vm5103_vm2 = vcmask 259075  }
 0x4eb   : > { %v4122_v24 = vsel %vm1579_vm3, %v4098_v31, %v10167_v44  ;;  %vm6936_vm3 = vmmov 0  }
 0x4ec   : > { %v4514_v45 = vmax.f32 %v3249_v17, %v6494_v4  ;;  %v4146_v60 = vsel %vm1604_vm4, %v4122_v24, %v10169_v63 }
 0x4ed   : > { %v2594_v18 = vpop.permute.xlu1 %2593 }
 0x4ee   : > { %v4021_v14 = vpop.permute.xlu0 %4020  ;;  %v2930_v43 = vsel %vm1654_vm6, %v2906_v39, %v2594_v18 }
 0x4ef   : > { %v4240_v48 = vsel %vm1704_vm8, %v4216_v33, %v4021_v14 }
 0x4f0   : > { %6504 = vmatprep.mubr.msk.f32.mxu0 %vm1733_vm9, %v4240_v48 }
 0x4f1   : > { %v3691_v22 = vpop.permute.xlu1 %3690 }
 0x4f2   : > { %v2664_v1 = vpop.permute.xlu0 %2663  ;;  %v4147_v16 = vsel %vm1604_vm4, %v4123_v53, %v3691_v22  ;;  %vm5496_vm4 = vcmask 73728  }
 0x4f3   : > { %v2953_v26 = vsel %vm1679_vm7, %v2929_v55, %v2664_v1  ;;  %v4529_v1 = vmax.f32 %v4513_v10, %v4514_v45 }
 0x4f5   : > { %v4023_v34 = vpop.permute.xlu1 %4022 }
 0x4f6   : > { %v3785_v51 = vpop.permute.xlu0 %3784  ;;  %v4241_v15 = vsel %vm1704_vm8, %v4217_v54, %v4023_v34 }
 0x4f7   : > { %6505 = vmatmul.mubr.msk.f32.gmra.mxu0 %vm1733_vm9, %v4241_v15 }
 0x4f9   : > { %v2760_v30 = vpop.permute.xlu1 %2759 }
 0x4fa   : > { %v2666_v7 = vpop.permute.xlu0 %2665  ;;  %v2977_v52 = vsel %vm1704_vm8, %v2953_v26, %v2760_v30  ;;  %v4581_v30 = vld [vmem:[#allocation2] sm:$0xff] }
 0x4fb   : > { %6463 = vmatprep.mubr.msk.f32.mxu1 %vm1733_vm9, %v2977_v52  ;;  %v2954_v20 = vsel %vm1679_vm7, %v2930_v43, %v2666_v7 }
 0x4fd   : > { %v3857_v0 = vpop.permute.xlu1 %3856 }
 0x4fe   : > { %v3787_v49 = vpop.permute.xlu0 %3786 }
 0x4ff   : > { %v4171_v6 = vsel %vm1629_vm5, %v4147_v16, %v3787_v49 }
 0x501   : > { %v3859_v58 = vpop.permute.xlu1 %3858 }
 0x502   : > { %v2762_v3 = vpop.permute.xlu0 %2761  ;;  %v4195_v23 = vsel %vm1654_vm6, %v4171_v6, %v3859_v58  ;;  %v10669_v6 = vld [vmem:[#allocation52_spill] sm:$0xff] }
 0x503   : > { %v2978_v32 = vsel %vm1704_vm8, %v2954_v20, %v2762_v3  ;;  %v6497_v33 = vpop.f32.mrf.mxu0 }
 0x504   : > { %6464 = vmatmul.mubr.msk.f32.gmra.mxu1 %vm1733_vm9, %v2978_v32  ;;  %v10222_v59 = vmax.f32 %v3251_v13, %v6497_v33 }
 0x505   : > { %6245 = vmatprep.mubr.msk.f32.mxu1 %vm4564_vm10, %v10057_v12  ;;  %v3931_v18 = vpop.permute.xlu1 %3930  ;;  %v4452_v48 = vpop.f32.mrf.mxu0  ;;  %v4170_v12 = vsel %vm1629_vm5, %v4146_v60, %v3785_v51 }
 0x506   : > { %v3929_v14 = vpop.permute.xlu0 %3928  ;;  %v4515_v44 = vmax.f32 %v3250_v27, %v4452_v48  ;;  %v4194_v28 = vsel %vm1654_vm6, %v4170_v12, %v3857_v0  ;;  %v4219_v62 = vsel %vm1679_vm7, %v4195_v23, %v3931_v18  ;;  %v10670_v23 = vld [vmem:[#allocation38_spill] sm:$0xff] }
 0x507   : > { %v4218_v37 = vsel %vm1679_vm7, %v4194_v28, %v3929_v14 }
 0x508   : > { %v4537_v54 = vmax.f32 %v4529_v1, %v4515_v44 }
 0x509   : > { %v4027_v34 = vpop.permute.xlu1 %4026 }
 0x50a   : > { %v4025_v63 = vpop.permute.xlu0 %4024  ;;  %v4243_v22 = vsel %vm1704_vm8, %v4219_v62, %v4027_v34  ;;  %v4552_v51 = vadd.f32 %v9959_v19, %v4537_v54 }
 0x50b   : > { %v4242_v9 = vsel %vm1704_vm8, %v4218_v37, %v4025_v63 }
 0x50c   : > { %6507 = vmatprep.mubr.msk.f32.mxu0 %vm1733_vm9, %v4242_v9  ;;  %v4560_v15 = vmax.f32 %v4552_v51, 0.0 }
 0x50d   : > { %6508 = vmatmul.mubr.msk.f32.gmra.mxu0 %vm1733_vm9, %v4243_v22  ;;  %v6625_v35 = vpop.permute.xlu1 %6624 }
 0x50e   : > { %v6620_v8 = vpop.permute.xlu0 %6619  ;;  %4569 = vst.msk [vmem:[#allocation2 + $0x40] sm:$0xff] %vm4564_vm10, %v4560_v15  ;;  %v6626_v26 = vunpack.i.l.bf16 %v6625_v35  ;;  %v6627_v0 = vunpack.i.h.bf16 %v6625_v35  ;;  %6551 = vmatprep.mubr.msk.f32.mxu0 %vm6936_vm3, %v10667_v46 }
 0x50f   : > { %v6621_v55 = vunpack.i.l.bf16 %v6620_v8  ;;  %v6622_v7 = vunpack.i.h.bf16 %v6620_v8 }
 0x511   : > { %v4805_v52 = vsel %vm4564_vm10, %v4581_v30, %v6621_v55  ;;  %v6635_v25 = vpop.permute.xlu1 %6634  ;;  %v4806_v57 = vsel %vm4564_vm10, %v10041_v38, %v6622_v7 }
 0x512   : > { %v6630_v4 = vpop.permute.xlu0 %6629  ;;  %v6636_v49 = vunpack.i.l.bf16 %v6635_v25  ;;  %v4812_v50 = vsel %vm4811_vm11, %v4805_v52, %v6626_v26  ;;  %v6637_v32 = vunpack.i.h.bf16 %v6635_v25  ;;  %v4813_v5 = vsel %vm4811_vm11, %v4806_v57, %v6627_v0  ;;  %v10671_v25 = vld [vmem:[#allocation19_spill] sm:$0xff]  ;;  %v10672_v0 = vld [vmem:[#allocation6_spill] sm:$0xff] }
 0x513   : > { %v6631_v21 = vunpack.i.l.bf16 %v6630_v4  ;;  %v6632_v39 = vunpack.i.h.bf16 %v6630_v4 }
 0x515   : > { %v4819_v56 = vsel %vm4818_vm12, %v4812_v50, %v6631_v21  ;;  %v6645_v43 = vpop.permute.xlu1 %6644  ;;  %v4609_v20 = vld [vmem:[#allocation2 + $0x41] sm:$0xff]  ;;  %v4820_v13 = vsel %vm4818_vm12, %v4813_v5, %v6632_v39 }
 0x516   : > { %v6640_v11 = vpop.permute.xlu0 %6639  ;;  %v10244_v58 = vld [vmem:[#allocation2 + $0x40] sm:$0xff]  ;;  %v6668_v17 = vpack.i.bf16 %v4609_v20, %v10071_v42  ;;  %v4826_v38 = vsel %vm4825_vm13, %v4819_v56, %v6636_v49  ;;  %v6646_v10 = vunpack.i.l.bf16 %v6645_v43  ;;  %v6647_v24 = vunpack.i.h.bf16 %v6645_v43  ;;  %v10673_v56 = vld [vmem:[#allocation51_spill] sm:$0xff] }
 0x517   : > { %v6641_v3 = vunpack.i.l.bf16 %v6640_v11  ;;  %v6663_v40 = vpack.i.bf16 %v10244_v58, %v10054_v2  ;;  %v4615_v41 = vld [vmem:[#allocation2 + $0x42] sm:$0xff]  ;;  %v6642_v45 = vunpack.i.h.bf16 %v6640_v11  ;;  %v4827_v27 = vsel %vm4825_vm13, %v4820_v13, %v6637_v32 }
 0x518   : > { %6669 = vrot.lane.b32.xlu0 %v6668_v17, %s6931_s27  ;;  %v6673_v33 = vpack.i.bf16 %v4615_v41, %v10088_v61 }
 0x519   : > { %v4833_v31 = vsel %vm4832_vm14, %v4826_v38, %v6641_v3  ;;  %6664 = vrot.lane.b32.xlu1 %v6663_v40, %s6932_s28  ;;  %v4834_v14 = vsel %vm4832_vm14, %v4827_v27, %v6642_v45  ;;  %v6655_v40 = vpop.permute.xlu1 %6654 }
 0x51a   : > { %v6650_v42 = vpop.permute.xlu0 %6649  ;;  %v4840_v47 = vsel %vm4839_vm15, %v4833_v31, %v6646_v10  ;;  %v4841_v60 = vsel %vm4839_vm15, %v4834_v14, %v6647_v24  ;;  %v6656_v13 = vunpack.i.l.bf16 %v6655_v40 }
 0x51b   : > { %v6651_v29 = vunpack.i.l.bf16 %v6650_v42  ;;  %v6652_v53 = vunpack.i.h.bf16 %v6650_v42  ;;  %v6456_v48 = vpop.f32.mrf.mxu1 }
 0x51c   : > { %v3253_v62 = vmax.f32 %v10670_v23, %v6456_v48 }
 0x51d   : > { %6674 = vrot.lane.b32.xlu1 %v6673_v33, %s6934_s22  ;;  %v4847_v18 = vsel %vm4846_vm0, %v4840_v47, %v6651_v29  ;;  %v4848_v16 = vsel %vm4846_vm0, %v4841_v60, %v6652_v53  ;;  %v3197_v1 = vpop.f32.mrf.mxu1  ;;  %v4807_v47 = vsel %vm4564_vm10, %v10032_v36, %v6656_v13 }
 0x51e   : > { %4961 = vmatmul.mubr.f32.vlgmr.msra.gmra.mxu1 %v4847_v18  ;;  %v3252_v44 = vmax.f32 %v10669_v6, %v3197_v1  ;;  %v6660_v38 = vpop.permute.xlu0 %6659 }
 0x51f   : > { %6246 = vmatprep.mubr.msk.f32.mxu1 %vm4564_vm10, %v10088_v61  ;;  %v6662_v45 = vunpack.i.h.bf16 %v6660_v38  ;;  %v6661_v31 = vunpack.i.l.bf16 %v6660_v38 }
 0x521   : > { %v4814_v18 = vsel %vm4811_vm11, %v4807_v47, %v6661_v31 }
 0x522   : > { %4966 = vmatmul.mubr.f32.gmra.mxu1 %v4848_v16 }
 0x523   : > { %6247 = vmatprep.mubr.msk.f32.mxu1 %vm4564_vm10, %v4615_v41 }
 0x543   : > { %v6500_v12 = vpop.f32.mrf.mxu0 }
 0x544   : > { %v4518_v54 = vmax.f32 %v3253_v62, %v6500_v12 }
 0x545   : > { %v4462_v28 = vpop.f32.mrf.mxu0 }
 0x546   : > { %v4517_v37 = vmax.f32 %v3252_v44, %v4462_v28 }
 0x548   : > { %v4530_v34 = vmax.f32 %v10222_v59, %v4517_v37  ;;  %v10674_v37 = vld [vmem:[#allocation37_spill] sm:$0xff] }
 0x54a   : > { %v4538_v61 = vmax.f32 %v4530_v34, %v4518_v54  ;;  %v10675_v34 = vld [vmem:[#allocation8_spill] sm:$0xff] }
 0x54c   : > { %v4553_v63 = vadd.f32 %v9959_v19, %v4538_v61 }
 0x54e   : > { %v4561_v22 = vmax.f32 %v4553_v63, 0.0 }
 0x550   : > { %4570 = vst.msk [vmem:[#allocation2 + $0x50] sm:$0xff] %vm4564_vm10, %v4561_v22 }
 0x557   : > { %v4628_v9 = vld [vmem:[#allocation2 + $0x51] sm:$0xff] }
 0x558   : > { %v10271_v51 = vld [vmem:[#allocation2 + $0x50] sm:$0xff]  ;;  %v6683_v15 = vpack.i.bf16 %v4628_v9, %v4609_v20 }
 0x559   : > { %v6678_v35 = vpack.i.bf16 %v10271_v51, %v10244_v58  ;;  %v10275_v8 = vld [vmem:[#allocation2 + $0x52] sm:$0xff] }
 0x55a   : > { %6684 = vrot.lane.b32.xlu1 %v6683_v15, %s6935_s29  ;;  %v6693_v59 = vpack.i.bf16 %v10275_v8, %v4615_v41  ;;  %v6657_v41 = vunpack.i.h.bf16 %v6655_v40  ;;  %v10322_v40 = vld [vmem:[%s10526_s4] ss:$0 sm:$0xff] }
 0x55b   : > { %6679 = vrot.lane.b32.xlu0 %v6678_v35, %s6933_s24  ;;  %v6459_v55 = vpop.f32.mrf.mxu1 }
 0x55c   : > { %v3255_v49 = vmax.f32 %v10672_v0, %v6459_v55  ;;  %v4808_v27 = vsel %vm4564_vm10, %v10054_v2, %v6657_v41 }
 0x55d   : > { %v3207_v26 = vpop.f32.mrf.mxu1  ;;  %v4815_v14 = vsel %vm4811_vm11, %v4808_v27, %v6662_v45 }
 0x55e   : > { %6694 = vrot.lane.b32.xlu1 %v6693_v59, %s6929_s23  ;;  %v3254_v4 = vmax.f32 %v10671_v25, %v3207_v26 }
 0x55f   : > { %6689 = vrot.lane.b32.xlu0 %v6683_v15, %s6930_s14 }
 0x583   : > { %v6503_v30 = vpop.f32.mrf.mxu0 }
 0x584   : > { %v4520_v39 = vmax.f32 %v3255_v49, %v6503_v30 }
 0x585   : > { %v4472_v52 = vpop.f32.mrf.mxu0 }
 0x586   : > { %v4519_v50 = vmax.f32 %v3254_v4, %v4472_v52  ;;  %v10676_v52 = vld [vmem:[#allocation23_spill] sm:$0xff] }
 0x588   : > { %v4531_v20 = vmax.f32 %v4519_v50, %v4520_v39 }
 0x58a   : > { %v6670_v42 = vpop.permute.xlu0 %6669 }
 0x58b   : > { %v6665_v10 = vpop.permute.xlu1 %6664  ;;  %v6671_v60 = vunpack.i.l.bf16 %v6670_v42  ;;  %v6672_v1 = vunpack.i.h.bf16 %v6670_v42 }
 0x58c   : > { %v6666_v29 = vunpack.i.l.bf16 %v6665_v10  ;;  %v6667_v24 = vunpack.i.h.bf16 %v6665_v10 }
 0x58e   : > { %v4821_v12 = vsel %vm4818_vm12, %v4814_v18, %v6666_v29  ;;  %v4822_v36 = vsel %vm4818_vm12, %v4815_v14, %v6667_v24 }
 0x58f   : > { %v6675_v53 = vpop.permute.xlu1 %6674  ;;  %v4828_v15 = vsel %vm4825_vm13, %v4821_v12, %v6671_v60  ;;  %v4829_v26 = vsel %vm4825_vm13, %v4822_v36, %v6672_v1 }
 0x590   : > { %v6676_v23 = vunpack.i.l.bf16 %v6675_v53  ;;  %v6677_v62 = vunpack.i.h.bf16 %v6675_v53 }
 0x592   : > { %v4836_v0 = vsel %vm4832_vm14, %v4829_v26, %v6677_v62 }
 0x59c   : > { %v6462_v7 = vpop.f32.mrf.mxu1 }
 0x59d   : > { %v3257_v54 = vmax.f32 %v10674_v37, %v6462_v7 }
 0x59e   : > { %v3217_v21 = vpop.f32.mrf.mxu1 }
 0x59f   : > { %v3256_v43 = vmax.f32 %v10673_v56, %v3217_v21  ;;  %v4835_v21 = vsel %vm4832_vm14, %v4828_v15, %v6676_v23 }
 0x5b7   : > { %v6506_v57 = vpop.f32.mrf.mxu0 }
 0x5b8   : > { %v4522_v30 = vmax.f32 %v3257_v54, %v6506_v57 }
 0x5b9   : > { %v4482_v11 = vpop.f32.mrf.mxu0 }
 0x5ba   : > { %v4521_v3 = vmax.f32 %v3256_v43, %v4482_v11 }
 0x5bc   : > { %v4539_v17 = vmax.f32 %v4531_v20, %v4521_v3 }
 0x5be   : > { %v4554_v32 = vadd.f32 %v9959_v19, %v4539_v17 }
 0x5c0   : > { %v4562_v5 = vmax.f32 %v4554_v32, 0.0 }
 0x5c2   : > { %4571 = vst.msk [vmem:[#allocation2 + $0x60] sm:$0xff] %vm4564_vm10, %v4562_v5 }
 0x5c4   : > { %v6465_v33 = vpop.f32.mrf.mxu1 }
 0x5c5   : > { %v3259_v25 = vmax.f32 %v10676_v52, %v6465_v33  ;;  %v5028_v52 = vld [vmem:[%s10527_s5 + $0x18] sm:$0xff] }
 0x5c6   : > { %v3227_v6 = vpop.f32.mrf.mxu1  ;;  %6511 = vmatpush3.msra.mxu1 %v5028_v52 }
 0x5c7   : > { %v3258_v61 = vmax.f32 %v10675_v34, %v3227_v6  ;;  %6512 = vmatprep.subr.mxu1 %v10667_v46 }
 0x5c9   : > { %v4611_v16 = vld [vmem:[#allocation2 + $0x61] sm:$0xff] }
 0x5ca   : > { %v4605_v48 = vld [vmem:[#allocation2 + $0x60] sm:$0xff]  ;;  %v6703_v44 = vpack.i.bf16 %v4611_v16, %v4628_v9 }
 0x5cb   : > { %v6698_v28 = vpack.i.bf16 %v4605_v48, %v10271_v51  ;;  %v4617_v11 = vld [vmem:[#allocation2 + $0x62] sm:$0xff] }
 0x5cc   : > { %6704 = vrot.lane.b32.xlu1 %v6703_v44, %s6931_s27  ;;  %v6685_v63 = vpop.permute.xlu1 %6684 }
 0x5cd   : > { %6699 = vrot.lane.b32.xlu0 %v6698_v28, %s6932_s28  ;;  %v6509_v2 = vpop.f32.mrf.mxu0  ;;  %v6680_v22 = vpop.permute.xlu0 %6679  ;;  %v6686_v9 = vunpack.i.l.bf16 %v6685_v63  ;;  %v6687_v49 = vunpack.i.h.bf16 %v6685_v63  ;;  %s323_s28 = sand.u32 1, %s6910_s10  }
 0x5ce   : > { %v6682_v35 = vunpack.i.h.bf16 %v6680_v22  ;;  %v6681_v59 = vunpack.i.l.bf16 %v6680_v22  ;;  %v4524_v50 = vmax.f32 %v3259_v25, %v6509_v2  ;;  %v5027_v25 = vld [vmem:[%s10527_s5 + $0x10] sm:$0xff]  ;;  %s324_s26 = scalar_lea.vmem [#allocation3], %s323_s28  ;;  %s5499_s23 = scalar_lea.sflag [#allocation4], %s323_s28 }
 0x5cf   : > { %v4492_v55 = vpop.f32.mrf.mxu0  ;;  %6513 = vmatpush3.msra.mxu1 %v5027_v25  ;;  %s5511_s21 = sshll.u32 %s324_s26, 4  ;;  %s5512_s21 = int_to_ptr.vmem [resolvable:$true] %s5511_s21 }
 0x5d0   : > { %v4523_v4 = vmax.f32 %v3258_v61, %v4492_v55  ;;  %4771 = vrot.lane.b32.xlu1 %v4605_v48, %s6933_s24  ;;  %v4842_v7 = vsel %vm4839_vm15, %v4835_v21, %v6681_v59  ;;  %v4843_v57 = vsel %vm4839_vm15, %v4836_v0, %v6682_v35  ;;  %6514 = vmatprep.subr.mxu1 %v10667_v46  ;;  %v5025_v21 = vld [vmem:[%s10527_s5] sm:$0xff]  ;;  %s6858_s14 = scalar_lea.vmem %s5512_s21, 16 }
 0x5d1   : > { %4747 = vrot.lane.b32.xlu0 %v10275_v8, %s6934_s22  ;;  %v4849_v56 = vsel %vm4846_vm0, %v4842_v7, %v6686_v9  ;;  %v4850_v3 = vsel %vm4846_vm0, %v4843_v57, %v6687_v49  ;;  %v6265_v7 = vld [vmem:[%s10527_s5 + $0x78] sm:$0xff]  ;;  %v6690_v0 = vpop.permute.xlu0 %6689  ;;  %v6695_v49 = vpop.permute.xlu1 %6694  ;;  %p6859_p11 = scmp.ne.s32.totalorder %s5512_s21, %s6858_s14 }
 0x5d2   : > { %v4532_v39 = vmax.f32 %v4522_v30, %v4523_v4  ;;  %4971 = vmatmul.mubr.f32.gmra.mxu1 %v4849_v56  ;;  %v5026_v4 = vld [vmem:[%s10527_s5 + $0x8] sm:$0xff]  ;;  %6544 = vmatpush3.msra.mxu0 %v6265_v7 }
 0x5d3   : > { %6248 = vmatprep.mubr.msk.f32.mxu1 %vm4564_vm10, %v10275_v8  ;;  %6515 = vmatpush3.msra.mxu1 %v5026_v4  ;;  %p6860_p12 = pnand %p6859_p11, %p7026_p5 }
 0x5d4   : > { %v4540_v43 = vmax.f32 %v4532_v39, %v4524_v50  ;;  %4749 = vrot.lane.b32.xlu1 %v4617_v11, %s6934_s22  ;;  %6516 = vmatprep.subr.mxu1 %v10667_v46  ;;  %v6691_v50 = vunpack.i.l.bf16 %v6690_v0  ;;  %v6696_v39 = vunpack.i.l.bf16 %v6695_v49 }
 0x5d5   : > { %4795 = vrot.lane.b32.xlu0 %v4611_v16, %s6935_s29  ;;  %6517 = vmatpush3.msra.mxu1 %v5025_v21  ;;  %p6861_p13 = pneg %p6860_p12 }
 0x5d6   : > { %v4555_v20 = vadd.f32 %v9959_v19, %v4540_v43  ;;  %4976 = vmatmul.mubr.f32.gmra.mxu1 %v4850_v3  ;;  %6521 = vmatprep.subr.mxu1 %v10667_v46  ;;  %v4809_v56 = vsel %vm4564_vm10, %v10244_v58, %v6691_v50  ;;  %v6254_v50 = vld [vmem:[%s10527_s5 + $0x30] sm:$0xff] }
 0x5d7   : > { %6249 = vmatprep.mubr.msk.f32.mxu1 %vm4564_vm10, %v4617_v11  ;;  %6545 = vmatprep.subr.mxu0 %v10667_v46  ;;  %v4816_v3 = vsel %vm4811_vm11, %v4809_v56, %v6696_v39  ;;  %v6252_v39 = vld [vmem:[%s10527_s5 + $0x20] sm:$0xff] }
 0x5d8   : > { %v4563_v17 = vmax.f32 %v4555_v20, 0.0 }
 0x5da   : > { %4572 = vst.msk [vmem:[#allocation2 + $0x70] sm:$0xff] %vm4564_vm10, %v4563_v17 }
 0x5de   : > { %v4962_v8 = vpop.f32.mrf.mxu1 }
 0x5df   : > { %v4963_v32 = vadd.f32 %v10322_v40, %v4962_v8 }
 0x5e0   : > { %v4964_v5 = vpop.f32.mrf.mxu1 }
 0x5e1   : > { %v4630_v19 = vld [vmem:[#allocation2 + $0x71] sm:$0xff]  ;;  %v4991_v10 = vmax.f32 %v4963_v32, 0.0 }
 0x5e2   : > { %v4624_v38 = vld [vmem:[#allocation2 + $0x70] sm:$0xff]  ;;  %4797 = vrot.lane.b32.xlu1 %v4630_v19, %s6935_s29  ;;  %v4967_v41 = vpop.f32.mrf.mxu1 }
 0x5e3   : > { %4773 = vrot.lane.b32.xlu0 %v4624_v38, %s6933_s24  ;;  %v4999_v13 = vsel %vm4998_vm1, %v4991_v10, -inf  ;;  %v5104_v45 = vsel %vm5103_vm2, %v4991_v10, -inf  ;;  %v4968_v31 = vadd.f32 %v10322_v40, %v4967_v41  ;;  %v6692_v41 = vunpack.i.h.bf16 %v6690_v0  ;;  %v6255_v0 = vld [vmem:[%s10527_s5 + $0x38] sm:$0xff]  ;;  %s6268_s24 = sshll.u32 %s7009_s13, 4  ;;  %s6937_s13 = smov [#allocation3]  }
 0x5e4   : > { %v5000_v42 = vrot.slane %v4999_v13, 4  ;;  %v5105_v29 = vrot.slane %v5104_v45, 4  ;;  %v4969_v33 = vpop.f32.mrf.mxu1  ;;  %s10487_s25 = scalar_lea.hbm %s10531_s9, %s6268_s24  ;;  %s6862_s27 = sshll.u32 %s6937_s13, 4  ;;  %s6863_s27 = int_to_ptr.vmem [resolvable:$false] %s6862_s27 }
 0x5e5   : > { %v4992_v24 = vmax.f32 %v4968_v31, 0.0  ;;  %v4810_v31 = vsel %vm4564_vm10, %v10271_v51, %v6692_v41  ;;  %s6864_s16 = scalar_lea.vmem %s6863_s27, 32  ;;  %p6865_p0 = scmp.lt.s32.totalorder %s5512_s21, %s6863_s27 }
 0x5e6   : > { %v5001_v47 = vmax.f32 %v4999_v13, %v5000_v42  ;;  %v5106_v27 = vmax.f32 %v5104_v45, %v5105_v29  ;;  %v4636_v13 = vld [vmem:[#allocation2 + $0x72] sm:$0xff]  ;;  %v6697_v45 = vunpack.i.h.bf16 %v6695_v49  ;;  %p6866_p1 = scmp.lt.s32.totalorder %s6864_s16, %s6858_s14 }
 0x5e7   : > { %v5006_v53 = vsel %vm4998_vm1, %v4992_v24, -inf  ;;  %v5111_v18 = vsel %vm5103_vm2, %v4992_v24, -inf }
 0x5e8   : > { %v5002_v14 = vrot.slane %v5001_v47, 2  ;;  %v5107_v60 = vrot.slane %v5106_v27, 2  ;;  %v5007_v16 = vrot.slane %v5006_v53, 4  ;;  %v5112_v48 = vrot.slane %v5111_v18, 4  ;;  %p6867_p2 = por %p6866_p1, %p6865_p0 }
 0x5e9   : > { %v4817_v33 = vsel %vm4811_vm11, %v4810_v31, %v6697_v45 }
 0x5ea   : > { %v5003_v1 = vmax.f32 %v5001_v47, %v5002_v14  ;;  %v5108_v12 = vmax.f32 %v5106_v27, %v5107_v60  ;;  %v5008_v6 = vmax.f32 %v5006_v53, %v5007_v16  ;;  %v5113_v44 = vmax.f32 %v5111_v18, %v5112_v48  ;;  %p6868_p3 = pnand %p6867_p2, %p6861_p13 }
 0x5ec   : > { %v5004_v28 = vrot.slane %v5003_v1, 1  ;;  %v5109_v36 = vrot.slane %v5108_v12, 1  ;;  %v5009_v23 = vrot.slane %v5008_v6, 2  ;;  %v5114_v62 = vrot.slane %v5113_v44, 2 }
 0x5ee   : > { %v5010_v2 = vmax.f32 %v5008_v6, %v5009_v23  ;;  %v5115_v37 = vmax.f32 %v5113_v44, %v5114_v62  ;;  %v5005_v54 = vmax.f32 %v5003_v1, %v5004_v28  ;;  %v5110_v34 = vmax.f32 %v5108_v12, %v5109_v36 }
 0x5f0   : > { %v5011_v61 = vrot.slane %v5010_v2, 1  ;;  %v5116_v63 = vrot.slane %v5115_v37, 1  ;;  %v10333_v9 = vsel %vm4811_vm11, %v5005_v54, -inf  ;;  %v10336_v35 = vsel %vm4811_vm11, %v5110_v34, -inf  ;;  %v6264_v54 = vld [vmem:[%s10527_s5 + $0x70] sm:$0xff]  ;;  %v6263_v34 = vld [vmem:[%s10527_s5 + $0x68] sm:$0xff] }
 0x5f1   : > { %6546 = vmatpush3.msra.mxu0 %v6264_v54 }
 0x5f2   : > { %v5012_v22 = vmax.f32 %v5010_v2, %v5011_v61  ;;  %v5117_v15 = vmax.f32 %v5115_v37, %v5116_v63  ;;  %6547 = vmatprep.subr.mxu0 %v10667_v46 }
 0x5f3   : > { %6548 = vmatpush3.msra.mxu0 %v6263_v34 }
 0x5f4   : > { %v10339_v59 = vsel %vm4811_vm11, %v5012_v22, -inf  ;;  %v10342_v55 = vsel %vm4811_vm11, %v5117_v15, -inf  ;;  %6549 = vmatprep.subr.mxu0 %v10667_v46 }
 0x5f5   : > { %v5023_v26 = vmax.f32 %v10333_v9, %v10339_v59  ;;  %v5128_v30 = vmax.f32 %v10336_v35, %v10342_v55  ;;  %v6253_v9 = vld [vmem:[%s10527_s5 + $0x28] sm:$0xff]  ;;  %v6262_v59 = vld [vmem:[%s10527_s5 + $0x60] sm:$0xff] }
 0x5f6   : > { %6550 = vmatpush3.msra.mxu0 %v6262_v59  ;;  %v6258_v35 = vld [vmem:[%s10527_s5 + $0x48] sm:$0xff]  ;;  %v6257_v55 = vld [vmem:[%s10527_s5 + $0x40] sm:$0xff] }
 0x63e   : > { %v6705_v57 = vpop.permute.xlu1 %6704 }
 0x63f   : > { %v6700_v43 = vpop.permute.xlu0 %6699  ;;  %v6706_v11 = vunpack.i.l.bf16 %v6705_v57  ;;  %v6707_v29 = vunpack.i.h.bf16 %v6705_v57  ;;  %v6260_v57 = vld [vmem:[%s10527_s5 + $0x58] sm:$0xff] }
 0x640   : > { %v6701_v20 = vunpack.i.l.bf16 %v6700_v43  ;;  %v6702_v42 = vunpack.i.h.bf16 %v6700_v43  ;;  %v6259_v43 = vld [vmem:[%s10527_s5 + $0x50] sm:$0xff] }
 0x642   : > { %v4823_v17 = vsel %vm4818_vm12, %v4816_v3, %v6701_v20  ;;  %v4772_v5 = vpop.permute.xlu1 %4771  ;;  %v4824_v47 = vsel %vm4818_vm12, %v4817_v33, %v6702_v42 }
 0x643   : > { %v4748_v8 = vpop.permute.xlu0 %4747  ;;  %v4830_v32 = vsel %vm4825_vm13, %v4823_v17, %v6706_v11  ;;  %v4831_v27 = vsel %vm4825_vm13, %v4824_v47, %v6707_v29 }
 0x644   : > { %v4837_v19 = vsel %vm4832_vm14, %v4830_v32, %v4748_v8 }
 0x645   : > { %v4844_v10 = vsel %vm4839_vm15, %v4837_v19, %v4772_v5 }
 0x646   : > { %v4750_v24 = vpop.permute.xlu1 %4749 }
 0x647   : > { %v4796_v38 = vpop.permute.xlu0 %4795  ;;  %v4838_v53 = vsel %vm4832_vm14, %v4831_v27, %v4750_v24 }
 0x648   : > { %v4851_v58 = vsel %vm4846_vm0, %v4844_v10, %v4796_v38 }
 0x649   : > { %4981 = vmatmul.mubr.f32.gmra.mxu1 %v4851_v58 }
 0x64a   : > { %6250 = vmatprep.mubr.msk.f32.mxu1 %vm4564_vm10, %v4636_v13 }
 0x654   : > { %v4798_v18 = vpop.permute.xlu1 %4797 }
 0x655   : > { %v4774_v14 = vpop.permute.xlu0 %4773 }
 0x656   : > { %v4845_v60 = vsel %vm4839_vm15, %v4838_v53, %v4774_v14 }
 0x657   : > { %v4852_v16 = vsel %vm4846_vm0, %v4845_v60, %v4798_v18 }
 0x658   : > { %4986 = vmatmul.mubr.f32.gmra.mxu1 %v4852_v16 }
 0x659   : > { %6518 = vmatprep.mubr.msk.f32.mxu1 %vm6936_vm3, %v10667_v46 }
 0x692   : > { %v4972_v51 = vpop.f32.mrf.mxu1 }
 0x693   : > { %v4973_v48 = vadd.f32 %v10322_v40, %v4972_v51 }
 0x694   : > { %v4974_v1 = vpop.f32.mrf.mxu1 }
 0x695   : > { %v4993_v12 = vmax.f32 %v4973_v48, 0.0 }
 0x696   : > { %v4977_v6 = vpop.f32.mrf.mxu1 }
 0x697   : > { %v5013_v44 = vsel %vm4998_vm1, %v4993_v12, -inf  ;;  %v5118_v28 = vsel %vm5103_vm2, %v4993_v12, -inf }
 0x698   : > { %v5014_v36 = vrot.slane %v5013_v44, 4  ;;  %v5119_v23 = vrot.slane %v5118_v28, 4  ;;  %v4979_v62 = vpop.f32.mrf.mxu1 }
 0x69a   : > { %v5015_v2 = vmax.f32 %v5013_v44, %v5014_v36  ;;  %v5120_v37 = vmax.f32 %v5118_v28, %v5119_v23 }
 0x69c   : > { %v5016_v61 = vrot.slane %v5015_v2, 2  ;;  %v5121_v63 = vrot.slane %v5120_v37, 2 }
 0x69e   : > { %v5017_v22 = vmax.f32 %v5015_v2, %v5016_v61  ;;  %v5122_v15 = vmax.f32 %v5120_v37, %v5121_v63 }
 0x6a0   : > { %v5018_v52 = vrot.slane %v5017_v22, 1  ;;  %v5123_v4 = vrot.slane %v5122_v15, 1 }
 0x6a2   : > { %v5019_v25 = vmax.f32 %v5017_v22, %v5018_v52  ;;  %v5124_v49 = vmax.f32 %v5122_v15, %v5123_v4 }
 0x6a4   : > { %v5022_v21 = vsel %vm4811_vm11, %v5019_v25, -inf }
 0x6a5   : > { %v5024_v7 = vmax.f32 %v5023_v26, %v5022_v21  ;;  %v5127_v26 = vsel %vm4811_vm11, %v5124_v49, -inf }
 0x6a6   : > { %v5129_v56 = vmax.f32 %v5128_v30, %v5127_v26  ;;  %v4978_v30 = vadd.f32 %v10322_v40, %v4977_v6 }
 0x6a7   : > { %6519 = vmatmul.mubr.msk.f32.vlgmr.msra.gmra.mxu1 %vm4811_vm11, %v5024_v7 }
 0x6a8   : > { %6522 = vmatpush3.msra.mxu1 %v6255_v0  ;;  %6529 = vmatprep.mubr.msk.f32.mxu1 %vm6936_vm3, %v10667_v46  ;;  %v4994_v11 = vmax.f32 %v4978_v30, 0.0 }
 0x6a9   : > { %6523 = vmatprep.subr.mxu1 %v10667_v46 }
 0x6aa   : > { %6524 = vmatpush3.msra.mxu1 %v6254_v50  ;;  %v5209_v8 = vsel %vm4998_vm1, %v4994_v11, -inf  ;;  %v5314_v32 = vsel %vm5103_vm2, %v4994_v11, -inf  ;;  %v4997_v11 = vld [vmem:[%s10528_s6] sm:$0x1] }
 0x6ab   : > { %6525 = vmatprep.subr.mxu1 %v10667_v46  ;;  %v5210_v10 = vrot.slane %v5209_v8, 4  ;;  %v5315_v41 = vrot.slane %v5314_v32, 4 }
 0x6ac   : > { %6526 = vmatpush3.msra.mxu1 %v6253_v9 }
 0x6ad   : > { %6527 = vmatprep.subr.mxu1 %v10667_v46  ;;  %v5211_v42 = vmax.f32 %v5209_v8, %v5210_v10  ;;  %v5316_v29 = vmax.f32 %v5314_v32, %v5315_v41  ;;  %v5421_v8 = vld [vmem:[%s10529_s7 + $0x8] sm:$0xff]  ;;  %v5420_v32 = vld [vmem:[%s10529_s7] sm:$0xff] }
 0x6ae   : > { %6528 = vmatpush3.msra.mxu1 %v6252_v39 }
 0x6af   : > { %6530 = vmatmul.mubr.msk.f32.vlgmr.msra.gmra.mxu1 %vm4811_vm11, %v5129_v56  ;;  %6532 = vmatprep.subr.mxu1 %v10667_v46  ;;  %v5212_v47 = vrot.slane %v5211_v42, 2  ;;  %v5317_v27 = vrot.slane %v5316_v29, 2 }
 0x6b0   : > { %6533 = vmatpush3.msra.mxu1 %v6260_v57  ;;  %6540 = vmatprep.mubr.msk.f32.mxu1 %vm6936_vm3, %v10667_v46 }
 0x6b1   : > { %6534 = vmatprep.subr.mxu1 %v10667_v46  ;;  %v5213_v48 = vmax.f32 %v5211_v42, %v5212_v47  ;;  %v5318_v1 = vmax.f32 %v5316_v29, %v5317_v27 }
 0x6b2   : > { %6535 = vmatpush3.msra.mxu1 %v6259_v43 }
 0x6b3   : > { %6536 = vmatprep.subr.mxu1 %v10667_v46  ;;  %v5214_v62 = vrot.slane %v5213_v48, 1  ;;  %v5319_v2 = vrot.slane %v5318_v1, 1 }
 0x6b4   : > { %6537 = vmatpush3.msra.mxu1 %v6258_v35 }
 0x6b5   : > { %6538 = vmatprep.subr.mxu1 %v10667_v46  ;;  %v5215_v22 = vmax.f32 %v5213_v48, %v5214_v62  ;;  %v5320_v15 = vmax.f32 %v5318_v1, %v5319_v2 }
 0x6b6   : > { %6539 = vmatpush3.msra.mxu1 %v6257_v55 }
 0x6b7   : > { %6554 = vmatprep.subr.mxu1 %v10667_v46  ;;  %v5230_v49 = vsel %vm4811_vm11, %v5215_v22, -inf  ;;  %v5335_v50 = vsel %vm4811_vm11, %v5320_v15, -inf }
 0x709   : > { %v4982_v20 = vpop.f32.mrf.mxu1 }
 0x70a   : > { %v4983_v3 = vadd.f32 %v10322_v40, %v4982_v20 }
 0x70b   : > { %v4984_v17 = vpop.f32.mrf.mxu1 }
 0x70c   : > { %v4995_v5 = vmax.f32 %v4983_v3, 0.0 }
 0x70e   : > { %v5216_v19 = vsel %vm4998_vm1, %v4995_v5, -inf  ;;  %v5321_v38 = vsel %vm5103_vm2, %v4995_v5, -inf }
 0x70f   : > { %v5217_v58 = vrot.slane %v5216_v19, 4  ;;  %v5322_v13 = vrot.slane %v5321_v38, 4 }
 0x711   : > { %v5218_v45 = vmax.f32 %v5216_v19, %v5217_v58  ;;  %v5323_v31 = vmax.f32 %v5321_v38, %v5322_v13 }
 0x713   : > { %v5219_v33 = vrot.slane %v5218_v45, 2  ;;  %v5324_v24 = vrot.slane %v5323_v31, 2 }
 0x715   : > { %v5220_v14 = vmax.f32 %v5218_v45, %v5219_v33  ;;  %v5325_v60 = vmax.f32 %v5323_v31, %v5324_v24  ;;  %v5422_v31 = vld [vmem:[%s10530_s8] sm:$0x1] }
 0x717   : > { %v5221_v44 = vrot.slane %v5220_v14, 1  ;;  %v5326_v28 = vrot.slane %v5325_v60, 1 }
 0x718   : > { %v4987_v53 = vpop.f32.mrf.mxu1 }
 0x719   : > { %v4988_v18 = vadd.f32 %v10322_v40, %v4987_v53  ;;  %v5222_v34 = vmax.f32 %v5220_v14, %v5221_v44  ;;  %v5327_v40 = vmax.f32 %v5325_v60, %v5326_v28 }
 0x71a   : > { %v4989_v16 = vpop.f32.mrf.mxu1 }
 0x71b   : > { %v4996_v51 = vmax.f32 %v4988_v18, 0.0  ;;  %v5231_v4 = vsel %vm4811_vm11, %v5222_v34, -inf  ;;  %v5336_v21 = vsel %vm4811_vm11, %v5327_v40, -inf }
 0x71c   : > { %v5233_v26 = vmax.f32 %v5230_v49, %v5231_v4  ;;  %v5338_v39 = vmax.f32 %v5335_v50, %v5336_v21 }
 0x71d   : > { %v5223_v12 = vsel %vm4998_vm1, %v4996_v51, -inf  ;;  %v5328_v6 = vsel %vm5103_vm2, %v4996_v51, -inf }
 0x71e   : > { %v5224_v36 = vrot.slane %v5223_v12, 4  ;;  %v5329_v23 = vrot.slane %v5328_v6, 4 }
 0x720   : > { %v5225_v37 = vmax.f32 %v5223_v12, %v5224_v36  ;;  %v5330_v54 = vmax.f32 %v5328_v6, %v5329_v23 }
 0x722   : > { %v5226_v61 = vrot.slane %v5225_v37, 2  ;;  %v5331_v63 = vrot.slane %v5330_v54, 2 }
 0x724   : > { %v5227_v52 = vmax.f32 %v5225_v37, %v5226_v61  ;;  %v5332_v25 = vmax.f32 %v5330_v54, %v5331_v63 }
 0x726   : > { %v5228_v7 = vrot.slane %v5227_v52, 1  ;;  %v5333_v0 = vrot.slane %v5332_v25, 1 }
 0x728   : > { %v5229_v9 = vmax.f32 %v5227_v52, %v5228_v7  ;;  %v5334_v59 = vmax.f32 %v5332_v25, %v5333_v0 }
 0x72a   : > { %v5232_v56 = vsel %vm4811_vm11, %v5229_v9, -inf  ;;  %v5337_v57 = vsel %vm4811_vm11, %v5334_v59, -inf }
 0x72b   : > { %v5234_v43 = vmax.f32 %v5233_v26, %v5232_v56  ;;  %v5339_v35 = vmax.f32 %v5338_v39, %v5337_v57 }
 0x72d   : > { %6541 = vmatmul.mubr.msk.f32.vlgmr.msra.gmra.mxu1 %vm4811_vm11, %v5234_v43  ;;  %6552 = vmatmul.mubr.msk.f32.vlgmr.msra.gmra.mxu0 %vm4811_vm11, %v5339_v35 }
 0x72e   : > { %6558 = vmatprep.mubr.msk.f32.mxu1 %vm6936_vm3, %v10667_v46  ;;  %6555 = vmatpush3.msra.mxu1 %v5421_v8 }
 0x72f   : > { %6556 = vmatprep.subr.mxu1 %v10667_v46 }
 0x730   : > { %6557 = vmatpush3.msra.mxu1 %v5420_v32 }
 0x767   : > { %v5098_v55 = vpop.f32.mrf.mxu1 }
 0x768   : > { %v5102_v20 = vadd.f32 %v5098_v55, %v4997_v11 }
 0x769   : > { %v6520_v30 = vpop.f32.mrf.mxu1 }
 0x76f   : > { %v5204_v3 = vpop.f32.mrf.mxu1 }
 0x770   : > { %v5208_v17 = vadd.f32 %v5204_v3, %v5102_v20 }
 0x771   : > { %v6531_v5 = vpop.f32.mrf.mxu1 }
 0x7ed   : > { %v5309_v19 = vpop.f32.mrf.mxu1  ;;  %v5414_v38 = vpop.f32.mrf.mxu0 }
 0x7ee   : > { %v5313_v10 = vadd.f32 %v5309_v19, %v5208_v17 }
 0x7ef   : > { %v6542_v41 = vpop.f32.mrf.mxu1  ;;  %v6553_v58 = vpop.f32.mrf.mxu0 }
 0x7f0   : > { %v5418_v13 = vadd.f32 %v5414_v38, %v5313_v10 }
 0x7f2   : > { %v5419_v45 = vmax.f32 %v5418_v13, 0.0 }
 0x7f4   : > { %6559 = vmatmul.mubr.msk.f32.vlgmr.msra.gmra.mxu1 %vm4564_vm10, %v5419_v45 }
 0x8b4   : > { %v5492_v46 = vpop.f32.mrf.mxu1 }
 0x8b5   : > { %v5493_v42 = vadd.f32 %v5492_v46, %v5422_v31 }
 0x8b6   : > { %v6560_v29 = vpop.f32.mrf.mxu1 }
 0x8b7   : > { %5497 = vst.msk [vmem:[%s324_s26] sm:$0x1] %vm5496_vm4, %v5493_v42 }
 0x8b8   : > { %6871 = shalt.err (!%p6868_p3)
}
 0x8b9   : > { %s6872_s17 = scalar_lea.hbm %s10487_s25, 16  ;;  %s6876_s26 = scalar_lea.hbm %s10531_s9, 32 }
 0x8ba   : > { %p6873_p4 = scmp.ne.s32.totalorder %s10487_s25, %s6872_s17  ;;  %p6877_p9 = scmp.lt.s32.totalorder %s10487_s25, %s10531_s9 }
 0x8bb   : > { %p6878_p10 = scmp.lt.s32.totalorder %s6876_s26, %s6872_s17 }
 0x8bc   : > { %p6874_p7 = pnand %p6873_p4, %p7026_p5 }
 0x8bd   : > { %p6879_p11 = por %p6878_p10, %p6877_p9 }
 0x8be   : > { %p6875_p8 = pneg %p6874_p7 }
 0x8c0   : > { %p6880_p12 = pnand %p6879_p11, %p6875_p8 }
 0x8c2   : > { %6883 = shalt.err (!%p6880_p12)
}
 0x8c3   : > { %6562 = dma.vmem_to_hbm [thread:$0]  (%p7026_p5), %s5512_s21, 16, %s10487_s25, %s5499_s23  }
 0x8c4 PF: > { %p6568_p13 = scmp.ge.s32.totalorder %s6918_s12, 2  ;;  %s5523_s14 = sand.u32 1, %s6906_s30  }
 0x8c5   : > { %s5524_s13 = scalar_lea.sflag [#allocation4], %s5523_s14 }
 0x8c6   : > { %p6565_p0 = pnand %p6568_p13, %p7030_p6 }
 0x8c8   : > { %p6566_p1 = pneg %p6565_p0 }
 0x8ca   : > { %6901 = dma.done.wait (%p6566_p1), %s5524_s13, 16  }
 0x8cb   : > { %6903 = vsyncadd (%p6566_p1), %s5524_s13, 4294967280  ;;  %p19_p2 = scmp.ge.s32.totalorder %s7013_s15, 4   ;;  %s10677_s30 = smov %s6910_s10 }
 0x8cc   : > { %s10678_s10 = smov %s6914_s11  ;;  %s10679_s11 = smov %s7024_s18 }
 0x8cd   : > { %s10680_s12 = smov %s7013_s15  ;;  %21 = sbr.rel (!%p19_p2) target bundleno = 3 (0x3), region = 455 }
 0x8d2   :  { %5528 = vsyncpa [#allocation4], 1 }
 0x8d3   :  { %5530 = vsyncpa [#allocation4 + $0x1], 1 }

</bundles_post_ra>
